<compile_context>
chip_gen: v6e
topology: v6e:2x2x1
jax: 0.10.0
libtpu: 0.0.40
codegen_flags: <defaults>
</compile_context>

<pallas_src>
import math

import jax
import jax.numpy as jnp
from jax.experimental import pallas as pl
from jax.experimental.pallas import tpu as pltpu


# ----------------------------------------------------------------------------- #
# Shared compiler params
# ----------------------------------------------------------------------------- #
def _cparams(dim_sem):
    # Explicit VMEM budget (fits v7x's 64 MiB physical with headroom; demo usage
    # is far below this). dimension_semantics lets Mosaic shard "parallel" axes
    # across both TensorCores on v7x.
    return pltpu.CompilerParams(
        dimension_semantics=dim_sem,
        vmem_limit_bytes=48 * 1024 * 1024,
    )


# ----------------------------------------------------------------------------- #
# Pallas kernels
# ----------------------------------------------------------------------------- #
def _avgpool_kernel(a_ref, b_ref, c_ref, d_ref, o_ref):
    # Four 2x2 corners, each (TM, Wo*C): lane dim is Wo*C (lane-dense stores).
    s = (a_ref[...] + b_ref[...] + c_ref[...] + d_ref[...]) * 0.25
    o_ref[...] = s.astype(o_ref.dtype)


def _conv3x3_s2_row_kernel(xe01_ref, xe2_ref, xo01_ref, xo2_ref, w_ref, b_ref, o_ref):
    # One output row (Wo, Cout) per grid step.
    #   xe01: (2, Wp, Cin)  even padded-column phase, padded rows 2h, 2h+1
    #   xe2:  (Wp, Cin)     even padded-column phase, padded row  2h+2
    #   xo01 / xo2: same for the odd padded-column phase
    #   w: (3, 3, Cin, Cout) bf16, b: (1, Cout) f32
    Wo, Cout = o_ref.shape
    acc = jnp.zeros((Wo, Cout), jnp.float32)
    rows_e = (xe01_ref[0], xe01_ref[1], xe2_ref[...])
    rows_o = (xo01_ref[0], xo01_ref[1], xo2_ref[...])
    for kh in range(3):
        re = rows_e[kh]           # (Wp, Cin), Wp = Wo + 1
        ro = rows_o[kh]
        # kw=0 -> even cols, offset 0 ; kw=1 -> odd cols, offset 0 ; kw=2 -> even cols, offset 1
        acc += jnp.dot(re[0:Wo, :], w_ref[kh, 0], preferred_element_type=jnp.float32)
        acc += jnp.dot(ro[0:Wo, :], w_ref[kh, 1], preferred_element_type=jnp.float32)
        acc += jnp.dot(re[1:Wo + 1, :], w_ref[kh, 2], preferred_element_type=jnp.float32)
    o_ref[...] = jnp.maximum(acc + b_ref[...], 0.0).astype(o_ref.dtype)


def _fc_head_kernel(x_ref, w1_ref, b1_ref, w2_ref, b2_ref, o_ref, acc_ref):
    # Fused fc1(+ReLU) + fc2(+softmax), K-streamed over fc_in.
    k = pl.program_id(0)

    @pl.when(k == 0)
    def _():
        acc_ref[...] = jnp.zeros_like(acc_ref)

    acc_ref[...] += jnp.dot(x_ref[...], w1_ref[...], preferred_element_type=jnp.float32)

    @pl.when(k == pl.num_programs(0) - 1)
    def _():
        h = jnp.maximum(acc_ref[...] + b1_ref[...], 0.0)              # (B, 128) f32
        logits = jnp.dot(h, w2_ref[...], preferred_element_type=jnp.float32) + b2_ref[...]
        m = jnp.max(logits, axis=-1, keepdims=True)
        e = jnp.exp(logits - m)
        o_ref[...] = (e / jnp.sum(e, axis=-1, keepdims=True)).astype(o_ref.dtype)


# ----------------------------------------------------------------------------- #
# Layer wrappers (glue: layout shuffles / pad / phase split only)
# ----------------------------------------------------------------------------- #
def avgpool2x2(x_nhwc, out_dtype=jnp.bfloat16):
    """nn.AvgPool2d(kernel_size=2, stride=2) on NHWC input (lane-dense Pallas kernel)."""
    N, H, W, C = x_nhwc.shape
    Ho, Wo = H // 2, W // 2
    x = x_nhwc[:, : 2 * Ho, : 2 * Wo, :]
    corners = [x[:, 0::2, 0::2, :], x[:, 0::2, 1::2, :],
               x[:, 1::2, 0::2, :], x[:, 1::2, 1::2, :]]
    R, L = N * Ho, Wo * C                       # lane dim = Wo*C (dense stores)
    corners = [c.reshape(R, L) for c in corners]
    TM = min(R, 1024)
    spec = pl.BlockSpec((TM, L), lambda i: (i, 0))
    out = pl.pallas_call(
        _avgpool_kernel,
        out_shape=jax.ShapeDtypeStruct((R, L), out_dtype),
        grid=(pl.cdiv(R, TM),),
        in_specs=[spec] * 4,
        out_specs=spec,
        compiler_params=_cparams(("parallel",)),
    )(*corners)
    return out.reshape(N, Ho, Wo, C)


def conv3x3_s2_p1_relu(x_nhwc, w_oihw, b, out_dtype=jnp.bfloat16):
    """relu(Conv2d(kernel=3, stride=2, padding=1)) as a direct Pallas conv.

    The padded input is split (once, 1x traffic) into even/odd column phases so
    the stride-2 window gather becomes contiguous slices inside the kernel; the
    row halo is provided by a second BlockSpec over the *same* array.
    """
    N, H, W, Cin = x_nhwc.shape
    assert H % 2 == 0 and W % 2 == 0, "conv inputs must have even spatial dims"
    Cout = w_oihw.shape[0]
    Ho, Wo = H // 2, W // 2
    Wp = Wo + 1

    xb = x_nhwc.astype(jnp.bfloat16)
    xp = jnp.pad(xb, ((0, 0), (1, 1), (1, 1), (0, 0)))   # (N, H+2, W+2, Cin)
    xpe = xp[:, :, 0::2, :]                              # (N, H+2, Wp, Cin) even padded cols
    xpo = xp[:, :, 1::2, :]                              # (N, H+2, Wp, Cin) odd  padded cols

    wt = jnp.transpose(w_oihw, (2, 3, 1, 0)).astype(jnp.bfloat16)   # (3, 3, Cin, Cout)
    b2 = b.reshape(1, Cout).astype(jnp.float32)

    row01_spec = pl.BlockSpec((None, 2, Wp, Cin), lambda n, h: (n, h, 0, 0))        # rows 2h, 2h+1
    row2_spec = pl.BlockSpec((None, None, Wp, Cin), lambda n, h: (n, 2 * h + 2, 0, 0))  # row 2h+2
    w_spec = pl.BlockSpec((3, 3, Cin, Cout), lambda n, h: (0, 0, 0, 0))
    b_spec = pl.BlockSpec((1, Cout), lambda n, h: (0, 0))
    out_spec = pl.BlockSpec((None, None, Wo, Cout), lambda n, h: (n, h, 0, 0))

    return pl.pallas_call(
        _conv3x3_s2_row_kernel,
        out_shape=jax.ShapeDtypeStruct((N, Ho, Wo, Cout), out_dtype),
        grid=(N, Ho),
        in_specs=[row01_spec, row2_spec, row01_spec, row2_spec, w_spec, b_spec],
        out_specs=out_spec,
        compiler_params=_cparams(("parallel", "parallel")),
    )(xpe, xpe, xpo, xpo, wt, b2)


def fc_head(x, w1, b1, w2, b2):
    """softmax(relu(x @ w1 + b1) @ w2 + b2) as one K-streamed Pallas kernel."""
    B, K = x.shape
    Kw, H1 = w1.shape
    assert K == Kw
    D = w2.shape[1]
    TK = K
    for cand in (1024, 512, 256, 128):
        if K % cand == 0:
            TK = cand
            break
    return pl.pallas_call(
        _fc_head_kernel,
        out_shape=jax.ShapeDtypeStruct((B, D), jnp.float32),
        grid=(K // TK,),
        in_specs=[
            pl.BlockSpec((B, TK), lambda k: (0, k)),
            pl.BlockSpec((TK, H1), lambda k: (k, 0)),
            pl.BlockSpec((1, H1), lambda k: (0, 0)),
            pl.BlockSpec((H1, D), lambda k: (0, 0)),
            pl.BlockSpec((1, D), lambda k: (0, 0)),
        ],
        out_specs=pl.BlockSpec((B, D), lambda k: (0, 0)),
        scratch_shapes=[pltpu.VMEM((B, H1), jnp.float32)],
        compiler_params=_cparams(("arbitrary",)),
    )(x.astype(jnp.bfloat16), w1.astype(jnp.bfloat16),
      b1.reshape(1, H1).astype(jnp.float32),
      w2.astype(jnp.float32), b2.reshape(1, D).astype(jnp.float32))


# ----------------------------------------------------------------------------- #
# Parameter init (deterministic, PyTorch-default-style uniform(-1/sqrt(fan_in), ..))
# ----------------------------------------------------------------------------- #
def _uinit(key, shape, fan_in):
    bound = 1.0 / math.sqrt(fan_in)
    return jax.random.uniform(key, shape, jnp.float32, -bound, bound)


def init_params(key, input_channels, output_dim, H, W):
    def conv_out(s):
        return (s - 1) // 2 + 1

    Hc, Wc = H // 2, W // 2
    for _ in range(4):
        Hc, Wc = conv_out(Hc), conv_out(Wc)
    fc_in = 256 * Hc * Wc

    keys = jax.random.split(key, 12)
    p = {}
    chans = [(input_channels, 32), (32, 64), (64, 128), (128, 256)]
    for i, (cin, cout) in enumerate(chans):
        fan = cin * 9
        p[f"conv{i + 1}_w"] = _uinit(keys[2 * i], (cout, cin, 3, 3), fan)
        p[f"conv{i + 1}_b"] = _uinit(keys[2 * i + 1], (cout,), fan)

    # fc1 stored as (in, out). Fold the PyTorch NCHW-flatten row order into the
    # weight (one-time reindex) so the kernel can flatten NHWC directly.
    w1_nchw = _uinit(keys[8], (fc_in, 128), fc_in)
    perm = jnp.transpose(jnp.arange(fc_in).reshape(256, Hc, Wc), (1, 2, 0)).reshape(-1)
    p["fc1_w"] = w1_nchw[perm, :]
    p["fc1_b"] = _uinit(keys[9], (128,), fc_in)
    p["fc2_w"] = _uinit(keys[10], (128, output_dim), 128)
    p["fc2_b"] = _uinit(keys[11], (output_dim,), 128)
    return p


# ----------------------------------------------------------------------------- #
# Forward pass (Actor)
# ----------------------------------------------------------------------------- #
@jax.jit
def actor_forward(params, state_nchw):
    # TODO(synk): the module's host-side numpy->tensor conversion / `train` flag
    # branch is pure host glue with no Pallas equivalent; inputs are taken as
    # device arrays directly.
    x = jnp.transpose(state_nchw.astype(jnp.float32), (0, 2, 3, 1))  # NCHW -> NHWC
    x = avgpool2x2(x)                                                # bf16 NHWC
    x = conv3x3_s2_p1_relu(x, params["conv1_w"], params["conv1_b"])
    x = conv3x3_s2_p1_relu(x, params["conv2_w"], params["conv2_b"])
    x = conv3x3_s2_p1_relu(x, params["conv3_w"], params["conv3_b"])
    x = conv3x3_s2_p1_relu(x, params["conv4_w"], params["conv4_b"])
    N = x.shape[0]
    x = x.reshape(N, -1)   # NHWC flatten; fc1_w rows were permuted at init to match
    probs = fc_head(x, params["fc1_w"], params["fc1_b"], params["fc2_w"], params["fc2_b"])
    if N == 1:
        probs = probs[0]   # mirrors SharedCNN's x.squeeze(0) for unbatched input
    return probs


# ----------------------------------------------------------------------------- #
if __name__ == "__main__":
    batch, input_channels, H, W = 2, 4, 64, 96
    output_dim = 6

    key = jax.random.PRNGKey(0)
    pkey, xkey = jax.random.split(key)
    params = init_params(pkey, input_channels, output_dim, H, W)
    state = jax.random.normal(xkey, (batch, input_channels, H, W), jnp.float32)

    probs = jax.block_until_ready(actor_forward(params, state))

    assert probs.shape == (batch, output_dim), probs.shape
    assert bool(jnp.all(jnp.isfinite(probs)))
    row_sums = jnp.sum(probs, axis=-1)
    assert bool(jnp.all(jnp.abs(row_sums - 1.0) < 1e-5)), row_sums
    print("KERNEL_OK")
</pallas_src>

<mosaic_0001>
module attributes {stable_mosaic.version = 11 : i64} {
  func.func @_avgpool_kernel(%arg0: i32, %arg1: memref<64x192xf32, #tpu.memory_space<vmem>>, %arg2: memref<64x192xf32, #tpu.memory_space<vmem>>, %arg3: memref<64x192xf32, #tpu.memory_space<vmem>>, %arg4: memref<64x192xf32, #tpu.memory_space<vmem>>, %arg5: memref<64x192xbf16, #tpu.memory_space<vmem>>) attributes {dimension_semantics = [#tpu.dimension_semantics<parallel>], iteration_bounds = array<i64: 1>, scalar_prefetch = 0 : i64, scratch_operands = 0 : i64, tpu.core_type = #tpu.core_type<tc>, window_params = [{transform_indices = @transform_0, window_bounds = array<i64: 64, 192>}, {transform_indices = @transform_1, window_bounds = array<i64: 64, 192>}, {transform_indices = @transform_2, window_bounds = array<i64: 64, 192>}, {transform_indices = @transform_3, window_bounds = array<i64: 64, 192>}, {transform_indices = @transform_4, window_bounds = array<i64: 64, 192>}]} {
    %c0 = arith.constant 0 : index
    %c0_0 = arith.constant 0 : index
    %0 = vector.load %arg1[%c0, %c0_0] : memref<64x192xf32, #tpu.memory_space<vmem>>, vector<64x192xf32>
    %c0_1 = arith.constant 0 : index
    %c0_2 = arith.constant 0 : index
    %1 = vector.load %arg2[%c0_1, %c0_2] : memref<64x192xf32, #tpu.memory_space<vmem>>, vector<64x192xf32>
    %2 = arith.addf %0, %1 : vector<64x192xf32>
    %c0_3 = arith.constant 0 : index
    %c0_4 = arith.constant 0 : index
    %3 = vector.load %arg3[%c0_3, %c0_4] : memref<64x192xf32, #tpu.memory_space<vmem>>, vector<64x192xf32>
    %4 = arith.addf %2, %3 : vector<64x192xf32>
    %c0_5 = arith.constant 0 : index
    %c0_6 = arith.constant 0 : index
    %5 = vector.load %arg4[%c0_5, %c0_6] : memref<64x192xf32, #tpu.memory_space<vmem>>, vector<64x192xf32>
    %6 = arith.addf %4, %5 : vector<64x192xf32>
    %cst = arith.constant 2.500000e-01 : f32
    %7 = vector.broadcast %cst : f32 to vector<64x192xf32>
    %8 = arith.mulf %6, %7 : vector<64x192xf32>
    %9 = arith.truncf %8 : vector<64x192xf32> to vector<64x192xbf16>
    %c0_7 = arith.constant 0 : index
    %c0_8 = arith.constant 0 : index
    %10 = vector.load %arg5[%c0_7, %c0_8] : memref<64x192xbf16, #tpu.memory_space<vmem>>, vector<64x192xbf16>
    tpu.vector_store %arg5[%c0_7, %c0_8], %9 {strides = array<i32>} : memref<64x192xbf16, #tpu.memory_space<vmem>>, vector<64x192xbf16>,
    return
  }
  func.func @transform_0(%arg0: i32) -> (i32, i32) {
    %c0_i32 = arith.constant 0 : i32
    %c0_i32_0 = arith.constant 0 : i32
    return %arg0, %c0_i32 : i32, i32
  }
  func.func @transform_1(%arg0: i32) -> (i32, i32) {
    %c0_i32 = arith.constant 0 : i32
    %c0_i32_0 = arith.constant 0 : i32
    return %arg0, %c0_i32 : i32, i32
  }
  func.func @transform_2(%arg0: i32) -> (i32, i32) {
    %c0_i32 = arith.constant 0 : i32
    %c0_i32_0 = arith.constant 0 : i32
    return %arg0, %c0_i32 : i32, i32
  }
  func.func @transform_3(%arg0: i32) -> (i32, i32) {
    %c0_i32 = arith.constant 0 : i32
    %c0_i32_0 = arith.constant 0 : i32
    return %arg0, %c0_i32 : i32, i32
  }
  func.func @transform_4(%arg0: i32) -> (i32, i32) {
    %c0_i32 = arith.constant 0 : i32
    %c0_i32_0 = arith.constant 0 : i32
    return %arg0, %c0_i32 : i32, i32
  }
}

module attributes {stable_mosaic.version = 11 : i64} {
  func.func @_conv3x3_s2_row_kernel(%arg0: i32, %arg1: i32, %arg2: memref<1x2x25x4xbf16, #tpu.memory_space<vmem>>, %arg3: memref<1x1x25x4xbf16, #tpu.memory_space<vmem>>, %arg4: memref<1x2x25x4xbf16, #tpu.memory_space<vmem>>, %arg5: memref<1x1x25x4xbf16, #tpu.memory_space<vmem>>, %arg6: memref<3x3x4x32xbf16, #tpu.memory_space<vmem>>, %arg7: memref<1x32xf32, #tpu.memory_space<vmem>>, %arg8: memref<1x1x24x32xbf16, #tpu.memory_space<vmem>>) attributes {dimension_semantics = [#tpu.dimension_semantics<parallel>, #tpu.dimension_semantics<parallel>], iteration_bounds = array<i64: 2, 16>, scalar_prefetch = 0 : i64, scratch_operands = 0 : i64, tpu.core_type = #tpu.core_type<tc>, window_params = [{transform_indices = @transform_0, window_bounds = array<i64: 1, 2, 25, 4>}, {transform_indices = @transform_1, window_bounds = array<i64: 1, 1, 25, 4>}, {transform_indices = @transform_2, window_bounds = array<i64: 1, 2, 25, 4>}, {transform_indices = @transform_3, window_bounds = array<i64: 1, 1, 25, 4>}, {pipeline_mode = #tpu.pipeline_mode<synchronous>, transform_indices = @transform_4, window_bounds = array<i64: 3, 3, 4, 32>}, {pipeline_mode = #tpu.pipeline_mode<synchronous>, transform_indices = @transform_5, window_bounds = array<i64: 1, 32>}, {transform_indices = @transform_6, window_bounds = array<i64: 1, 1, 24, 32>}]} {
    %cst = arith.constant 0.000000e+00 : f32
    %0 = vector.broadcast %cst : f32 to vector<24x32xf32>
    %c0 = arith.constant 0 : index
    %c0_0 = arith.constant 0 : index
    %c0_1 = arith.constant 0 : index
    %c0_2 = arith.constant 0 : index
    %1 = vector.load %arg2[%c0, %c0_0, %c0_1, %c0_2] : memref<1x2x25x4xbf16, #tpu.memory_space<vmem>>, vector<1x1x25x4xbf16>
    %2 = vector.shape_cast %1 : vector<1x1x25x4xbf16> to vector<25x4xbf16>
    %c0_3 = arith.constant 0 : index
    %c1 = arith.constant 1 : index
    %c0_4 = arith.constant 0 : index
    %c0_5 = arith.constant 0 : index
    %3 = vector.load %arg2[%c0_3, %c1, %c0_4, %c0_5] : memref<1x2x25x4xbf16, #tpu.memory_space<vmem>>, vector<1x1x25x4xbf16>
    %4 = vector.shape_cast %3 : vector<1x1x25x4xbf16> to vector<25x4xbf16>
    %c0_6 = arith.constant 0 : index
    %c0_7 = arith.constant 0 : index
    %c0_8 = arith.constant 0 : index
    %c0_9 = arith.constant 0 : index
    %5 = vector.load %arg3[%c0_6, %c0_7, %c0_8, %c0_9] : memref<1x1x25x4xbf16, #tpu.memory_space<vmem>>, vector<1x1x25x4xbf16>
    %6 = vector.shape_cast %5 : vector<1x1x25x4xbf16> to vector<25x4xbf16>
    %c0_10 = arith.constant 0 : index
    %c0_11 = arith.constant 0 : index
    %c0_12 = arith.constant 0 : index
    %c0_13 = arith.constant 0 : index
    %7 = vector.load %arg4[%c0_10, %c0_11, %c0_12, %c0_13] : memref<1x2x25x4xbf16, #tpu.memory_space<vmem>>, vector<1x1x25x4xbf16>
    %8 = vector.shape_cast %7 : vector<1x1x25x4xbf16> to vector<25x4xbf16>
    %c0_14 = arith.constant 0 : index
    %c1_15 = arith.constant 1 : index
    %c0_16 = arith.constant 0 : index
    %c0_17 = arith.constant 0 : index
    %9 = vector.load %arg4[%c0_14, %c1_15, %c0_16, %c0_17] : memref<1x2x25x4xbf16, #tpu.memory_space<vmem>>, vector<1x1x25x4xbf16>
    %10 = vector.shape_cast %9 : vector<1x1x25x4xbf16> to vector<25x4xbf16>
    %c0_18 = arith.constant 0 : index
    %c0_19 = arith.constant 0 : index
    %c0_20 = arith.constant 0 : index
    %c0_21 = arith.constant 0 : index
    %11 = vector.load %arg5[%c0_18, %c0_19, %c0_20, %c0_21] : memref<1x1x25x4xbf16, #tpu.memory_space<vmem>>, vector<1x1x25x4xbf16>
    %12 = vector.shape_cast %11 : vector<1x1x25x4xbf16> to vector<25x4xbf16>
    %13 = vector.extract_strided_slice %2 {offsets = [0, 0], sizes = [24, 4], strides = [1, 1]} : vector<25x4xbf16> to vector<24x4xbf16>
    %c0_22 = arith.constant 0 : index
    %c0_23 = arith.constant 0 : index
    %c0_24 = arith.constant 0 : index
    %c0_25 = arith.constant 0 : index
    %14 = vector.load %arg6[%c0_22, %c0_23, %c0_24, %c0_25] : memref<3x3x4x32xbf16, #tpu.memory_space<vmem>>, vector<1x1x4x32xbf16>
    %15 = vector.shape_cast %14 : vector<1x1x4x32xbf16> to vector<4x32xbf16>
    %cst_26 = arith.constant dense<0.000000e+00> : vector<24x32xf32>
    %16 = tpu.matmul %13, %15, %cst_26 {dimension_numbers = #tpu.dot_dimension_numbers<[1], [0], [0], [1], [0, 0, 1, 1], [], []>} : vector<24x4xbf16>, vector<4x32xbf16>, vector<24x32xf32> -> vector<24x32xf32>
    %17 = arith.addf %0, %16 : vector<24x32xf32>
    %18 = vector.extract_strided_slice %8 {offsets = [0, 0], sizes = [24, 4], strides = [1, 1]} : vector<25x4xbf16> to vector<24x4xbf16>
    %c0_27 = arith.constant 0 : index
    %c1_28 = arith.constant 1 : index
    %c0_29 = arith.constant 0 : index
    %c0_30 = arith.constant 0 : index
    %19 = vector.load %arg6[%c0_27, %c1_28, %c0_29, %c0_30] : memref<3x3x4x32xbf16, #tpu.memory_space<vmem>>, vector<1x1x4x32xbf16>
    %20 = vector.shape_cast %19 : vector<1x1x4x32xbf16> to vector<4x32xbf16>
    %cst_31 = arith.constant dense<0.000000e+00> : vector<24x32xf32>
    %21 = tpu.matmul %18, %20, %cst_31 {dimension_numbers = #tpu.dot_dimension_numbers<[1], [0], [0], [1], [0, 0, 1, 1], [], []>} : vector<24x4xbf16>, vector<4x32xbf16>, vector<24x32xf32> -> vector<24x32xf32>
    %22 = arith.addf %17, %21 : vector<24x32xf32>
    %23 = vector.extract_strided_slice %2 {offsets = [1, 0], sizes = [24, 4], strides = [1, 1]} : vector<25x4xbf16> to vector<24x4xbf16>
    %c0_32 = arith.constant 0 : index
    %c2 = arith.constant 2 : index
    %c0_33 = arith.constant 0 : index
    %c0_34 = arith.constant 0 : index
    %24 = vector.load %arg6[%c0_32, %c2, %c0_33, %c0_34] : memref<3x3x4x32xbf16, #tpu.memory_space<vmem>>, vector<1x1x4x32xbf16>
    %25 = vector.shape_cast %24 : vector<1x1x4x32xbf16> to vector<4x32xbf16>
    %cst_35 = arith.constant dense<0.000000e+00> : vector<24x32xf32>
    %26 = tpu.matmul %23, %25, %cst_35 {dimension_numbers = #tpu.dot_dimension_numbers<[1], [0], [0], [1], [0, 0, 1, 1], [], []>} : vector<24x4xbf16>, vector<4x32xbf16>, vector<24x32xf32> -> vector<24x32xf32>
    %27 = arith.addf %22, %26 : vector<24x32xf32>
    %28 = vector.extract_strided_slice %4 {offsets = [0, 0], sizes = [24, 4], strides = [1, 1]} : vector<25x4xbf16> to vector<24x4xbf16>
    %c1_36 = arith.constant 1 : index
    %c0_37 = arith.constant 0 : index
    %c0_38 = arith.constant 0 : index
    %c0_39 = arith.constant 0 : index
    %29 = vector.load %arg6[%c1_36, %c0_37, %c0_38, %c0_39] : memref<3x3x4x32xbf16, #tpu.memory_space<vmem>>, vector<1x1x4x32xbf16>
    %30 = vector.shape_cast %29 : vector<1x1x4x32xbf16> to vector<4x32xbf16>
    %cst_40 = arith.constant dense<0.000000e+00> : vector<24x32xf32>
    %31 = tpu.matmul %28, %30, %cst_40 {dimension_numbers = #tpu.dot_dimension_numbers<[1], [0], [0], [1], [0, 0, 1, 1], [], []>} : vector<24x4xbf16>, vector<4x32xbf16>, vector<24x32xf32> -> vector<24x32xf32>
    %32 = arith.addf %27, %31 : vector<24x32xf32>
    %33 = vector.extract_strided_slice %10 {offsets = [0, 0], sizes = [24, 4], strides = [1, 1]} : vector<25x4xbf16> to vector<24x4xbf16>
    %c1_41 = arith.constant 1 : index
    %c1_42 = arith.constant 1 : index
    %c0_43 = arith.constant 0 : index
    %c0_44 = arith.constant 0 : index
    %34 = vector.load %arg6[%c1_41, %c1_42, %c0_43, %c0_44] : memref<3x3x4x32xbf16, #tpu.memory_space<vmem>>, vector<1x1x4x32xbf16>
    %35 = vector.shape_cast %34 : vector<1x1x4x32xbf16> to vector<4x32xbf16>
    %cst_45 = arith.constant dense<0.000000e+00> : vector<24x32xf32>
    %36 = tpu.matmul %33, %35, %cst_45 {dimension_numbers = #tpu.dot_dimension_numbers<[1], [0], [0], [1], [0, 0, 1, 1], [], []>} : vector<24x4xbf16>, vector<4x32xbf16>, vector<24x32xf32> -> vector<24x32xf32>
    %37 = arith.addf %32, %36 : vector<24x32xf32>
    %38 = vector.extract_strided_slice %4 {offsets = [1, 0], sizes = [24, 4], strides = [1, 1]} : vector<25x4xbf16> to vector<24x4xbf16>
    %c1_46 = arith.constant 1 : index
    %c2_47 = arith.constant 2 : index
    %c0_48 = arith.constant 0 : index
    %c0_49 = arith.constant 0 : index
    %39 = vector.load %arg6[%c1_46, %c2_47, %c0_48, %c0_49] : memref<3x3x4x32xbf16, #tpu.memory_space<vmem>>, vector<1x1x4x32xbf16>
    %40 = vector.shape_cast %39 : vector<1x1x4x32xbf16> to vector<4x32xbf16>
    %cst_50 = arith.constant dense<0.000000e+00> : vector<24x32xf32>
    %41 = tpu.matmul %38, %40, %cst_50 {dimension_numbers = #tpu.dot_dimension_numbers<[1], [0], [0], [1], [0, 0, 1, 1], [], []>} : vector<24x4xbf16>, vector<4x32xbf16>, vector<24x32xf32> -> vector<24x32xf32>
    %42 = arith.addf %37, %41 : vector<24x32xf32>
    %43 = vector.extract_strided_slice %6 {offsets = [0, 0], sizes = [24, 4], strides = [1, 1]} : vector<25x4xbf16> to vector<24x4xbf16>
    %c2_51 = arith.constant 2 : index
    %c0_52 = arith.constant 0 : index
    %c0_53 = arith.constant 0 : index
    %c0_54 = arith.constant 0 : index
    %44 = vector.load %arg6[%c2_51, %c0_52, %c0_53, %c0_54] : memref<3x3x4x32xbf16, #tpu.memory_space<vmem>>, vector<1x1x4x32xbf16>
    %45 = vector.shape_cast %44 : vector<1x1x4x32xbf16> to vector<4x32xbf16>
    %cst_55 = arith.constant dense<0.000000e+00> : vector<24x32xf32>
    %46 = tpu.matmul %43, %45, %cst_55 {dimension_numbers = #tpu.dot_dimension_numbers<[1], [0], [0], [1], [0, 0, 1, 1], [], []>} : vector<24x4xbf16>, vector<4x32xbf16>, vector<24x32xf32> -> vector<24x32xf32>
    %47 = arith.addf %42, %46 : vector<24x32xf32>
    %48 = vector.extract_strided_slice %12 {offsets = [0, 0], sizes = [24, 4], strides = [1, 1]} : vector<25x4xbf16> to vector<24x4xbf16>
    %c2_56 = arith.constant 2 : index
    %c1_57 = arith.constant 1 : index
    %c0_58 = arith.constant 0 : index
    %c0_59 = arith.constant 0 : index
    %49 = vector.load %arg6[%c2_56, %c1_57, %c0_58, %c0_59] : memref<3x3x4x32xbf16, #tpu.memory_space<vmem>>, vector<1x1x4x32xbf16>
    %50 = vector.shape_cast %49 : vector<1x1x4x32xbf16> to vector<4x32xbf16>
    %cst_60 = arith.constant dense<0.000000e+00> : vector<24x32xf32>
    %51 = tpu.matmul %48, %50, %cst_60 {dimension_numbers = #tpu.dot_dimension_numbers<[1], [0], [0], [1], [0, 0, 1, 1], [], []>} : vector<24x4xbf16>, vector<4x32xbf16>, vector<24x32xf32> -> vector<24x32xf32>
    %52 = arith.addf %47, %51 : vector<24x32xf32>
    %53 = vector.extract_strided_slice %6 {offsets = [1, 0], sizes = [24, 4], strides = [1, 1]} : vector<25x4xbf16> to vector<24x4xbf16>
    %c2_61 = arith.constant 2 : index
    %c2_62 = arith.constant 2 : index
    %c0_63 = arith.constant 0 : index
    %c0_64 = arith.constant 0 : index
    %54 = vector.load %arg6[%c2_61, %c2_62, %c0_63, %c0_64] : memref<3x3x4x32xbf16, #tpu.memory_space<vmem>>, vector<1x1x4x32xbf16>
    %55 = vector.shape_cast %54 : vector<1x1x4x32xbf16> to vector<4x32xbf16>
    %cst_65 = arith.constant dense<0.000000e+00> : vector<24x32xf32>
    %56 = tpu.matmul %53, %55, %cst_65 {dimension_numbers = #tpu.dot_dimension_numbers<[1], [0], [0], [1], [0, 0, 1, 1], [], []>} : vector<24x4xbf16>, vector<4x32xbf16>, vector<24x32xf32> -> vector<24x32xf32>
    %57 = arith.addf %52, %56 : vector<24x32xf32>
    %c0_66 = arith.constant 0 : index
    %c0_67 = arith.constant 0 : index
    %58 = vector.load %arg7[%c0_66, %c0_67] : memref<1x32xf32, #tpu.memory_space<vmem>>, vector<1x32xf32>
    %59 = vector.broadcast %58 : vector<1x32xf32> to vector<24x32xf32>
    %60 = arith.addf %57, %59 : vector<24x32xf32>
    %cst_68 = arith.constant 0.000000e+00 : f32
    %61 = vector.broadcast %cst_68 : f32 to vector<24x32xf32>
    %62 = arith.maximumf %60, %61 : vector<24x32xf32>
    %63 = arith.truncf %62 : vector<24x32xf32> to vector<24x32xbf16>
    %c0_69 = arith.constant 0 : index
    %c0_70 = arith.constant 0 : index
    %c0_71 = arith.constant 0 : index
    %c0_72 = arith.constant 0 : index
    %64 = vector.load %arg8[%c0_69, %c0_70, %c0_71, %c0_72] : memref<1x1x24x32xbf16, #tpu.memory_space<vmem>>, vector<1x1x24x32xbf16>
    %65 = vector.shape_cast %64 : vector<1x1x24x32xbf16> to vector<24x32xbf16>
    %66 = vector.shape_cast %63 : vector<24x32xbf16> to vector<1x1x24x32xbf16>
    tpu.vector_store %arg8[%c0_69, %c0_70, %c0_71, %c0_72], %66 {strides = array<i32>} : memref<1x1x24x32xbf16, #tpu.memory_space<vmem>>, vector<1x1x24x32xbf16>,
    return
  }
  func.func @transform_0(%arg0: i32, %arg1: i32) -> (i32, i32, i32, i32) {
    %c0_i32 = arith.constant 0 : i32
    %c0_i32_0 = arith.constant 0 : i32
    %c0_i32_1 = arith.constant 0 : i32
    return %arg0, %arg1, %c0_i32, %c0_i32_0 : i32, i32, i32, i32
  }
  func.func @transform_1(%arg0: i32, %arg1: i32) -> (i32, i32, i32, i32) {
    %c2_i32 = arith.constant 2 : i32
    %0 = arith.muli %c2_i32, %arg1 : i32
    %c2_i32_0 = arith.constant 2 : i32
    %1 = arith.addi %0, %c2_i32_0 : i32
    %c0_i32 = arith.constant 0 : i32
    %c0_i32_1 = arith.constant 0 : i32
    %c0_i32_2 = arith.constant 0 : i32
    return %arg0, %1, %c0_i32, %c0_i32_1 : i32, i32, i32, i32
  }
  func.func @transform_2(%arg0: i32, %arg1: i32) -> (i32, i32, i32, i32) {
    %c0_i32 = arith.constant 0 : i32
    %c0_i32_0 = arith.constant 0 : i32
    %c0_i32_1 = arith.constant 0 : i32
    return %arg0, %arg1, %c0_i32, %c0_i32_0 : i32, i32, i32, i32
  }
  func.func @transform_3(%arg0: i32, %arg1: i32) -> (i32, i32, i32, i32) {
    %c2_i32 = arith.constant 2 : i32
    %0 = arith.muli %c2_i32, %arg1 : i32
    %c2_i32_0 = arith.constant 2 : i32
    %1 = arith.addi %0, %c2_i32_0 : i32
    %c0_i32 = arith.constant 0 : i32
    %c0_i32_1 = arith.constant 0 : i32
    %c0_i32_2 = arith.constant 0 : i32
    return %arg0, %1, %c0_i32, %c0_i32_1 : i32, i32, i32, i32
  }
  func.func @transform_4(%arg0: i32, %arg1: i32) -> (i32, i32, i32, i32) {
    %c0_i32 = arith.constant 0 : i32
    %c0_i32_0 = arith.constant 0 : i32
    %c0_i32_1 = arith.constant 0 : i32
    %c0_i32_2 = arith.constant 0 : i32
    %c0_i32_3 = arith.constant 0 : i32
    return %c0_i32, %c0_i32_0, %c0_i32_1, %c0_i32_2 : i32, i32, i32, i32
  }
  func.func @transform_5(%arg0: i32, %arg1: i32) -> (i32, i32) {
    %c0_i32 = arith.constant 0 : i32
    %c0_i32_0 = arith.constant 0 : i32
    %c0_i32_1 = arith.constant 0 : i32
    return %c0_i32, %c0_i32_0 : i32, i32
  }
  func.func @transform_6(%arg0: i32, %arg1: i32) -> (i32, i32, i32, i32) {
    %c0_i32 = arith.constant 0 : i32
    %c0_i32_0 = arith.constant 0 : i32
    %c0_i32_1 = arith.constant 0 : i32
    return %arg0, %arg1, %c0_i32, %c0_i32_0 : i32, i32, i32, i32
  }
}

module attributes {stable_mosaic.version = 11 : i64} {
  func.func @_conv3x3_s2_row_kernel(%arg0: i32, %arg1: i32, %arg2: memref<1x2x13x32xbf16, #tpu.memory_space<vmem>>, %arg3: memref<1x1x13x32xbf16, #tpu.memory_space<vmem>>, %arg4: memref<1x2x13x32xbf16, #tpu.memory_space<vmem>>, %arg5: memref<1x1x13x32xbf16, #tpu.memory_space<vmem>>, %arg6: memref<3x3x32x64xbf16, #tpu.memory_space<vmem>>, %arg7: memref<1x64xf32, #tpu.memory_space<vmem>>, %arg8: memref<1x1x12x64xbf16, #tpu.memory_space<vmem>>) attributes {dimension_semantics = [#tpu.dimension_semantics<parallel>, #tpu.dimension_semantics<parallel>], iteration_bounds = array<i64: 2, 8>, scalar_prefetch = 0 : i64, scratch_operands = 0 : i64, tpu.core_type = #tpu.core_type<tc>, window_params = [{transform_indices = @transform_0, window_bounds = array<i64: 1, 2, 13, 32>}, {transform_indices = @transform_1, window_bounds = array<i64: 1, 1, 13, 32>}, {transform_indices = @transform_2, window_bounds = array<i64: 1, 2, 13, 32>}, {transform_indices = @transform_3, window_bounds = array<i64: 1, 1, 13, 32>}, {pipeline_mode = #tpu.pipeline_mode<synchronous>, transform_indices = @transform_4, window_bounds = array<i64: 3, 3, 32, 64>}, {pipeline_mode = #tpu.pipeline_mode<synchronous>, transform_indices = @transform_5, window_bounds = array<i64: 1, 64>}, {transform_indices = @transform_6, window_bounds = array<i64: 1, 1, 12, 64>}]} {
    %cst = arith.constant 0.000000e+00 : f32
    %0 = vector.broadcast %cst : f32 to vector<12x64xf32>
    %c0 = arith.constant 0 : index
    %c0_0 = arith.constant 0 : index
    %c0_1 = arith.constant 0 : index
    %c0_2 = arith.constant 0 : index
    %1 = vector.load %arg2[%c0, %c0_0, %c0_1, %c0_2] : memref<1x2x13x32xbf16, #tpu.memory_space<vmem>>, vector<1x1x13x32xbf16>
    %2 = vector.shape_cast %1 : vector<1x1x13x32xbf16> to vector<13x32xbf16>
    %c0_3 = arith.constant 0 : index
    %c1 = arith.constant 1 : index
    %c0_4 = arith.constant 0 : index
    %c0_5 = arith.constant 0 : index
    %3 = vector.load %arg2[%c0_3, %c1, %c0_4, %c0_5] : memref<1x2x13x32xbf16, #tpu.memory_space<vmem>>, vector<1x1x13x32xbf16>
    %4 = vector.shape_cast %3 : vector<1x1x13x32xbf16> to vector<13x32xbf16>
    %c0_6 = arith.constant 0 : index
    %c0_7 = arith.constant 0 : index
    %c0_8 = arith.constant 0 : index
    %c0_9 = arith.constant 0 : index
    %5 = vector.load %arg3[%c0_6, %c0_7, %c0_8, %c0_9] : memref<1x1x13x32xbf16, #tpu.memory_space<vmem>>, vector<1x1x13x32xbf16>
    %6 = vector.shape_cast %5 : vector<1x1x13x32xbf16> to vector<13x32xbf16>
    %c0_10 = arith.constant 0 : index
    %c0_11 = arith.constant 0 : index
    %c0_12 = arith.constant 0 : index
    %c0_13 = arith.constant 0 : index
    %7 = vector.load %arg4[%c0_10, %c0_11, %c0_12, %c0_13] : memref<1x2x13x32xbf16, #tpu.memory_space<vmem>>, vector<1x1x13x32xbf16>
    %8 = vector.shape_cast %7 : vector<1x1x13x32xbf16> to vector<13x32xbf16>
    %c0_14 = arith.constant 0 : index
    %c1_15 = arith.constant 1 : index
    %c0_16 = arith.constant 0 : index
    %c0_17 = arith.constant 0 : index
    %9 = vector.load %arg4[%c0_14, %c1_15, %c0_16, %c0_17] : memref<1x2x13x32xbf16, #tpu.memory_space<vmem>>, vector<1x1x13x32xbf16>
    %10 = vector.shape_cast %9 : vector<1x1x13x32xbf16> to vector<13x32xbf16>
    %c0_18 = arith.constant 0 : index
    %c0_19 = arith.constant 0 : index
    %c0_20 = arith.constant 0 : index
    %c0_21 = arith.constant 0 : index
    %11 = vector.load %arg5[%c0_18, %c0_19, %c0_20, %c0_21] : memref<1x1x13x32xbf16, #tpu.memory_space<vmem>>, vector<1x1x13x32xbf16>
    %12 = vector.shape_cast %11 : vector<1x1x13x32xbf16> to vector<13x32xbf16>
    %13 = vector.extract_strided_slice %2 {offsets = [0, 0], sizes = [12, 32], strides = [1, 1]} : vector<13x32xbf16> to vector<12x32xbf16>
    %c0_22 = arith.constant 0 : index
    %c0_23 = arith.constant 0 : index
    %c0_24 = arith.constant 0 : index
    %c0_25 = arith.constant 0 : index
    %14 = vector.load %arg6[%c0_22, %c0_23, %c0_24, %c0_25] : memref<3x3x32x64xbf16, #tpu.memory_space<vmem>>, vector<1x1x32x64xbf16>
    %15 = vector.shape_cast %14 : vector<1x1x32x64xbf16> to vector<32x64xbf16>
    %cst_26 = arith.constant dense<0.000000e+00> : vector<12x64xf32>
    %16 = tpu.matmul %13, %15, %cst_26 {dimension_numbers = #tpu.dot_dimension_numbers<[1], [0], [0], [1], [0, 0, 1, 1], [], []>} : vector<12x32xbf16>, vector<32x64xbf16>, vector<12x64xf32> -> vector<12x64xf32>
    %17 = arith.addf %0, %16 : vector<12x64xf32>
    %18 = vector.extract_strided_slice %8 {offsets = [0, 0], sizes = [12, 32], strides = [1, 1]} : vector<13x32xbf16> to vector<12x32xbf16>
    %c0_27 = arith.constant 0 : index
    %c1_28 = arith.constant 1 : index
    %c0_29 = arith.constant 0 : index
    %c0_30 = arith.constant 0 : index
    %19 = vector.load %arg6[%c0_27, %c1_28, %c0_29, %c0_30] : memref<3x3x32x64xbf16, #tpu.memory_space<vmem>>, vector<1x1x32x64xbf16>
    %20 = vector.shape_cast %19 : vector<1x1x32x64xbf16> to vector<32x64xbf16>
    %cst_31 = arith.constant dense<0.000000e+00> : vector<12x64xf32>
    %21 = tpu.matmul %18, %20, %cst_31 {dimension_numbers = #tpu.dot_dimension_numbers<[1], [0], [0], [1], [0, 0, 1, 1], [], []>} : vector<12x32xbf16>, vector<32x64xbf16>, vector<12x64xf32> -> vector<12x64xf32>
    %22 = arith.addf %17, %21 : vector<12x64xf32>
    %23 = vector.extract_strided_slice %2 {offsets = [1, 0], sizes = [12, 32], strides = [1, 1]} : vector<13x32xbf16> to vector<12x32xbf16>
    %c0_32 = arith.constant 0 : index
    %c2 = arith.constant 2 : index
    %c0_33 = arith.constant 0 : index
    %c0_34 = arith.constant 0 : index
    %24 = vector.load %arg6[%c0_32, %c2, %c0_33, %c0_34] : memref<3x3x32x64xbf16, #tpu.memory_space<vmem>>, vector<1x1x32x64xbf16>
    %25 = vector.shape_cast %24 : vector<1x1x32x64xbf16> to vector<32x64xbf16>
    %cst_35 = arith.constant dense<0.000000e+00> : vector<12x64xf32>
    %26 = tpu.matmul %23, %25, %cst_35 {dimension_numbers = #tpu.dot_dimension_numbers<[1], [0], [0], [1], [0, 0, 1, 1], [], []>} : vector<12x32xbf16>, vector<32x64xbf16>, vector<12x64xf32> -> vector<12x64xf32>
    %27 = arith.addf %22, %26 : vector<12x64xf32>
    %28 = vector.extract_strided_slice %4 {offsets = [0, 0], sizes = [12, 32], strides = [1, 1]} : vector<13x32xbf16> to vector<12x32xbf16>
    %c1_36 = arith.constant 1 : index
    %c0_37 = arith.constant 0 : index
    %c0_38 = arith.constant 0 : index
    %c0_39 = arith.constant 0 : index
    %29 = vector.load %arg6[%c1_36, %c0_37, %c0_38, %c0_39] : memref<3x3x32x64xbf16, #tpu.memory_space<vmem>>, vector<1x1x32x64xbf16>
    %30 = vector.shape_cast %29 : vector<1x1x32x64xbf16> to vector<32x64xbf16>
    %cst_40 = arith.constant dense<0.000000e+00> : vector<12x64xf32>
    %31 = tpu.matmul %28, %30, %cst_40 {dimension_numbers = #tpu.dot_dimension_numbers<[1], [0], [0], [1], [0, 0, 1, 1], [], []>} : vector<12x32xbf16>, vector<32x64xbf16>, vector<12x64xf32> -> vector<12x64xf32>
    %32 = arith.addf %27, %31 : vector<12x64xf32>
    %33 = vector.extract_strided_slice %10 {offsets = [0, 0], sizes = [12, 32], strides = [1, 1]} : vector<13x32xbf16> to vector<12x32xbf16>
    %c1_41 = arith.constant 1 : index
    %c1_42 = arith.constant 1 : index
    %c0_43 = arith.constant 0 : index
    %c0_44 = arith.constant 0 : index
    %34 = vector.load %arg6[%c1_41, %c1_42, %c0_43, %c0_44] : memref<3x3x32x64xbf16, #tpu.memory_space<vmem>>, vector<1x1x32x64xbf16>
    %35 = vector.shape_cast %34 : vector<1x1x32x64xbf16> to vector<32x64xbf16>
    %cst_45 = arith.constant dense<0.000000e+00> : vector<12x64xf32>
    %36 = tpu.matmul %33, %35, %cst_45 {dimension_numbers = #tpu.dot_dimension_numbers<[1], [0], [0], [1], [0, 0, 1, 1], [], []>} : vector<12x32xbf16>, vector<32x64xbf16>, vector<12x64xf32> -> vector<12x64xf32>
    %37 = arith.addf %32, %36 : vector<12x64xf32>
    %38 = vector.extract_strided_slice %4 {offsets = [1, 0], sizes = [12, 32], strides = [1, 1]} : vector<13x32xbf16> to vector<12x32xbf16>
    %c1_46 = arith.constant 1 : index
    %c2_47 = arith.constant 2 : index
    %c0_48 = arith.constant 0 : index
    %c0_49 = arith.constant 0 : index
    %39 = vector.load %arg6[%c1_46, %c2_47, %c0_48, %c0_49] : memref<3x3x32x64xbf16, #tpu.memory_space<vmem>>, vector<1x1x32x64xbf16>
    %40 = vector.shape_cast %39 : vector<1x1x32x64xbf16> to vector<32x64xbf16>
    %cst_50 = arith.constant dense<0.000000e+00> : vector<12x64xf32>
    %41 = tpu.matmul %38, %40, %cst_50 {dimension_numbers = #tpu.dot_dimension_numbers<[1], [0], [0], [1], [0, 0, 1, 1], [], []>} : vector<12x32xbf16>, vector<32x64xbf16>, vector<12x64xf32> -> vector<12x64xf32>
    %42 = arith.addf %37, %41 : vector<12x64xf32>
    %43 = vector.extract_strided_slice %6 {offsets = [0, 0], sizes = [12, 32], strides = [1, 1]} : vector<13x32xbf16> to vector<12x32xbf16>
    %c2_51 = arith.constant 2 : index
    %c0_52 = arith.constant 0 : index
    %c0_53 = arith.constant 0 : index
    %c0_54 = arith.constant 0 : index
    %44 = vector.load %arg6[%c2_51, %c0_52, %c0_53, %c0_54] : memref<3x3x32x64xbf16, #tpu.memory_space<vmem>>, vector<1x1x32x64xbf16>
    %45 = vector.shape_cast %44 : vector<1x1x32x64xbf16> to vector<32x64xbf16>
    %cst_55 = arith.constant dense<0.000000e+00> : vector<12x64xf32>
    %46 = tpu.matmul %43, %45, %cst_55 {dimension_numbers = #tpu.dot_dimension_numbers<[1], [0], [0], [1], [0, 0, 1, 1], [], []>} : vector<12x32xbf16>, vector<32x64xbf16>, vector<12x64xf32> -> vector<12x64xf32>
    %47 = arith.addf %42, %46 : vector<12x64xf32>
    %48 = vector.extract_strided_slice %12 {offsets = [0, 0], sizes = [12, 32], strides = [1, 1]} : vector<13x32xbf16> to vector<12x32xbf16>
    %c2_56 = arith.constant 2 : index
    %c1_57 = arith.constant 1 : index
    %c0_58 = arith.constant 0 : index
    %c0_59 = arith.constant 0 : index
    %49 = vector.load %arg6[%c2_56, %c1_57, %c0_58, %c0_59] : memref<3x3x32x64xbf16, #tpu.memory_space<vmem>>, vector<1x1x32x64xbf16>
    %50 = vector.shape_cast %49 : vector<1x1x32x64xbf16> to vector<32x64xbf16>
    %cst_60 = arith.constant dense<0.000000e+00> : vector<12x64xf32>
    %51 = tpu.matmul %48, %50, %cst_60 {dimension_numbers = #tpu.dot_dimension_numbers<[1], [0], [0], [1], [0, 0, 1, 1], [], []>} : vector<12x32xbf16>, vector<32x64xbf16>, vector<12x64xf32> -> vector<12x64xf32>
    %52 = arith.addf %47, %51 : vector<12x64xf32>
    %53 = vector.extract_strided_slice %6 {offsets = [1, 0], sizes = [12, 32], strides = [1, 1]} : vector<13x32xbf16> to vector<12x32xbf16>
    %c2_61 = arith.constant 2 : index
    %c2_62 = arith.constant 2 : index
    %c0_63 = arith.constant 0 : index
    %c0_64 = arith.constant 0 : index
    %54 = vector.load %arg6[%c2_61, %c2_62, %c0_63, %c0_64] : memref<3x3x32x64xbf16, #tpu.memory_space<vmem>>, vector<1x1x32x64xbf16>
    %55 = vector.shape_cast %54 : vector<1x1x32x64xbf16> to vector<32x64xbf16>
    %cst_65 = arith.constant dense<0.000000e+00> : vector<12x64xf32>
    %56 = tpu.matmul %53, %55, %cst_65 {dimension_numbers = #tpu.dot_dimension_numbers<[1], [0], [0], [1], [0, 0, 1, 1], [], []>} : vector<12x32xbf16>, vector<32x64xbf16>, vector<12x64xf32> -> vector<12x64xf32>
    %57 = arith.addf %52, %56 : vector<12x64xf32>
    %c0_66 = arith.constant 0 : index
    %c0_67 = arith.constant 0 : index
    %58 = vector.load %arg7[%c0_66, %c0_67] : memref<1x64xf32, #tpu.memory_space<vmem>>, vector<1x64xf32>
    %59 = vector.broadcast %58 : vector<1x64xf32> to vector<12x64xf32>
    %60 = arith.addf %57, %59 : vector<12x64xf32>
    %cst_68 = arith.constant 0.000000e+00 : f32
    %61 = vector.broadcast %cst_68 : f32 to vector<12x64xf32>
    %62 = arith.maximumf %60, %61 : vector<12x64xf32>
    %63 = arith.truncf %62 : vector<12x64xf32> to vector<12x64xbf16>
    %c0_69 = arith.constant 0 : index
    %c0_70 = arith.constant 0 : index
    %c0_71 = arith.constant 0 : index
    %c0_72 = arith.constant 0 : index
    %64 = vector.load %arg8[%c0_69, %c0_70, %c0_71, %c0_72] : memref<1x1x12x64xbf16, #tpu.memory_space<vmem>>, vector<1x1x12x64xbf16>
    %65 = vector.shape_cast %64 : vector<1x1x12x64xbf16> to vector<12x64xbf16>
    %66 = vector.shape_cast %63 : vector<12x64xbf16> to vector<1x1x12x64xbf16>
    tpu.vector_store %arg8[%c0_69, %c0_70, %c0_71, %c0_72], %66 {strides = array<i32>} : memref<1x1x12x64xbf16, #tpu.memory_space<vmem>>, vector<1x1x12x64xbf16>,
    return
  }
  func.func @transform_0(%arg0: i32, %arg1: i32) -> (i32, i32, i32, i32) {
    %c0_i32 = arith.constant 0 : i32
    %c0_i32_0 = arith.constant 0 : i32
    %c0_i32_1 = arith.constant 0 : i32
    return %arg0, %arg1, %c0_i32, %c0_i32_0 : i32, i32, i32, i32
  }
  func.func @transform_1(%arg0: i32, %arg1: i32) -> (i32, i32, i32, i32) {
    %c2_i32 = arith.constant 2 : i32
    %0 = arith.muli %c2_i32, %arg1 : i32
    %c2_i32_0 = arith.constant 2 : i32
    %1 = arith.addi %0, %c2_i32_0 : i32
    %c0_i32 = arith.constant 0 : i32
    %c0_i32_1 = arith.constant 0 : i32
    %c0_i32_2 = arith.constant 0 : i32
    return %arg0, %1, %c0_i32, %c0_i32_1 : i32, i32, i32, i32
  }
  func.func @transform_2(%arg0: i32, %arg1: i32) -> (i32, i32, i32, i32) {
    %c0_i32 = arith.constant 0 : i32
    %c0_i32_0 = arith.constant 0 : i32
    %c0_i32_1 = arith.constant 0 : i32
    return %arg0, %arg1, %c0_i32, %c0_i32_0 : i32, i32, i32, i32
  }
  func.func @transform_3(%arg0: i32, %arg1: i32) -> (i32, i32, i32, i32) {
    %c2_i32 = arith.constant 2 : i32
    %0 = arith.muli %c2_i32, %arg1 : i32
    %c2_i32_0 = arith.constant 2 : i32
    %1 = arith.addi %0, %c2_i32_0 : i32
    %c0_i32 = arith.constant 0 : i32
    %c0_i32_1 = arith.constant 0 : i32
    %c0_i32_2 = arith.constant 0 : i32
    return %arg0, %1, %c0_i32, %c0_i32_1 : i32, i32, i32, i32
  }
  func.func @transform_4(%arg0: i32, %arg1: i32) -> (i32, i32, i32, i32) {
    %c0_i32 = arith.constant 0 : i32
    %c0_i32_0 = arith.constant 0 : i32
    %c0_i32_1 = arith.constant 0 : i32
    %c0_i32_2 = arith.constant 0 : i32
    %c0_i32_3 = arith.constant 0 : i32
    return %c0_i32, %c0_i32_0, %c0_i32_1, %c0_i32_2 : i32, i32, i32, i32
  }
  func.func @transform_5(%arg0: i32, %arg1: i32) -> (i32, i32) {
    %c0_i32 = arith.constant 0 : i32
    %c0_i32_0 = arith.constant 0 : i32
    %c0_i32_1 = arith.constant 0 : i32
    return %c0_i32, %c0_i32_0 : i32, i32
  }
  func.func @transform_6(%arg0: i32, %arg1: i32) -> (i32, i32, i32, i32) {
    %c0_i32 = arith.constant 0 : i32
    %c0_i32_0 = arith.constant 0 : i32
    %c0_i32_1 = arith.constant 0 : i32
    return %arg0, %arg1, %c0_i32, %c0_i32_0 : i32, i32, i32, i32
  }
}

module attributes {stable_mosaic.version = 11 : i64} {
  func.func @_conv3x3_s2_row_kernel(%arg0: i32, %arg1: i32, %arg2: memref<1x2x7x64xbf16, #tpu.memory_space<vmem>>, %arg3: memref<1x1x7x64xbf16, #tpu.memory_space<vmem>>, %arg4: memref<1x2x7x64xbf16, #tpu.memory_space<vmem>>, %arg5: memref<1x1x7x64xbf16, #tpu.memory_space<vmem>>, %arg6: memref<3x3x64x128xbf16, #tpu.memory_space<vmem>>, %arg7: memref<1x128xf32, #tpu.memory_space<vmem>>, %arg8: memref<1x1x6x128xbf16, #tpu.memory_space<vmem>>) attributes {dimension_semantics = [#tpu.dimension_semantics<parallel>, #tpu.dimension_semantics<parallel>], iteration_bounds = array<i64: 2, 4>, scalar_prefetch = 0 : i64, scratch_operands = 0 : i64, tpu.core_type = #tpu.core_type<tc>, window_params = [{transform_indices = @transform_0, window_bounds = array<i64: 1, 2, 7, 64>}, {transform_indices = @transform_1, window_bounds = array<i64: 1, 1, 7, 64>}, {transform_indices = @transform_2, window_bounds = array<i64: 1, 2, 7, 64>}, {transform_indices = @transform_3, window_bounds = array<i64: 1, 1, 7, 64>}, {pipeline_mode = #tpu.pipeline_mode<synchronous>, transform_indices = @transform_4, window_bounds = array<i64: 3, 3, 64, 128>}, {pipeline_mode = #tpu.pipeline_mode<synchronous>, transform_indices = @transform_5, window_bounds = array<i64: 1, 128>}, {transform_indices = @transform_6, window_bounds = array<i64: 1, 1, 6, 128>}]} {
    %cst = arith.constant 0.000000e+00 : f32
    %0 = vector.broadcast %cst : f32 to vector<6x128xf32>
    %c0 = arith.constant 0 : index
    %c0_0 = arith.constant 0 : index
    %c0_1 = arith.constant 0 : index
    %c0_2 = arith.constant 0 : index
    %1 = vector.load %arg2[%c0, %c0_0, %c0_1, %c0_2] : memref<1x2x7x64xbf16, #tpu.memory_space<vmem>>, vector<1x1x7x64xbf16>
    %2 = vector.shape_cast %1 : vector<1x1x7x64xbf16> to vector<7x64xbf16>
    %c0_3 = arith.constant 0 : index
    %c1 = arith.constant 1 : index
    %c0_4 = arith.constant 0 : index
    %c0_5 = arith.constant 0 : index
    %3 = vector.load %arg2[%c0_3, %c1, %c0_4, %c0_5] : memref<1x2x7x64xbf16, #tpu.memory_space<vmem>>, vector<1x1x7x64xbf16>
    %4 = vector.shape_cast %3 : vector<1x1x7x64xbf16> to vector<7x64xbf16>
    %c0_6 = arith.constant 0 : index
    %c0_7 = arith.constant 0 : index
    %c0_8 = arith.constant 0 : index
    %c0_9 = arith.constant 0 : index
    %5 = vector.load %arg3[%c0_6, %c0_7, %c0_8, %c0_9] : memref<1x1x7x64xbf16, #tpu.memory_space<vmem>>, vector<1x1x7x64xbf16>
    %6 = vector.shape_cast %5 : vector<1x1x7x64xbf16> to vector<7x64xbf16>
    %c0_10 = arith.constant 0 : index
    %c0_11 = arith.constant 0 : index
    %c0_12 = arith.constant 0 : index
    %c0_13 = arith.constant 0 : index
    %7 = vector.load %arg4[%c0_10, %c0_11, %c0_12, %c0_13] : memref<1x2x7x64xbf16, #tpu.memory_space<vmem>>, vector<1x1x7x64xbf16>
    %8 = vector.shape_cast %7 : vector<1x1x7x64xbf16> to vector<7x64xbf16>
    %c0_14 = arith.constant 0 : index
    %c1_15 = arith.constant 1 : index
    %c0_16 = arith.constant 0 : index
    %c0_17 = arith.constant 0 : index
    %9 = vector.load %arg4[%c0_14, %c1_15, %c0_16, %c0_17] : memref<1x2x7x64xbf16, #tpu.memory_space<vmem>>, vector<1x1x7x64xbf16>
    %10 = vector.shape_cast %9 : vector<1x1x7x64xbf16> to vector<7x64xbf16>
    %c0_18 = arith.constant 0 : index
    %c0_19 = arith.constant 0 : index
    %c0_20 = arith.constant 0 : index
    %c0_21 = arith.constant 0 : index
    %11 = vector.load %arg5[%c0_18, %c0_19, %c0_20, %c0_21] : memref<1x1x7x64xbf16, #tpu.memory_space<vmem>>, vector<1x1x7x64xbf16>
    %12 = vector.shape_cast %11 : vector<1x1x7x64xbf16> to vector<7x64xbf16>
    %13 = vector.extract_strided_slice %2 {offsets = [0, 0], sizes = [6, 64], strides = [1, 1]} : vector<7x64xbf16> to vector<6x64xbf16>
    %c0_22 = arith.constant 0 : index
    %c0_23 = arith.constant 0 : index
    %c0_24 = arith.constant 0 : index
    %c0_25 = arith.constant 0 : index
    %14 = vector.load %arg6[%c0_22, %c0_23, %c0_24, %c0_25] : memref<3x3x64x128xbf16, #tpu.memory_space<vmem>>, vector<1x1x64x128xbf16>
    %15 = vector.shape_cast %14 : vector<1x1x64x128xbf16> to vector<64x128xbf16>
    %cst_26 = arith.constant dense<0.000000e+00> : vector<6x128xf32>
    %16 = tpu.matmul %13, %15, %cst_26 {dimension_numbers = #tpu.dot_dimension_numbers<[1], [0], [0], [1], [0, 0, 1, 1], [], []>} : vector<6x64xbf16>, vector<64x128xbf16>, vector<6x128xf32> -> vector<6x128xf32>
    %17 = arith.addf %0, %16 : vector<6x128xf32>
    %18 = vector.extract_strided_slice %8 {offsets = [0, 0], sizes = [6, 64], strides = [1, 1]} : vector<7x64xbf16> to vector<6x64xbf16>
    %c0_27 = arith.constant 0 : index
    %c1_28 = arith.constant 1 : index
    %c0_29 = arith.constant 0 : index
    %c0_30 = arith.constant 0 : index
    %19 = vector.load %arg6[%c0_27, %c1_28, %c0_29, %c0_30] : memref<3x3x64x128xbf16, #tpu.memory_space<vmem>>, vector<1x1x64x128xbf16>
    %20 = vector.shape_cast %19 : vector<1x1x64x128xbf16> to vector<64x128xbf16>
    %cst_31 = arith.constant dense<0.000000e+00> : vector<6x128xf32>
    %21 = tpu.matmul %18, %20, %cst_31 {dimension_numbers = #tpu.dot_dimension_numbers<[1], [0], [0], [1], [0, 0, 1, 1], [], []>} : vector<6x64xbf16>, vector<64x128xbf16>, vector<6x128xf32> -> vector<6x128xf32>
    %22 = arith.addf %17, %21 : vector<6x128xf32>
    %23 = vector.extract_strided_slice %2 {offsets = [1, 0], sizes = [6, 64], strides = [1, 1]} : vector<7x64xbf16> to vector<6x64xbf16>
    %c0_32 = arith.constant 0 : index
    %c2 = arith.constant 2 : index
    %c0_33 = arith.constant 0 : index
    %c0_34 = arith.constant 0 : index
    %24 = vector.load %arg6[%c0_32, %c2, %c0_33, %c0_34] : memref<3x3x64x128xbf16, #tpu.memory_space<vmem>>, vector<1x1x64x128xbf16>
    %25 = vector.shape_cast %24 : vector<1x1x64x128xbf16> to vector<64x128xbf16>
    %cst_35 = arith.constant dense<0.000000e+00> : vector<6x128xf32>
    %26 = tpu.matmul %23, %25, %cst_35 {dimension_numbers = #tpu.dot_dimension_numbers<[1], [0], [0], [1], [0, 0, 1, 1], [], []>} : vector<6x64xbf16>, vector<64x128xbf16>, vector<6x128xf32> -> vector<6x128xf32>
    %27 = arith.addf %22, %26 : vector<6x128xf32>
    %28 = vector.extract_strided_slice %4 {offsets = [0, 0], sizes = [6, 64], strides = [1, 1]} : vector<7x64xbf16> to vector<6x64xbf16>
    %c1_36 = arith.constant 1 : index
    %c0_37 = arith.constant 0 : index
    %c0_38 = arith.constant 0 : index
    %c0_39 = arith.constant 0 : index
    %29 = vector.load %arg6[%c1_36, %c0_37, %c0_38, %c0_39] : memref<3x3x64x128xbf16, #tpu.memory_space<vmem>>, vector<1x1x64x128xbf16>
    %30 = vector.shape_cast %29 : vector<1x1x64x128xbf16> to vector<64x128xbf16>
    %cst_40 = arith.constant dense<0.000000e+00> : vector<6x128xf32>
    %31 = tpu.matmul %28, %30, %cst_40 {dimension_numbers = #tpu.dot_dimension_numbers<[1], [0], [0], [1], [0, 0, 1, 1], [], []>} : vector<6x64xbf16>, vector<64x128xbf16>, vector<6x128xf32> -> vector<6x128xf32>
    %32 = arith.addf %27, %31 : vector<6x128xf32>
    %33 = vector.extract_strided_slice %10 {offsets = [0, 0], sizes = [6, 64], strides = [1, 1]} : vector<7x64xbf16> to vector<6x64xbf16>
    %c1_41 = arith.constant 1 : index
    %c1_42 = arith.constant 1 : index
    %c0_43 = arith.constant 0 : index
    %c0_44 = arith.constant 0 : index
    %34 = vector.load %arg6[%c1_41, %c1_42, %c0_43, %c0_44] : memref<3x3x64x128xbf16, #tpu.memory_space<vmem>>, vector<1x1x64x128xbf16>
    %35 = vector.shape_cast %34 : vector<1x1x64x128xbf16> to vector<64x128xbf16>
    %cst_45 = arith.constant dense<0.000000e+00> : vector<6x128xf32>
    %36 = tpu.matmul %33, %35, %cst_45 {dimension_numbers = #tpu.dot_dimension_numbers<[1], [0], [0], [1], [0, 0, 1, 1], [], []>} : vector<6x64xbf16>, vector<64x128xbf16>, vector<6x128xf32> -> vector<6x128xf32>
    %37 = arith.addf %32, %36 : vector<6x128xf32>
    %38 = vector.extract_strided_slice %4 {offsets = [1, 0], sizes = [6, 64], strides = [1, 1]} : vector<7x64xbf16> to vector<6x64xbf16>
    %c1_46 = arith.constant 1 : index
    %c2_47 = arith.constant 2 : index
    %c0_48 = arith.constant 0 : index
    %c0_49 = arith.constant 0 : index
    %39 = vector.load %arg6[%c1_46, %c2_47, %c0_48, %c0_49] : memref<3x3x64x128xbf16, #tpu.memory_space<vmem>>, vector<1x1x64x128xbf16>
    %40 = vector.shape_cast %39 : vector<1x1x64x128xbf16> to vector<64x128xbf16>
    %cst_50 = arith.constant dense<0.000000e+00> : vector<6x128xf32>
    %41 = tpu.matmul %38, %40, %cst_50 {dimension_numbers = #tpu.dot_dimension_numbers<[1], [0], [0], [1], [0, 0, 1, 1], [], []>} : vector<6x64xbf16>, vector<64x128xbf16>, vector<6x128xf32> -> vector<6x128xf32>
    %42 = arith.addf %37, %41 : vector<6x128xf32>
    %43 = vector.extract_strided_slice %6 {offsets = [0, 0], sizes = [6, 64], strides = [1, 1]} : vector<7x64xbf16> to vector<6x64xbf16>
    %c2_51 = arith.constant 2 : index
    %c0_52 = arith.constant 0 : index
    %c0_53 = arith.constant 0 : index
    %c0_54 = arith.constant 0 : index
    %44 = vector.load %arg6[%c2_51, %c0_52, %c0_53, %c0_54] : memref<3x3x64x128xbf16, #tpu.memory_space<vmem>>, vector<1x1x64x128xbf16>
    %45 = vector.shape_cast %44 : vector<1x1x64x128xbf16> to vector<64x128xbf16>
    %cst_55 = arith.constant dense<0.000000e+00> : vector<6x128xf32>
    %46 = tpu.matmul %43, %45, %cst_55 {dimension_numbers = #tpu.dot_dimension_numbers<[1], [0], [0], [1], [0, 0, 1, 1], [], []>} : vector<6x64xbf16>, vector<64x128xbf16>, vector<6x128xf32> -> vector<6x128xf32>
    %47 = arith.addf %42, %46 : vector<6x128xf32>
    %48 = vector.extract_strided_slice %12 {offsets = [0, 0], sizes = [6, 64], strides = [1, 1]} : vector<7x64xbf16> to vector<6x64xbf16>
    %c2_56 = arith.constant 2 : index
    %c1_57 = arith.constant 1 : index
    %c0_58 = arith.constant 0 : index
    %c0_59 = arith.constant 0 : index
    %49 = vector.load %arg6[%c2_56, %c1_57, %c0_58, %c0_59] : memref<3x3x64x128xbf16, #tpu.memory_space<vmem>>, vector<1x1x64x128xbf16>
    %50 = vector.shape_cast %49 : vector<1x1x64x128xbf16> to vector<64x128xbf16>
    %cst_60 = arith.constant dense<0.000000e+00> : vector<6x128xf32>
    %51 = tpu.matmul %48, %50, %cst_60 {dimension_numbers = #tpu.dot_dimension_numbers<[1], [0], [0], [1], [0, 0, 1, 1], [], []>} : vector<6x64xbf16>, vector<64x128xbf16>, vector<6x128xf32> -> vector<6x128xf32>
    %52 = arith.addf %47, %51 : vector<6x128xf32>
    %53 = vector.extract_strided_slice %6 {offsets = [1, 0], sizes = [6, 64], strides = [1, 1]} : vector<7x64xbf16> to vector<6x64xbf16>
    %c2_61 = arith.constant 2 : index
    %c2_62 = arith.constant 2 : index
    %c0_63 = arith.constant 0 : index
    %c0_64 = arith.constant 0 : index
    %54 = vector.load %arg6[%c2_61, %c2_62, %c0_63, %c0_64] : memref<3x3x64x128xbf16, #tpu.memory_space<vmem>>, vector<1x1x64x128xbf16>
    %55 = vector.shape_cast %54 : vector<1x1x64x128xbf16> to vector<64x128xbf16>
    %cst_65 = arith.constant dense<0.000000e+00> : vector<6x128xf32>
    %56 = tpu.matmul %53, %55, %cst_65 {dimension_numbers = #tpu.dot_dimension_numbers<[1], [0], [0], [1], [0, 0, 1, 1], [], []>} : vector<6x64xbf16>, vector<64x128xbf16>, vector<6x128xf32> -> vector<6x128xf32>
    %57 = arith.addf %52, %56 : vector<6x128xf32>
    %c0_66 = arith.constant 0 : index
    %c0_67 = arith.constant 0 : index
    %58 = vector.load %arg7[%c0_66, %c0_67] : memref<1x128xf32, #tpu.memory_space<vmem>>, vector<1x128xf32>
    %59 = vector.broadcast %58 : vector<1x128xf32> to vector<6x128xf32>
    %60 = arith.addf %57, %59 : vector<6x128xf32>
    %cst_68 = arith.constant 0.000000e+00 : f32
    %61 = vector.broadcast %cst_68 : f32 to vector<6x128xf32>
    %62 = arith.maximumf %60, %61 : vector<6x128xf32>
    %63 = arith.truncf %62 : vector<6x128xf32> to vector<6x128xbf16>
    %c0_69 = arith.constant 0 : index
    %c0_70 = arith.constant 0 : index
    %c0_71 = arith.constant 0 : index
    %c0_72 = arith.constant 0 : index
    %64 = vector.load %arg8[%c0_69, %c0_70, %c0_71, %c0_72] : memref<1x1x6x128xbf16, #tpu.memory_space<vmem>>, vector<1x1x6x128xbf16>
    %65 = vector.shape_cast %64 : vector<1x1x6x128xbf16> to vector<6x128xbf16>
    %66 = vector.shape_cast %63 : vector<6x128xbf16> to vector<1x1x6x128xbf16>
    tpu.vector_store %arg8[%c0_69, %c0_70, %c0_71, %c0_72], %66 {strides = array<i32>} : memref<1x1x6x128xbf16, #tpu.memory_space<vmem>>, vector<1x1x6x128xbf16>,
    return
  }
  func.func @transform_0(%arg0: i32, %arg1: i32) -> (i32, i32, i32, i32) {
    %c0_i32 = arith.constant 0 : i32
    %c0_i32_0 = arith.constant 0 : i32
    %c0_i32_1 = arith.constant 0 : i32
    return %arg0, %arg1, %c0_i32, %c0_i32_0 : i32, i32, i32, i32
  }
  func.func @transform_1(%arg0: i32, %arg1: i32) -> (i32, i32, i32, i32) {
    %c2_i32 = arith.constant 2 : i32
    %0 = arith.muli %c2_i32, %arg1 : i32
    %c2_i32_0 = arith.constant 2 : i32
    %1 = arith.addi %0, %c2_i32_0 : i32
    %c0_i32 = arith.constant 0 : i32
    %c0_i32_1 = arith.constant 0 : i32
    %c0_i32_2 = arith.constant 0 : i32
    return %arg0, %1, %c0_i32, %c0_i32_1 : i32, i32, i32, i32
  }
  func.func @transform_2(%arg0: i32, %arg1: i32) -> (i32, i32, i32, i32) {
    %c0_i32 = arith.constant 0 : i32
    %c0_i32_0 = arith.constant 0 : i32
    %c0_i32_1 = arith.constant 0 : i32
    return %arg0, %arg1, %c0_i32, %c0_i32_0 : i32, i32, i32, i32
  }
  func.func @transform_3(%arg0: i32, %arg1: i32) -> (i32, i32, i32, i32) {
    %c2_i32 = arith.constant 2 : i32
    %0 = arith.muli %c2_i32, %arg1 : i32
    %c2_i32_0 = arith.constant 2 : i32
    %1 = arith.addi %0, %c2_i32_0 : i32
    %c0_i32 = arith.constant 0 : i32
    %c0_i32_1 = arith.constant 0 : i32
    %c0_i32_2 = arith.constant 0 : i32
    return %arg0, %1, %c0_i32, %c0_i32_1 : i32, i32, i32, i32
  }
  func.func @transform_4(%arg0: i32, %arg1: i32) -> (i32, i32, i32, i32) {
    %c0_i32 = arith.constant 0 : i32
    %c0_i32_0 = arith.constant 0 : i32
    %c0_i32_1 = arith.constant 0 : i32
    %c0_i32_2 = arith.constant 0 : i32
    %c0_i32_3 = arith.constant 0 : i32
    return %c0_i32, %c0_i32_0, %c0_i32_1, %c0_i32_2 : i32, i32, i32, i32
  }
  func.func @transform_5(%arg0: i32, %arg1: i32) -> (i32, i32) {
    %c0_i32 = arith.constant 0 : i32
    %c0_i32_0 = arith.constant 0 : i32
    %c0_i32_1 = arith.constant 0 : i32
    return %c0_i32, %c0_i32_0 : i32, i32
  }
  func.func @transform_6(%arg0: i32, %arg1: i32) -> (i32, i32, i32, i32) {
    %c0_i32 = arith.constant 0 : i32
    %c0_i32_0 = arith.constant 0 : i32
    %c0_i32_1 = arith.constant 0 : i32
    return %arg0, %arg1, %c0_i32, %c0_i32_0 : i32, i32, i32, i32
  }
}

module attributes {stable_mosaic.version = 11 : i64} {
  func.func @_conv3x3_s2_row_kernel(%arg0: i32, %arg1: i32, %arg2: memref<1x2x4x128xbf16, #tpu.memory_space<vmem>>, %arg3: memref<1x1x4x128xbf16, #tpu.memory_space<vmem>>, %arg4: memref<1x2x4x128xbf16, #tpu.memory_space<vmem>>, %arg5: memref<1x1x4x128xbf16, #tpu.memory_space<vmem>>, %arg6: memref<3x3x128x256xbf16, #tpu.memory_space<vmem>>, %arg7: memref<1x256xf32, #tpu.memory_space<vmem>>, %arg8: memref<1x1x3x256xbf16, #tpu.memory_space<vmem>>) attributes {dimension_semantics = [#tpu.dimension_semantics<parallel>, #tpu.dimension_semantics<parallel>], iteration_bounds = array<i64: 2, 2>, scalar_prefetch = 0 : i64, scratch_operands = 0 : i64, tpu.core_type = #tpu.core_type<tc>, window_params = [{transform_indices = @transform_0, window_bounds = array<i64: 1, 2, 4, 128>}, {transform_indices = @transform_1, window_bounds = array<i64: 1, 1, 4, 128>}, {transform_indices = @transform_2, window_bounds = array<i64: 1, 2, 4, 128>}, {transform_indices = @transform_3, window_bounds = array<i64: 1, 1, 4, 128>}, {pipeline_mode = #tpu.pipeline_mode<synchronous>, transform_indices = @transform_4, window_bounds = array<i64: 3, 3, 128, 256>}, {pipeline_mode = #tpu.pipeline_mode<synchronous>, transform_indices = @transform_5, window_bounds = array<i64: 1, 256>}, {transform_indices = @transform_6, window_bounds = array<i64: 1, 1, 3, 256>}]} {
    %cst = arith.constant 0.000000e+00 : f32
    %0 = vector.broadcast %cst : f32 to vector<3x256xf32>
    %c0 = arith.constant 0 : index
    %c0_0 = arith.constant 0 : index
    %c0_1 = arith.constant 0 : index
    %c0_2 = arith.constant 0 : index
    %1 = vector.load %arg2[%c0, %c0_0, %c0_1, %c0_2] : memref<1x2x4x128xbf16, #tpu.memory_space<vmem>>, vector<1x1x4x128xbf16>
    %2 = vector.shape_cast %1 : vector<1x1x4x128xbf16> to vector<4x128xbf16>
    %c0_3 = arith.constant 0 : index
    %c1 = arith.constant 1 : index
    %c0_4 = arith.constant 0 : index
    %c0_5 = arith.constant 0 : index
    %3 = vector.load %arg2[%c0_3, %c1, %c0_4, %c0_5] : memref<1x2x4x128xbf16, #tpu.memory_space<vmem>>, vector<1x1x4x128xbf16>
    %4 = vector.shape_cast %3 : vector<1x1x4x128xbf16> to vector<4x128xbf16>
    %c0_6 = arith.constant 0 : index
    %c0_7 = arith.constant 0 : index
    %c0_8 = arith.constant 0 : index
    %c0_9 = arith.constant 0 : index
    %5 = vector.load %arg3[%c0_6, %c0_7, %c0_8, %c0_9] : memref<1x1x4x128xbf16, #tpu.memory_space<vmem>>, vector<1x1x4x128xbf16>
    %6 = vector.shape_cast %5 : vector<1x1x4x128xbf16> to vector<4x128xbf16>
    %c0_10 = arith.constant 0 : index
    %c0_11 = arith.constant 0 : index
    %c0_12 = arith.constant 0 : index
    %c0_13 = arith.constant 0 : index
    %7 = vector.load %arg4[%c0_10, %c0_11, %c0_12, %c0_13] : memref<1x2x4x128xbf16, #tpu.memory_space<vmem>>, vector<1x1x4x128xbf16>
    %8 = vector.shape_cast %7 : vector<1x1x4x128xbf16> to vector<4x128xbf16>
    %c0_14 = arith.constant 0 : index
    %c1_15 = arith.constant 1 : index
    %c0_16 = arith.constant 0 : index
    %c0_17 = arith.constant 0 : index
    %9 = vector.load %arg4[%c0_14, %c1_15, %c0_16, %c0_17] : memref<1x2x4x128xbf16, #tpu.memory_space<vmem>>, vector<1x1x4x128xbf16>
    %10 = vector.shape_cast %9 : vector<1x1x4x128xbf16> to vector<4x128xbf16>
    %c0_18 = arith.constant 0 : index
    %c0_19 = arith.constant 0 : index
    %c0_20 = arith.constant 0 : index
    %c0_21 = arith.constant 0 : index
    %11 = vector.load %arg5[%c0_18, %c0_19, %c0_20, %c0_21] : memref<1x1x4x128xbf16, #tpu.memory_space<vmem>>, vector<1x1x4x128xbf16>
    %12 = vector.shape_cast %11 : vector<1x1x4x128xbf16> to vector<4x128xbf16>
    %13 = vector.extract_strided_slice %2 {offsets = [0, 0], sizes = [3, 128], strides = [1, 1]} : vector<4x128xbf16> to vector<3x128xbf16>
    %c0_22 = arith.constant 0 : index
    %c0_23 = arith.constant 0 : index
    %c0_24 = arith.constant 0 : index
    %c0_25 = arith.constant 0 : index
    %14 = vector.load %arg6[%c0_22, %c0_23, %c0_24, %c0_25] : memref<3x3x128x256xbf16, #tpu.memory_space<vmem>>, vector<1x1x128x256xbf16>
    %15 = vector.shape_cast %14 : vector<1x1x128x256xbf16> to vector<128x256xbf16>
    %cst_26 = arith.constant dense<0.000000e+00> : vector<3x256xf32>
    %16 = tpu.matmul %13, %15, %cst_26 {dimension_numbers = #tpu.dot_dimension_numbers<[1], [0], [0], [1], [0, 0, 1, 1], [], []>} : vector<3x128xbf16>, vector<128x256xbf16>, vector<3x256xf32> -> vector<3x256xf32>
    %17 = arith.addf %0, %16 : vector<3x256xf32>
    %18 = vector.extract_strided_slice %8 {offsets = [0, 0], sizes = [3, 128], strides = [1, 1]} : vector<4x128xbf16> to vector<3x128xbf16>
    %c0_27 = arith.constant 0 : index
    %c1_28 = arith.constant 1 : index
    %c0_29 = arith.constant 0 : index
    %c0_30 = arith.constant 0 : index
    %19 = vector.load %arg6[%c0_27, %c1_28, %c0_29, %c0_30] : memref<3x3x128x256xbf16, #tpu.memory_space<vmem>>, vector<1x1x128x256xbf16>
    %20 = vector.shape_cast %19 : vector<1x1x128x256xbf16> to vector<128x256xbf16>
    %cst_31 = arith.constant dense<0.000000e+00> : vector<3x256xf32>
    %21 = tpu.matmul %18, %20, %cst_31 {dimension_numbers = #tpu.dot_dimension_numbers<[1], [0], [0], [1], [0, 0, 1, 1], [], []>} : vector<3x128xbf16>, vector<128x256xbf16>, vector<3x256xf32> -> vector<3x256xf32>
    %22 = arith.addf %17, %21 : vector<3x256xf32>
    %23 = vector.extract_strided_slice %2 {offsets = [1, 0], sizes = [3, 128], strides = [1, 1]} : vector<4x128xbf16> to vector<3x128xbf16>
    %c0_32 = arith.constant 0 : index
    %c2 = arith.constant 2 : index
    %c0_33 = arith.constant 0 : index
    %c0_34 = arith.constant 0 : index
    %24 = vector.load %arg6[%c0_32, %c2, %c0_33, %c0_34] : memref<3x3x128x256xbf16, #tpu.memory_space<vmem>>, vector<1x1x128x256xbf16>
    %25 = vector.shape_cast %24 : vector<1x1x128x256xbf16> to vector<128x256xbf16>
    %cst_35 = arith.constant dense<0.000000e+00> : vector<3x256xf32>
    %26 = tpu.matmul %23, %25, %cst_35 {dimension_numbers = #tpu.dot_dimension_numbers<[1], [0], [0], [1], [0, 0, 1, 1], [], []>} : vector<3x128xbf16>, vector<128x256xbf16>, vector<3x256xf32> -> vector<3x256xf32>
    %27 = arith.addf %22, %26 : vector<3x256xf32>
    %28 = vector.extract_strided_slice %4 {offsets = [0, 0], sizes = [3, 128], strides = [1, 1]} : vector<4x128xbf16> to vector<3x128xbf16>
    %c1_36 = arith.constant 1 : index
    %c0_37 = arith.constant 0 : index
    %c0_38 = arith.constant 0 : index
    %c0_39 = arith.constant 0 : index
    %29 = vector.load %arg6[%c1_36, %c0_37, %c0_38, %c0_39] : memref<3x3x128x256xbf16, #tpu.memory_space<vmem>>, vector<1x1x128x256xbf16>
    %30 = vector.shape_cast %29 : vector<1x1x128x256xbf16> to vector<128x256xbf16>
    %cst_40 = arith.constant dense<0.000000e+00> : vector<3x256xf32>
    %31 = tpu.matmul %28, %30, %cst_40 {dimension_numbers = #tpu.dot_dimension_numbers<[1], [0], [0], [1], [0, 0, 1, 1], [], []>} : vector<3x128xbf16>, vector<128x256xbf16>, vector<3x256xf32> -> vector<3x256xf32>
    %32 = arith.addf %27, %31 : vector<3x256xf32>
    %33 = vector.extract_strided_slice %10 {offsets = [0, 0], sizes = [3, 128], strides = [1, 1]} : vector<4x128xbf16> to vector<3x128xbf16>
    %c1_41 = arith.constant 1 : index
    %c1_42 = arith.constant 1 : index
    %c0_43 = arith.constant 0 : index
    %c0_44 = arith.constant 0 : index
    %34 = vector.load %arg6[%c1_41, %c1_42, %c0_43, %c0_44] : memref<3x3x128x256xbf16, #tpu.memory_space<vmem>>, vector<1x1x128x256xbf16>
    %35 = vector.shape_cast %34 : vector<1x1x128x256xbf16> to vector<128x256xbf16>
    %cst_45 = arith.constant dense<0.000000e+00> : vector<3x256xf32>
    %36 = tpu.matmul %33, %35, %cst_45 {dimension_numbers = #tpu.dot_dimension_numbers<[1], [0], [0], [1], [0, 0, 1, 1], [], []>} : vector<3x128xbf16>, vector<128x256xbf16>, vector<3x256xf32> -> vector<3x256xf32>
    %37 = arith.addf %32, %36 : vector<3x256xf32>
    %38 = vector.extract_strided_slice %4 {offsets = [1, 0], sizes = [3, 128], strides = [1, 1]} : vector<4x128xbf16> to vector<3x128xbf16>
    %c1_46 = arith.constant 1 : index
    %c2_47 = arith.constant 2 : index
    %c0_48 = arith.constant 0 : index
    %c0_49 = arith.constant 0 : index
    %39 = vector.load %arg6[%c1_46, %c2_47, %c0_48, %c0_49] : memref<3x3x128x256xbf16, #tpu.memory_space<vmem>>, vector<1x1x128x256xbf16>
    %40 = vector.shape_cast %39 : vector<1x1x128x256xbf16> to vector<128x256xbf16>
    %cst_50 = arith.constant dense<0.000000e+00> : vector<3x256xf32>
    %41 = tpu.matmul %38, %40, %cst_50 {dimension_numbers = #tpu.dot_dimension_numbers<[1], [0], [0], [1], [0, 0, 1, 1], [], []>} : vector<3x128xbf16>, vector<128x256xbf16>, vector<3x256xf32> -> vector<3x256xf32>
    %42 = arith.addf %37, %41 : vector<3x256xf32>
    %43 = vector.extract_strided_slice %6 {offsets = [0, 0], sizes = [3, 128], strides = [1, 1]} : vector<4x128xbf16> to vector<3x128xbf16>
    %c2_51 = arith.constant 2 : index
    %c0_52 = arith.constant 0 : index
    %c0_53 = arith.constant 0 : index
    %c0_54 = arith.constant 0 : index
    %44 = vector.load %arg6[%c2_51, %c0_52, %c0_53, %c0_54] : memref<3x3x128x256xbf16, #tpu.memory_space<vmem>>, vector<1x1x128x256xbf16>
    %45 = vector.shape_cast %44 : vector<1x1x128x256xbf16> to vector<128x256xbf16>
    %cst_55 = arith.constant dense<0.000000e+00> : vector<3x256xf32>
    %46 = tpu.matmul %43, %45, %cst_55 {dimension_numbers = #tpu.dot_dimension_numbers<[1], [0], [0], [1], [0, 0, 1, 1], [], []>} : vector<3x128xbf16>, vector<128x256xbf16>, vector<3x256xf32> -> vector<3x256xf32>
    %47 = arith.addf %42, %46 : vector<3x256xf32>
    %48 = vector.extract_strided_slice %12 {offsets = [0, 0], sizes = [3, 128], strides = [1, 1]} : vector<4x128xbf16> to vector<3x128xbf16>
    %c2_56 = arith.constant 2 : index
    %c1_57 = arith.constant 1 : index
    %c0_58 = arith.constant 0 : index
    %c0_59 = arith.constant 0 : index
    %49 = vector.load %arg6[%c2_56, %c1_57, %c0_58, %c0_59] : memref<3x3x128x256xbf16, #tpu.memory_space<vmem>>, vector<1x1x128x256xbf16>
    %50 = vector.shape_cast %49 : vector<1x1x128x256xbf16> to vector<128x256xbf16>
    %cst_60 = arith.constant dense<0.000000e+00> : vector<3x256xf32>
    %51 = tpu.matmul %48, %50, %cst_60 {dimension_numbers = #tpu.dot_dimension_numbers<[1], [0], [0], [1], [0, 0, 1, 1], [], []>} : vector<3x128xbf16>, vector<128x256xbf16>, vector<3x256xf32> -> vector<3x256xf32>
    %52 = arith.addf %47, %51 : vector<3x256xf32>
    %53 = vector.extract_strided_slice %6 {offsets = [1, 0], sizes = [3, 128], strides = [1, 1]} : vector<4x128xbf16> to vector<3x128xbf16>
    %c2_61 = arith.constant 2 : index
    %c2_62 = arith.constant 2 : index
    %c0_63 = arith.constant 0 : index
    %c0_64 = arith.constant 0 : index
    %54 = vector.load %arg6[%c2_61, %c2_62, %c0_63, %c0_64] : memref<3x3x128x256xbf16, #tpu.memory_space<vmem>>, vector<1x1x128x256xbf16>
    %55 = vector.shape_cast %54 : vector<1x1x128x256xbf16> to vector<128x256xbf16>
    %cst_65 = arith.constant dense<0.000000e+00> : vector<3x256xf32>
    %56 = tpu.matmul %53, %55, %cst_65 {dimension_numbers = #tpu.dot_dimension_numbers<[1], [0], [0], [1], [0, 0, 1, 1], [], []>} : vector<3x128xbf16>, vector<128x256xbf16>, vector<3x256xf32> -> vector<3x256xf32>
    %57 = arith.addf %52, %56 : vector<3x256xf32>
    %c0_66 = arith.constant 0 : index
    %c0_67 = arith.constant 0 : index
    %58 = vector.load %arg7[%c0_66, %c0_67] : memref<1x256xf32, #tpu.memory_space<vmem>>, vector<1x256xf32>
    %59 = vector.broadcast %58 : vector<1x256xf32> to vector<3x256xf32>
    %60 = arith.addf %57, %59 : vector<3x256xf32>
    %cst_68 = arith.constant 0.000000e+00 : f32
    %61 = vector.broadcast %cst_68 : f32 to vector<3x256xf32>
    %62 = arith.maximumf %60, %61 : vector<3x256xf32>
    %63 = arith.truncf %62 : vector<3x256xf32> to vector<3x256xbf16>
    %c0_69 = arith.constant 0 : index
    %c0_70 = arith.constant 0 : index
    %c0_71 = arith.constant 0 : index
    %c0_72 = arith.constant 0 : index
    %64 = vector.load %arg8[%c0_69, %c0_70, %c0_71, %c0_72] : memref<1x1x3x256xbf16, #tpu.memory_space<vmem>>, vector<1x1x3x256xbf16>
    %65 = vector.shape_cast %64 : vector<1x1x3x256xbf16> to vector<3x256xbf16>
    %66 = vector.shape_cast %63 : vector<3x256xbf16> to vector<1x1x3x256xbf16>
    tpu.vector_store %arg8[%c0_69, %c0_70, %c0_71, %c0_72], %66 {strides = array<i32>} : memref<1x1x3x256xbf16, #tpu.memory_space<vmem>>, vector<1x1x3x256xbf16>,
    return
  }
  func.func @transform_0(%arg0: i32, %arg1: i32) -> (i32, i32, i32, i32) {
    %c0_i32 = arith.constant 0 : i32
    %c0_i32_0 = arith.constant 0 : i32
    %c0_i32_1 = arith.constant 0 : i32
    return %arg0, %arg1, %c0_i32, %c0_i32_0 : i32, i32, i32, i32
  }
  func.func @transform_1(%arg0: i32, %arg1: i32) -> (i32, i32, i32, i32) {
    %c2_i32 = arith.constant 2 : i32
    %0 = arith.muli %c2_i32, %arg1 : i32
    %c2_i32_0 = arith.constant 2 : i32
    %1 = arith.addi %0, %c2_i32_0 : i32
    %c0_i32 = arith.constant 0 : i32
    %c0_i32_1 = arith.constant 0 : i32
    %c0_i32_2 = arith.constant 0 : i32
    return %arg0, %1, %c0_i32, %c0_i32_1 : i32, i32, i32, i32
  }
  func.func @transform_2(%arg0: i32, %arg1: i32) -> (i32, i32, i32, i32) {
    %c0_i32 = arith.constant 0 : i32
    %c0_i32_0 = arith.constant 0 : i32
    %c0_i32_1 = arith.constant 0 : i32
    return %arg0, %arg1, %c0_i32, %c0_i32_0 : i32, i32, i32, i32
  }
  func.func @transform_3(%arg0: i32, %arg1: i32) -> (i32, i32, i32, i32) {
    %c2_i32 = arith.constant 2 : i32
    %0 = arith.muli %c2_i32, %arg1 : i32
    %c2_i32_0 = arith.constant 2 : i32
    %1 = arith.addi %0, %c2_i32_0 : i32
    %c0_i32 = arith.constant 0 : i32
    %c0_i32_1 = arith.constant 0 : i32
    %c0_i32_2 = arith.constant 0 : i32
    return %arg0, %1, %c0_i32, %c0_i32_1 : i32, i32, i32, i32
  }
  func.func @transform_4(%arg0: i32, %arg1: i32) -> (i32, i32, i32, i32) {
    %c0_i32 = arith.constant 0 : i32
    %c0_i32_0 = arith.constant 0 : i32
    %c0_i32_1 = arith.constant 0 : i32
    %c0_i32_2 = arith.constant 0 : i32
    %c0_i32_3 = arith.constant 0 : i32
    return %c0_i32, %c0_i32_0, %c0_i32_1, %c0_i32_2 : i32, i32, i32, i32
  }
  func.func @transform_5(%arg0: i32, %arg1: i32) -> (i32, i32) {
    %c0_i32 = arith.constant 0 : i32
    %c0_i32_0 = arith.constant 0 : i32
    %c0_i32_1 = arith.constant 0 : i32
    return %c0_i32, %c0_i32_0 : i32, i32
  }
  func.func @transform_6(%arg0: i32, %arg1: i32) -> (i32, i32, i32, i32) {
    %c0_i32 = arith.constant 0 : i32
    %c0_i32_0 = arith.constant 0 : i32
    %c0_i32_1 = arith.constant 0 : i32
    return %arg0, %arg1, %c0_i32, %c0_i32_0 : i32, i32, i32, i32
  }
}

module attributes {stable_mosaic.version = 11 : i64} {
  func.func @_fc_head_kernel(%arg0: i32, %arg1: memref<2x512xbf16, #tpu.memory_space<vmem>>, %arg2: memref<512x128xbf16, #tpu.memory_space<vmem>>, %arg3: memref<1x128xf32, #tpu.memory_space<vmem>>, %arg4: memref<128x6xf32, #tpu.memory_space<vmem>>, %arg5: memref<1x6xf32, #tpu.memory_space<vmem>>, %arg6: memref<2x6xf32, #tpu.memory_space<vmem>>, %arg7: memref<2x128xf32, #tpu.memory_space<vmem>>) attributes {dimension_semantics = [#tpu.dimension_semantics<arbitrary>], iteration_bounds = array<i64: 3>, scalar_prefetch = 0 : i64, scratch_operands = 1 : i64, tpu.core_type = #tpu.core_type<tc>, window_params = [{transform_indices = @transform_0, window_bounds = array<i64: 2, 512>}, {transform_indices = @transform_1, window_bounds = array<i64: 512, 128>}, {pipeline_mode = #tpu.pipeline_mode<synchronous>, transform_indices = @transform_2, window_bounds = array<i64: 1, 128>}, {pipeline_mode = #tpu.pipeline_mode<synchronous>, transform_indices = @transform_3, window_bounds = array<i64: 128, 6>}, {pipeline_mode = #tpu.pipeline_mode<synchronous>, transform_indices = @transform_4, window_bounds = array<i64: 1, 6>}, {pipeline_mode = #tpu.pipeline_mode<synchronous>, transform_indices = @transform_5, window_bounds = array<i64: 2, 6>}]} {
    %c0_i32 = arith.constant 0 : i32
    %0 = arith.cmpi eq, %arg0, %c0_i32 : i32
    %1 = arith.extui %0 : i1 to i32
    %c0_i32_0 = arith.constant 0 : i32
    %2 = arith.cmpi ne, %1, %c0_i32_0 : i32
    scf.if %2 {
      %cst_9 = arith.constant 0.000000e+00 : f32
      %12 = vector.broadcast %cst_9 : f32 to vector<2x128xf32>
      %c0_10 = arith.constant 0 : index
      %c0_11 = arith.constant 0 : index
      %13 = vector.load %arg7[%c0_10, %c0_11] : memref<2x128xf32, #tpu.memory_space<vmem>>, vector<2x128xf32>
      tpu.vector_store %arg7[%c0_10, %c0_11], %12 {strides = array<i32>} : memref<2x128xf32, #tpu.memory_space<vmem>>, vector<2x128xf32>,
    } else {
    }
    %c0 = arith.constant 0 : index
    %c0_1 = arith.constant 0 : index
    %3 = vector.load %arg7[%c0, %c0_1] : memref<2x128xf32, #tpu.memory_space<vmem>>, vector<2x128xf32>
    %c0_2 = arith.constant 0 : index
    %c0_3 = arith.constant 0 : index
    %4 = vector.load %arg1[%c0_2, %c0_3] : memref<2x512xbf16, #tpu.memory_space<vmem>>, vector<2x512xbf16>
    %c0_4 = arith.constant 0 : index
    %c0_5 = arith.constant 0 : index
    %5 = vector.load %arg2[%c0_4, %c0_5] : memref<512x128xbf16, #tpu.memory_space<vmem>>, vector<512x128xbf16>
    %cst = arith.constant dense<0.000000e+00> : vector<2x128xf32>
    %6 = tpu.matmul %4, %5, %cst {dimension_numbers = #tpu.dot_dimension_numbers<[1], [0], [0], [1], [0, 0, 1, 1], [], []>} : vector<2x512xbf16>, vector<512x128xbf16>, vector<2x128xf32> -> vector<2x128xf32>
    %7 = arith.addf %3, %6 : vector<2x128xf32>
    %c0_6 = arith.constant 0 : index
    %c0_7 = arith.constant 0 : index
    %8 = vector.load %arg7[%c0_6, %c0_7] : memref<2x128xf32, #tpu.memory_space<vmem>>, vector<2x128xf32>
    tpu.vector_store %arg7[%c0_6, %c0_7], %7 {strides = array<i32>} : memref<2x128xf32, #tpu.memory_space<vmem>>, vector<2x128xf32>,
    %c2_i32 = arith.constant 2 : i32
    %9 = arith.cmpi eq, %arg0, %c2_i32 : i32
    %10 = arith.extui %9 : i1 to i32
    %c0_i32_8 = arith.constant 0 : i32
    %11 = arith.cmpi ne, %10, %c0_i32_8 : i32
    scf.if %11 {
      %c0_9 = arith.constant 0 : index
      %c0_10 = arith.constant 0 : index
      %12 = vector.load %arg7[%c0_9, %c0_10] : memref<2x128xf32, #tpu.memory_space<vmem>>, vector<2x128xf32>
      %c0_11 = arith.constant 0 : index
      %c0_12 = arith.constant 0 : index
      %13 = vector.load %arg3[%c0_11, %c0_12] : memref<1x128xf32, #tpu.memory_space<vmem>>, vector<1x128xf32>
      %14 = vector.broadcast %13 : vector<1x128xf32> to vector<2x128xf32>
      %15 = arith.addf %12, %14 : vector<2x128xf32>
      %cst_13 = arith.constant 0.000000e+00 : f32
      %16 = vector.broadcast %cst_13 : f32 to vector<2x128xf32>
      %17 = arith.maximumf %15, %16 : vector<2x128xf32>
      %c0_14 = arith.constant 0 : index
      %c0_15 = arith.constant 0 : index
      %18 = vector.load %arg4[%c0_14, %c0_15] : memref<128x6xf32, #tpu.memory_space<vmem>>, vector<128x6xf32>
      %cst_16 = arith.constant dense<0.000000e+00> : vector<2x6xf32>
      %19 = tpu.matmul %17, %18, %cst_16 {dimension_numbers = #tpu.dot_dimension_numbers<[1], [0], [0], [1], [0, 0, 1, 1], [], []>} : vector<2x128xf32>, vector<128x6xf32>, vector<2x6xf32> -> vector<2x6xf32>
      %c0_17 = arith.constant 0 : index
      %c0_18 = arith.constant 0 : index
      %20 = vector.load %arg5[%c0_17, %c0_18] : memref<1x6xf32, #tpu.memory_space<vmem>>, vector<1x6xf32>
      %21 = vector.broadcast %20 : vector<1x6xf32> to vector<2x6xf32>
      %22 = arith.addf %19, %21 : vector<2x6xf32>
      %cst_19 = arith.constant dense<0xFF800000> : vector<2xf32>
      %23 = vector.multi_reduction <maximumf>, %22, %cst_19 [1] : vector<2x6xf32> to vector<2xf32>
      %24 = vector.shape_cast %23 : vector<2xf32> to vector<2x1xf32>
      %25 = vector.broadcast %24 : vector<2x1xf32> to vector<2x6xf32>
      %26 = arith.subf %22, %25 : vector<2x6xf32>
      %27 = math.exp %26 : vector<2x6xf32>
      %cst_20 = arith.constant dense<0.000000e+00> : vector<2xf32>
      %28 = vector.multi_reduction <add>, %27, %cst_20 [1] : vector<2x6xf32> to vector<2xf32>
      %29 = vector.shape_cast %28 : vector<2xf32> to vector<2x1xf32>
      %30 = vector.broadcast %29 : vector<2x1xf32> to vector<2x6xf32>
      %31 = arith.divf %27, %30 : vector<2x6xf32>
      %c0_21 = arith.constant 0 : index
      %c0_22 = arith.constant 0 : index
      %32 = vector.load %arg6[%c0_21, %c0_22] : memref<2x6xf32, #tpu.memory_space<vmem>>, vector<2x6xf32>
      tpu.vector_store %arg6[%c0_21, %c0_22], %31 {strides = array<i32>} : memref<2x6xf32, #tpu.memory_space<vmem>>, vector<2x6xf32>,
    } else {
    }
    return
  }
  func.func @transform_0(%arg0: i32) -> (i32, i32) {
    %c0_i32 = arith.constant 0 : i32
    %c0_i32_0 = arith.constant 0 : i32
    return %c0_i32, %arg0 : i32, i32
  }
  func.func @transform_1(%arg0: i32) -> (i32, i32) {
    %c0_i32 = arith.constant 0 : i32
    %c0_i32_0 = arith.constant 0 : i32
    return %arg0, %c0_i32 : i32, i32
  }
  func.func @transform_2(%arg0: i32) -> (i32, i32) {
    %c0_i32 = arith.constant 0 : i32
    %c0_i32_0 = arith.constant 0 : i32
    %c0_i32_1 = arith.constant 0 : i32
    return %c0_i32, %c0_i32_0 : i32, i32
  }
  func.func @transform_3(%arg0: i32) -> (i32, i32) {
    %c0_i32 = arith.constant 0 : i32
    %c0_i32_0 = arith.constant 0 : i32
    %c0_i32_1 = arith.constant 0 : i32
    return %c0_i32, %c0_i32_0 : i32, i32
  }
  func.func @transform_4(%arg0: i32) -> (i32, i32) {
    %c0_i32 = arith.constant 0 : i32
    %c0_i32_0 = arith.constant 0 : i32
    %c0_i32_1 = arith.constant 0 : i32
    return %c0_i32, %c0_i32_0 : i32, i32
  }
  func.func @transform_5(%arg0: i32) -> (i32, i32) {
    %c0_i32 = arith.constant 0 : i32
    %c0_i32_0 = arith.constant 0 : i32
    %c0_i32_1 = arith.constant 0 : i32
    return %c0_i32, %c0_i32_0 : i32, i32
  }
}

</mosaic_0001>

<bundles_post_ra>
// kernel: actor_forward.6
= control target key start
LH: loop header
LB: loop body
LE: loop exit
PB: predicated region body
PF: predicated region fallthrough
CT: control target
= control target key end

     0   :  { %vm193_vm0 = vcmask 1043456   ;;  %vm194_vm1 = vcmask 523268   ;;  %s485_s0 = inlined_call_operand.vmem [shape: f32[64,192], index: 0, kind: input, shape index: {}]   ;;  %s486_s1 = inlined_call_operand.vmem [shape: f32[64,192], index: 1, kind: input, shape index: {}]   ;;  %s487_s2 = inlined_call_operand.vmem [shape: f32[64,192], index: 2, kind: input, shape index: {}]   ;;  %s488_s3 = inlined_call_operand.vmem [shape: f32[64,192], index: 3, kind: input, shape index: {}]   ;;  %s489_s4 = inlined_call_operand.vmem [shape: bf16[64,192], index: 4, kind: output, shape index: {}]  }
   0x1   :  { %v17_v0 = vld [vmem:[%s485_s0] sm:$0xff]  ;;  %v18_v1 = vld [vmem:[%s485_s0 + $0x8] sm:$0xff]  ;;  %vm273_vm2 = vmor %vm194_vm1, %vm193_vm0 }
   0x2   :  { %v33_v2 = vld [vmem:[%s486_s1] sm:$0xff]  ;;  %v34_v3 = vld [vmem:[%s486_s1 + $0x8] sm:$0xff]  ;;  %v19_v12 = vld [vmem:[%s485_s0 + $0x10] sm:$0xff] }
   0x3   :  { %v49_v4 = vadd.f32 %v33_v2, %v17_v0  ;;  %v65_v5 = vld [vmem:[%s487_s2] sm:$0xff]  ;;  %v66_v6 = vld [vmem:[%s487_s2 + $0x8] sm:$0xff]  ;;  %v50_v7 = vadd.f32 %v34_v3, %v18_v1  ;;  %v20_v13 = vld [vmem:[%s485_s0 + $0x18] sm:$0xff] }
   0x4   :  { %v97_v8 = vld [vmem:[%s488_s3] sm:$0xff]  ;;  %v98_v9 = vld [vmem:[%s488_s3 + $0x8] sm:$0xff]  ;;  %v35_v14 = vld [vmem:[%s486_s1 + $0x10] sm:$0xff] }
   0x5   :  { %v81_v11 = vadd.f32 %v65_v5, %v49_v4  ;;  %v82_v15 = vadd.f32 %v66_v6, %v50_v7  ;;  %v36_v16 = vld [vmem:[%s486_s1 + $0x18] sm:$0xff]  ;;  %v51_v17 = vadd.f32 %v35_v14, %v19_v12  ;;  %v67_v18 = vld [vmem:[%s487_s2 + $0x10] sm:$0xff]  ;;  %v21_v24 = vld [vmem:[%s485_s0 + $0x20] sm:$0xff] }
   0x6   :  { %v68_v19 = vld [vmem:[%s487_s2 + $0x18] sm:$0xff]  ;;  %v52_v21 = vadd.f32 %v36_v16, %v20_v13  ;;  %v99_v22 = vld [vmem:[%s488_s3 + $0x10] sm:$0xff]  ;;  %v22_v27 = vld [vmem:[%s485_s0 + $0x28] sm:$0xff] }
   0x7   :  { %v113_v20 = vadd.f32 %v97_v8, %v81_v11  ;;  %v100_v23 = vld [vmem:[%s488_s3 + $0x18] sm:$0xff]  ;;  %v114_v25 = vadd.f32 %v98_v9, %v82_v15  ;;  %v83_v26 = vadd.f32 %v67_v18, %v51_v17  ;;  %v37_v28 = vld [vmem:[%s486_s1 + $0x20] sm:$0xff]  ;;  %v38_v29 = vld [vmem:[%s486_s1 + $0x28] sm:$0xff] }
   0x8   :  { %v84_v31 = vadd.f32 %v68_v19, %v52_v21  ;;  %v53_v32 = vadd.f32 %v37_v28, %v21_v24  ;;  %v54_v33 = vadd.f32 %v38_v29, %v22_v27  ;;  %v69_v34 = vld [vmem:[%s487_s2 + $0x20] sm:$0xff]  ;;  %v70_v35 = vld [vmem:[%s487_s2 + $0x28] sm:$0xff]  ;;  %v23_v40 = vld [vmem:[%s485_s0 + $0x30] sm:$0xff] }
   0x9   :  { %v129_v30 = vmul.f32 0.25, %v113_v20  ;;  %v101_v36 = vld [vmem:[%s488_s3 + $0x20] sm:$0xff]  ;;  %v130_v37 = vmul.f32 0.25, %v114_v25  ;;  %v115_v38 = vadd.f32 %v99_v22, %v83_v26  ;;  %v102_v39 = vld [vmem:[%s488_s3 + $0x28] sm:$0xff]  ;;  %v24_v41 = vld [vmem:[%s485_s0 + $0x38] sm:$0xff] }
   0xa   :  { %v116_v42 = vadd.f32 %v100_v23, %v84_v31  ;;  %v85_v43 = vadd.f32 %v69_v34, %v53_v32  ;;  %v86_v44 = vadd.f32 %v70_v35, %v54_v33  ;;  %v39_v45 = vld [vmem:[%s486_s1 + $0x30] sm:$0xff]  ;;  %v40_v46 = vld [vmem:[%s486_s1 + $0x38] sm:$0xff]  ;;  %v25_v58 = vld [vmem:[%s485_s0 + $0x40] sm:$0xff] }
   0xb   :  { %v71_v47 = vld [vmem:[%s487_s2 + $0x30] sm:$0xff]  ;;  %v216_v48 = vpack.c.bf16 %v130_v37, %v129_v30  ;;  %v131_v49 = vmul.f32 0.25, %v115_v38  ;;  %v55_v50 = vadd.f32 %v39_v45, %v23_v40  ;;  %v56_v51 = vadd.f32 %v40_v46, %v24_v41  ;;  %v72_v52 = vld [vmem:[%s487_s2 + $0x38] sm:$0xff]  ;;  %v26_v59 = vld [vmem:[%s485_s0 + $0x48] sm:$0xff] }
   0xc   :  { %v103_v53 = vld [vmem:[%s488_s3 + $0x30] sm:$0xff]  ;;  %v104_v54 = vld [vmem:[%s488_s3 + $0x38] sm:$0xff]  ;;  %v132_v55 = vmul.f32 0.25, %v116_v42  ;;  %v117_v56 = vadd.f32 %v101_v36, %v85_v43  ;;  %v118_v57 = vadd.f32 %v102_v39, %v86_v44  ;;  %v41_v60 = vld [vmem:[%s486_s1 + $0x40] sm:$0xff] }
   0xd   :  { %196 = vst.msk [vmem:[%s489_s4] sm:$0xff] %vm273_vm2, %v216_v48  ;;  %v87_v61 = vadd.f32 %v71_v47, %v55_v50  ;;  %v88_v62 = vadd.f32 %v72_v52, %v56_v51  ;;  %v42_v63 = vld [vmem:[%s486_s1 + $0x48] sm:$0xff]  ;;  %v57_v0 = vadd.f32 %v41_v60, %v25_v58  ;;  %v73_v1 = vld [vmem:[%s487_s2 + $0x40] sm:$0xff]  ;;  %v27_v9 = vld [vmem:[%s485_s0 + $0x50] sm:$0xff] }
   0xe   :  { %v74_v2 = vld [vmem:[%s487_s2 + $0x48] sm:$0xff]  ;;  %v217_v3 = vpack.c.bf16 %v132_v55, %v131_v49  ;;  %v133_v4 = vmul.f32 0.25, %v117_v56  ;;  %v134_v5 = vmul.f32 0.25, %v118_v57  ;;  %v58_v6 = vadd.f32 %v42_v63, %v26_v59  ;;  %v105_v7 = vld [vmem:[%s488_s3 + $0x40] sm:$0xff]  ;;  %v28_v14 = vld [vmem:[%s485_s0 + $0x58] sm:$0xff] }
   0xf   :  { %v106_v8 = vld [vmem:[%s488_s3 + $0x48] sm:$0xff]  ;;  %v119_v11 = vadd.f32 %v103_v53, %v87_v61  ;;  %v120_v12 = vadd.f32 %v104_v54, %v88_v62  ;;  %v89_v13 = vadd.f32 %v73_v1, %v57_v0  ;;  %v43_v15 = vld [vmem:[%s486_s1 + $0x50] sm:$0xff]  ;;  %v44_v16 = vld [vmem:[%s486_s1 + $0x58] sm:$0xff] }
  0x10   :  { %197 = vst.msk [vmem:[%s489_s4 + $0x8] sm:$0xff] %vm273_vm2, %v217_v3  ;;  %v218_v17 = vpack.c.bf16 %v134_v5, %v133_v4  ;;  %v90_v18 = vadd.f32 %v74_v2, %v58_v6  ;;  %v59_v19 = vadd.f32 %v43_v15, %v27_v9  ;;  %v60_v20 = vadd.f32 %v44_v16, %v28_v14  ;;  %v75_v21 = vld [vmem:[%s487_s2 + $0x50] sm:$0xff]  ;;  %v76_v22 = vld [vmem:[%s487_s2 + $0x58] sm:$0xff]  ;;  %v29_v28 = vld [vmem:[%s485_s0 + $0x60] sm:$0xff] }
  0x11   :  { %v107_v23 = vld [vmem:[%s488_s3 + $0x50] sm:$0xff]  ;;  %v135_v24 = vmul.f32 0.25, %v119_v11  ;;  %v136_v25 = vmul.f32 0.25, %v120_v12  ;;  %v121_v26 = vadd.f32 %v105_v7, %v89_v13  ;;  %v108_v27 = vld [vmem:[%s488_s3 + $0x58] sm:$0xff]  ;;  %v30_v29 = vld [vmem:[%s485_s0 + $0x68] sm:$0xff] }
  0x12   :  { %198 = vst.msk [vmem:[%s489_s4 + $0x10] sm:$0xff] %vm273_vm2, %v218_v17  ;;  %v122_v30 = vadd.f32 %v106_v8, %v90_v18  ;;  %v91_v31 = vadd.f32 %v75_v21, %v59_v19  ;;  %v92_v32 = vadd.f32 %v76_v22, %v60_v20  ;;  %v45_v33 = vld [vmem:[%s486_s1 + $0x60] sm:$0xff]  ;;  %v46_v34 = vld [vmem:[%s486_s1 + $0x68] sm:$0xff]  ;;  %v31_v46 = vld [vmem:[%s485_s0 + $0x70] sm:$0xff] }
  0x13   :  { %v77_v35 = vld [vmem:[%s487_s2 + $0x60] sm:$0xff]  ;;  %v219_v36 = vpack.c.bf16 %v136_v25, %v135_v24  ;;  %v137_v37 = vmul.f32 0.25, %v121_v26  ;;  %v61_v38 = vadd.f32 %v45_v33, %v29_v28  ;;  %v62_v39 = vadd.f32 %v46_v34, %v30_v29  ;;  %v78_v40 = vld [vmem:[%s487_s2 + $0x68] sm:$0xff]  ;;  %v32_v47 = vld [vmem:[%s485_s0 + $0x78] sm:$0xff] }
  0x14   :  { %v109_v41 = vld [vmem:[%s488_s3 + $0x60] sm:$0xff]  ;;  %v110_v42 = vld [vmem:[%s488_s3 + $0x68] sm:$0xff]  ;;  %v138_v43 = vmul.f32 0.25, %v122_v30  ;;  %v123_v44 = vadd.f32 %v107_v23, %v91_v31  ;;  %v124_v45 = vadd.f32 %v108_v27, %v92_v32  ;;  %v47_v48 = vld [vmem:[%s486_s1 + $0x70] sm:$0xff] }
  0x15   :  { %199 = vst.msk [vmem:[%s489_s4 + $0x18] sm:$0xff] %vm273_vm2, %v219_v36  ;;  %v93_v49 = vadd.f32 %v77_v35, %v61_v38  ;;  %v94_v50 = vadd.f32 %v78_v40, %v62_v39  ;;  %v48_v51 = vld [vmem:[%s486_s1 + $0x78] sm:$0xff]  ;;  %v63_v52 = vadd.f32 %v47_v48, %v31_v46  ;;  %v79_v53 = vld [vmem:[%s487_s2 + $0x70] sm:$0xff] }
  0x16   :  { %v80_v54 = vld [vmem:[%s487_s2 + $0x78] sm:$0xff]  ;;  %v220_v55 = vpack.c.bf16 %v138_v43, %v137_v37  ;;  %v139_v56 = vmul.f32 0.25, %v123_v44  ;;  %v140_v57 = vmul.f32 0.25, %v124_v45  ;;  %v64_v58 = vadd.f32 %v48_v51, %v32_v47  ;;  %v111_v59 = vld [vmem:[%s488_s3 + $0x70] sm:$0xff] }
  0x17   :  { %v125_v60 = vadd.f32 %v109_v41, %v93_v49  ;;  %v126_v61 = vadd.f32 %v110_v42, %v94_v50  ;;  %v95_v62 = vadd.f32 %v79_v53, %v63_v52  ;;  %v112_v63 = vld [vmem:[%s488_s3 + $0x78] sm:$0xff] }
  0x18   :  { %200 = vst.msk [vmem:[%s489_s4 + $0x20] sm:$0xff] %vm273_vm2, %v220_v55  ;;  %v221_v0 = vpack.c.bf16 %v140_v57, %v139_v56  ;;  %v96_v1 = vadd.f32 %v80_v54, %v64_v58 }
  0x19   :  { %v141_v2 = vmul.f32 0.25, %v125_v60  ;;  %v142_v3 = vmul.f32 0.25, %v126_v61  ;;  %v127_v4 = vadd.f32 %v111_v59, %v95_v62 }
  0x1a   :  { %201 = vst.msk [vmem:[%s489_s4 + $0x28] sm:$0xff] %vm273_vm2, %v221_v0  ;;  %v128_v5 = vadd.f32 %v112_v63, %v96_v1 }
  0x1b   :  { %v222_v6 = vpack.c.bf16 %v142_v3, %v141_v2  ;;  %v143_v7 = vmul.f32 0.25, %v127_v4 }
  0x1c   :  { %v144_v8 = vmul.f32 0.25, %v128_v5 }
  0x1d   :  { %202 = vst.msk [vmem:[%s489_s4 + $0x30] sm:$0xff] %vm273_vm2, %v222_v6 }
  0x1e   :  { %v223_v9 = vpack.c.bf16 %v144_v8, %v143_v7 }
  0x20   :  { %203 = vst.msk [vmem:[%s489_s4 + $0x38] sm:$0xff] %vm273_vm2, %v223_v9 }

// kernel: actor_forward.7
= control target key start
LH: loop header
LB: loop body
LE: loop exit
PB: predicated region body
PF: predicated region fallthrough
CT: control target
= control target key end

     0   :  { %s1595_s21 = smov 0   ;;  %s1597_s22 = smov 0   ;;  %s1755_s0 = inlined_call_operand.vmem [shape: bf16[2,34,25,4], index: 0, kind: input, shape index: {}, may-alias: {0,1}]   ;;  %s1756_s1 = inlined_call_operand.vmem [shape: bf16[2,34,25,4], index: 1, kind: input, shape index: {}, may-alias: {0,1}]   ;;  %s1757_s2 = inlined_call_operand.vmem [shape: bf16[2,34,25,4], index: 2, kind: input, shape index: {}, may-alias: {2,3}]   ;;  %s1758_s3 = inlined_call_operand.vmem [shape: bf16[2,34,25,4], index: 3, kind: input, shape index: {}, may-alias: {2,3}]   ;;  %s1759_s4 = inlined_call_operand.vmem [shape: bf16[3,3,4,32], index: 4, kind: input, shape index: {}]   ;;  %s1760_s5 = inlined_call_operand.vmem [shape: f32[1,32], index: 5, kind: input, shape index: {}]   ;;  %s1761_s6 = inlined_call_operand.vmem [shape: bf16[2,16,24,32], index: 6, kind: output, shape index: {}]  }
   0x1   :  { %s1599_s23 = smov 0   ;;  %s1601_s24 = smov 0  }
   0x2   :  { %s1603_s25 = smov 0  }
   0x3 LB: > { %s25_s26 = sadd.s32 1, %s1550_s23  ;;  %s28_s27 = sadd.s32 1, %s1554_s24  ;;  %s1558_s25 = sphi %s1603_s25, %s16_s25   ;;  %s1554_s24 = sphi %s1601_s24, %s1765_s24   ;;  %s1550_s23 = sphi %s1599_s23, %s1764_s23   ;;  %s1546_s22 = sphi %s1597_s22, %s1763_s22   ;;  %s1542_s21 = sphi %s1595_s21, %s1762_s21  }
   0x4   : > { %p26_p0 = scmp.ge.s32.totalorder %s25_s26, 16  ;;  %p1301_p1 = scmp.ge.s32.totalorder %s1558_s25, 1 }
   0x5   : > { %p300_p2 = scmp.lt.s32.totalorder %s1558_s25, 33 }
   0x6   : > { %s1767_s26 = smov (%p26_p0, %s25_s26), 0  ;;  %s1769_s27 = smov (!%p26_p0, %s28_s27), %s1554_s24 }
   0x7   : > { %p301_p3 = pnand %p1301_p1, %p300_p2  ;;  %p30_p4 = scmp.ge.s32.totalorder %s1769_s27, 2 }
   0x8   : > { %s1302_s8 = sshll.u32 (!%p301_p3), %s1542_s21, 1  ;;  %p372_p5 = scmp.lt.s32.totalorder (!%p301_p3), %s1546_s22, 1 }
   0x9   : > { %s1771_s27 = smov (%p30_p4, %s1769_s27), 0  ;;  %304 = sbr.rel (%p301_p3) target bundleno = 264 (0x108), region = 44 }
   0xa   : > { %p374_p6 = scmp.lt.s32.totalorder (!%p301_p3), %s1302_s8, 33  ;;  %s383_s15 = sadd.s32 (!%p301_p3), 2, %s1302_s8 }
   0xb   : > { %p386_p7 = scmp.lt.s32.totalorder (!%p301_p3), %s383_s15, 33  ;;  %p421_p8 = scmp.lt.s32.totalorder (!%p301_p3), %s1542_s21, 15 }
   0xe   : > { %v1322_v0 = vld [vmem:[%s1759_s4 + $0x2] sm:$0x3]  ;;  %vm470_vm0 = vcmask 1041408   ;;  %v452_v1 = vld [vmem:[%s1759_s4] sm:$0x3]  ;;  %s1773_s22 = smov (!%p372_p5, %s1546_s22), 1 }
   0xf   : > { %1453 = vmatprep.subr.msk.bf16.mxu0 %vm470_vm0, %v1322_v0  ;;  %v472_v2 = vsel %vm470_vm0, %v1322_v0, 0  ;;  %1454 = vmatprep.subr.msk.bf16.mxu1 %vm470_vm0, %v452_v1  ;;  %v537_v3 = vsel %vm470_vm0, %v452_v1, 0  ;;  %v1331_v4 = vld [vmem:[%s1759_s4 + $0x4] sm:$0x3]  ;;  %v1335_v5 = vld [vmem:[%s1759_s4 + $0x6] sm:$0x3] }
  0x10   : > { %1400 = vmatpush3.bf16.msra.mxu0 %v472_v2  ;;  %1406 = vmatpush3.bf16.msra.mxu1 %v537_v3  ;;  %s375_s13 = scalar_select %p374_p6, %s1302_s8, 33  ;;  %vm463_vm1 = vcmask 31744   ;;  %v614_v6 = vsel %vm470_vm0, %v1331_v4, 0  ;;  %v684_v9 = vsel %vm470_vm0, %v1335_v5, 0  ;;  %v1340_v12 = vld [vmem:[%s1759_s4 + $0x8] sm:$0x3] }
  0x11   : > { %1455 = vmatprep.subr.msk.bf16.mxu0 %vm470_vm0, %v1331_v4  ;;  %1456 = vmatprep.subr.msk.bf16.mxu1 %vm470_vm0, %v1335_v5  ;;  %s1462_s14 = smul.u32 136, %s1773_s22  ;;  %s1775_s15 = smov (!%p386_p7, %s383_s15), 33  ;;  %v1345_v13 = vld [vmem:[%s1759_s4 + $0xa] sm:$0x3]  ;;  %vm592_vm2 = vsmask.f32 7424 }
  0x12   : > { %s1303_s16 = sshll.u32 %s375_s13, 2  ;;  %s1306_s12 = sshll.u32 %s1775_s15, 2  ;;  %v754_v35 = vsel %vm470_vm0, %v1340_v12, 0  ;;  %v833_v38 = vsel %vm470_vm0, %v1345_v13, 0  ;;  %v1349_v41 = vld [vmem:[%s1759_s4 + $0xc] sm:$0x3] }
  0x13   : > { %s378_s17 = sadd.s32 %s1462_s14, %s1303_s16  ;;  %s390_s13 = sadd.s32 %s1462_s14, %s1306_s12  ;;  %v1354_v45 = vld [vmem:[%s1759_s4 + $0xe] sm:$0x3]  ;;  %v903_v51 = vsel %vm470_vm0, %v1349_v41, 0  ;;  %v1359_v57 = vld [vmem:[%s1759_s4 + $0x10] sm:$0x3]  ;;  %vm1131_vm3 = vcmask 257024  }
  0x14   : > { %s1304_s18 = sshll.u32 %s378_s17, 2  ;;  %s1307_s15 = sshll.u32 %s390_s13, 2  ;;  %v973_v52 = vsel %vm470_vm0, %v1354_v45, 0  ;;  %v1052_v62 = vsel %vm470_vm0, %v1359_v57, 0 }
  0x15   : > { %s1654_s28 = scalar_lea.vmem %s1755_s0, %s1304_s18  ;;  %s1659_s7 = scalar_lea.vmem %s1757_s2, %s1304_s18 }
  0x16   : > { %v1505_v7 = vld [vmem:[%s1659_s7] sm:$0xff]   ;;  %v1507_v10 = vld [vmem:[%s1659_s7 + $0x8] ss:$0 sps:$4 sm:$0xff]   ;;  %v432_v16 = vld [vmem:[%s1654_s28 + $0xc] sm:$0x1]  ;;  %s392_s17 = scalar_lea.vmem %s1756_s1, %s1307_s15  ;;  %s1692_s20 = scalar_lea.vmem %s1758_s3, %s1307_s15 }
  0x17   : > { %v1506_v8 = vld [vmem:[%s1654_s28] sm:$0xff]   ;;  %1401 = vmatprep.mubr.msk.bf16.mxu0 %vm463_vm1, %v1505_v7  ;;  %v431_v11 = vld [vmem:[%s1654_s28 + $0x8] sm:$0xf]  ;;  %v1510_v19 = vld [vmem:[%s1654_s28 + $0x10] sm:$0xff]   ;;  %s1777_s21 = smov (!%p421_p8, %s1542_s21), 15 }
  0x18   : > { %1407 = vmatprep.mubr.msk.bf16.mxu1 %vm463_vm1, %v1506_v8  ;;  %v593_v14 = vshrl.u32 %v1506_v8, 16  ;;  %v595_v15 = vshll.u32 %v1506_v8, 16  ;;  %v1328_v17 = vcombine.low %v431_v11, %v431_v11  ;;  %1402 = vmatmul.mubr.msk.bf16.vlgmr.msra.gmra.mxu0 %vm463_vm1, %v1507_v10  ;;  %v1332_v18 = vcombine.low %v431_v11, %v432_v16  ;;  %v1317_v20 = vld [vmem:[%s1654_s28 + $0x18] sm:$0xf]  ;;  %v1318_v24 = vld [vmem:[%s1654_s28 + $0x1c] sm:$0x1] }
  0x19   : > { %1412 = vmatpush3.bf16.msra.mxu0 %v614_v6  ;;  %v812_v25 = vshrl.u32 %v1510_v19, 16  ;;  %v814_v26 = vshll.u32 %v1510_v19, 16  ;;  %v1346_v28 = vcombine.low %v1317_v20, %v1318_v24  ;;  %v1337_v31 = vcombine.low %v1317_v20, %v1317_v20  ;;  %v1512_v36 = vld [vmem:[%s1659_s7 + $0x10] sm:$0xff]   ;;  %v1515_v40 = vld [vmem:[%s392_s17] sm:$0xff]   ;;  %v441_v42 = vld [vmem:[%s392_s17 + $0xc] sm:$0x1] }
  0x1a   : > { %v597_v21 = vrot.slane %v595_v15, 1  ;;  %1408 = vmatmul.mubr.msk.bf16.vlgmr.msra.gmra.mxu1 %vm463_vm1, %v1328_v17  ;;  %v604_v22 = vshrl.u32 %v1332_v18, 16  ;;  %v600_v23 = vshll.u32 %v1332_v18, 16  ;;  %1457 = vmatprep.subr.msk.bf16.mxu0 %vm470_vm0, %v1340_v12  ;;  %v440_v46 = vld [vmem:[%s392_s17 + $0x8] sm:$0xf]  ;;  %v1033_v48 = vshll.u32 %v1515_v40, 16 }
  0x1b   : > { %1418 = vmatpush3.bf16.msra.mxu1 %v684_v9  ;;  %1419 = vmatprep.mubr.msk.bf16.mxu1 %vm463_vm1, %v1510_v19  ;;  %v816_v30 = vrot.slane %v814_v26, 1  ;;  %v819_v32 = vshll.u32 %v1346_v28, 16  ;;  %v823_v44 = vshrl.u32 %v1346_v28, 16  ;;  %v1360_v47 = vcombine.low %v440_v46, %v441_v42  ;;  %v1514_v49 = vld [vmem:[%s1659_s7 + $0x18] ss:$0 sps:$4 sm:$0xff]   ;;  %v1516_v53 = vld [vmem:[%s1692_s20] sm:$0xff]  }
  0x1c   : > { %v598_v27 = vor.u32 %v597_v21, %v593_v14  ;;  %1458 = vmatprep.subr.msk.bf16.mxu1 %vm470_vm0, %v1345_v13  ;;  %v602_v29 = vrot.slane %v600_v23, 1  ;;  %v1031_v54 = vshrl.u32 %v1515_v40, 16  ;;  %v1035_v55 = vrot.slane %v1033_v48, 1  ;;  %v1518_v61 = vld [vmem:[%s1692_s20 + $0x8] ss:$0 sps:$4 sm:$0xff]   ;;  %s1464_s7 = smul.u32 48, %s1773_s22 }
  0x1d   : > { %v817_v37 = vor.u32 %v816_v30, %v812_v25  ;;  %v821_v39 = vrot.slane %v819_v32, 1  ;;  %v1038_v56 = vshll.u32 %v1360_v47, 16  ;;  %v1351_v60 = vcombine.low %v440_v46, %v440_v46  ;;  %s1463_s11 = smul.u32 3, %s1777_s21 }
  0x1e   : > { %v603_v33 = vsel %vm592_vm2, %v598_v27, %v602_v29  ;;  %v606_v34 = vor.u32 %v604_v22, %v602_v29  ;;  %v1036_v58 = vor.u32 %v1035_v55, %v1031_v54  ;;  %v1042_v0 = vshrl.u32 %v1360_v47, 16 }
  0x1f   : > { %1413 = vmatprep.mubr.msk.bf16.mxu0 %vm463_vm1, %v603_v33  ;;  %v822_v43 = vsel %vm592_vm2, %v817_v37, %v821_v39  ;;  %v825_v50 = vor.u32 %v823_v44, %v821_v39  ;;  %v1040_v59 = vrot.slane %v1038_v56, 1  ;;  %s425_s12 = sadd.s32 %s1464_s7, %s1463_s11 }
  0x20   : > { %1414 = vmatmul.mubr.msk.bf16.vlgmr.msra.gmra.mxu0 %vm463_vm1, %v606_v34  ;;  %s1314_s14 = sshll.u32 %s425_s12, 2 }
  0x21   : > { %1424 = vmatpush3.bf16.msra.mxu0 %v754_v35  ;;  %1425 = vmatprep.mubr.msk.bf16.mxu0 %vm463_vm1, %v1512_v36  ;;  %v1041_v63 = vsel %vm592_vm2, %v1036_v58, %v1040_v59  ;;  %v1044_v1 = vor.u32 %v1042_v0, %v1040_v59  ;;  %s427_s16 = scalar_lea.vmem %s1761_s6, %s1314_s14 }
  0x22   : > { %1420 = vmatmul.mubr.msk.bf16.vlgmr.msra.gmra.mxu1 %vm463_vm1, %v1337_v31  ;;  %1459 = vmatprep.subr.msk.bf16.mxu0 %vm470_vm0, %v1349_v41 }
  0x23   : > { %1430 = vmatpush3.bf16.msra.mxu1 %v833_v38  ;;  %1431 = vmatprep.mubr.msk.bf16.mxu1 %vm463_vm1, %v822_v43 }
  0x24   : > { %1460 = vmatprep.subr.msk.bf16.mxu1 %vm470_vm0, %v1354_v45 }
  0x28   : > { %1426 = vmatmul.mubr.msk.bf16.vlgmr.msra.gmra.mxu0 %vm463_vm1, %v1514_v49 }
  0x29   : > { %1436 = vmatpush3.bf16.msra.mxu0 %v903_v51  ;;  %1437 = vmatprep.mubr.msk.bf16.mxu0 %vm463_vm1, %v1515_v40 }
  0x2a   : > { %1432 = vmatmul.mubr.msk.bf16.vlgmr.msra.gmra.mxu1 %vm463_vm1, %v825_v50  ;;  %1461 = vmatprep.subr.msk.bf16.mxu0 %vm470_vm0, %v1359_v57 }
  0x2b   : > { %1442 = vmatpush3.bf16.msra.mxu1 %v973_v52  ;;  %1443 = vmatprep.mubr.msk.bf16.mxu1 %vm463_vm1, %v1516_v53  ;;  %v1363_v52 = vld [vmem:[%s1760_s5] ss:$0 sm:$0xff] }
  0x30   : > { %1438 = vmatmul.mubr.msk.bf16.vlgmr.msra.gmra.mxu0 %vm463_vm1, %v1351_v60 }
  0x31   : > { %1448 = vmatpush3.bf16.msra.mxu0 %v1052_v62  ;;  %1449 = vmatprep.mubr.msk.bf16.mxu0 %vm463_vm1, %v1041_v63 }
  0x32   : > { %1444 = vmatmul.mubr.msk.bf16.vlgmr.msra.gmra.mxu1 %vm463_vm1, %v1518_v61 }
  0x38   : > { %1450 = vmatmul.mubr.msk.bf16.vlgmr.msra.gmra.mxu0 %vm463_vm1, %v1044_v1 }
  0xd8   : > { %v1403_v2 = vpop.f32.mrf.mxu0 }
  0xda   : > { %v1409_v3 = vpop.f32.mrf.mxu1  ;;  %v508_v4 = vpop.f32.mrf.mxu0 }
  0xdb   : > { %v582_v15 = vadd.f32 %v1409_v3, %v1403_v2 }
  0xdc   : > { %v573_v5 = vpop.f32.mrf.mxu1  ;;  %v1404_v6 = vpop.f32.mrf.mxu0 }
  0xdd   : > { %v574_v18 = vadd.f32 %v573_v5, %v508_v4 }
  0xde   : > { %v1410_v7 = vpop.f32.mrf.mxu1  ;;  %v511_v8 = vpop.f32.mrf.mxu0 }
  0xe0   : > { %v576_v9 = vpop.f32.mrf.mxu1  ;;  %v1415_v10 = vpop.f32.mrf.mxu0 }
  0xe1   : > { %v666_v19 = vadd.f32 %v1415_v10, %v582_v15  ;;  %v577_v25 = vadd.f32 %v576_v9, %v511_v8 }
  0xe2   : > { %v1421_v11 = vpop.f32.mrf.mxu1  ;;  %v650_v12 = vpop.f32.mrf.mxu0 }
  0xe3   : > { %v664_v22 = vadd.f32 %v650_v12, %v574_v18  ;;  %v736_v26 = vadd.f32 %v1421_v11, %v666_v19 }
  0xe4   : > { %v720_v13 = vpop.f32.mrf.mxu1  ;;  %v1416_v14 = vpop.f32.mrf.mxu0 }
  0xe5   : > { %v734_v29 = vadd.f32 %v720_v13, %v664_v22 }
  0xe6   : > { %v1422_v16 = vpop.f32.mrf.mxu1  ;;  %v653_v17 = vpop.f32.mrf.mxu0 }
  0xe7   : > { %v665_v30 = vadd.f32 %v653_v17, %v577_v25 }
  0xe8   : > { %v723_v20 = vpop.f32.mrf.mxu1  ;;  %v1427_v21 = vpop.f32.mrf.mxu0 }
  0xe9   : > { %v806_v31 = vadd.f32 %v1427_v21, %v736_v26  ;;  %v735_v37 = vadd.f32 %v723_v20, %v665_v30 }
  0xea   : > { %v1433_v23 = vpop.f32.mrf.mxu1  ;;  %v790_v24 = vpop.f32.mrf.mxu0 }
  0xeb   : > { %v804_v34 = vadd.f32 %v790_v24, %v734_v29  ;;  %v885_v38 = vadd.f32 %v1433_v23, %v806_v31 }
  0xec   : > { %v869_v27 = vpop.f32.mrf.mxu1  ;;  %v1428_v28 = vpop.f32.mrf.mxu0 }
  0xed   : > { %v883_v41 = vadd.f32 %v869_v27, %v804_v34 }
  0xee   : > { %v1434_v32 = vpop.f32.mrf.mxu1  ;;  %v793_v33 = vpop.f32.mrf.mxu0 }
  0xef   : > { %v805_v42 = vadd.f32 %v793_v33, %v735_v37 }
  0xf0   : > { %v872_v35 = vpop.f32.mrf.mxu1  ;;  %v1439_v36 = vpop.f32.mrf.mxu0 }
  0xf1   : > { %v955_v43 = vadd.f32 %v1439_v36, %v885_v38  ;;  %v884_v49 = vadd.f32 %v872_v35, %v805_v42 }
  0xf2   : > { %v1445_v39 = vpop.f32.mrf.mxu1  ;;  %v939_v40 = vpop.f32.mrf.mxu0 }
  0xf3   : > { %v953_v46 = vadd.f32 %v939_v40, %v883_v41  ;;  %v1025_v50 = vadd.f32 %v1445_v39, %v955_v43 }
  0xf4   : > { %v1009_v44 = vpop.f32.mrf.mxu1  ;;  %v1440_v45 = vpop.f32.mrf.mxu0 }
  0xf5   : > { %v1023_v53 = vadd.f32 %v1009_v44, %v953_v46 }
  0xf6   : > { %v1446_v47 = vpop.f32.mrf.mxu1  ;;  %v942_v48 = vpop.f32.mrf.mxu0 }
  0xf7   : > { %v954_v54 = vadd.f32 %v942_v48, %v884_v49 }
  0xf8   : > { %v1451_v51 = vpop.f32.mrf.mxu0  ;;  %v1012_v59 = vpop.f32.mrf.mxu1 }
  0xf9   : > { %v1104_v55 = vadd.f32 %v1451_v51, %v1025_v50  ;;  %v1024_v61 = vadd.f32 %v1012_v59, %v954_v54 }
  0xfa   : > { %v1088_v56 = vpop.f32.mrf.mxu0 }
  0xfb   : > { %v1114_v57 = vadd.f32 %v1363_v52, %v1104_v55  ;;  %v1102_v58 = vadd.f32 %v1088_v56, %v1023_v53 }
  0xfc   : > { %v1452_v60 = vpop.f32.mrf.mxu0 }
  0xfd   : > { %v1117_v62 = vmax.f32 %v1114_v57, 0.0  ;;  %v1112_v63 = vadd.f32 %v1363_v52, %v1102_v58 }
  0xfe   : > { %v1091_v0 = vpop.f32.mrf.mxu0 }
  0xff   : > { %v1371_v1 = vpack.c.bf16 %v1117_v62, %v1117_v62  ;;  %v1115_v2 = vmax.f32 %v1112_v63, 0.0  ;;  %v1103_v3 = vadd.f32 %v1091_v0, %v1024_v61 }
 0x101   : > { %1134 = vst.msk [vmem:[%s427_s16 + $0x8] sm:$0xf] %vm1131_vm3, %v1371_v1  ;;  %v1369_v4 = vpack.c.bf16 %v1115_v2, %v1115_v2  ;;  %v1113_v5 = vadd.f32 %v1363_v52, %v1103_v3 }
 0x103   : > { %1132 = vst.msk [vmem:[%s427_s16] sm:$0xf] %vm1131_vm3, %v1369_v4  ;;  %v1116_v6 = vmax.f32 %v1113_v5, 0.0 }
 0x105   : > { %v1370_v7 = vpack.c.bf16 %v1116_v6, %v1116_v6 }
 0x107   : > { %1133 = vst.msk [vmem:[%s427_s16 + $0x4] sm:$0xf] %vm1131_vm3, %v1370_v7 }
 0x108 PF: > { %s16_s25 = sadd.s32 1, %s1558_s25   ;;  %s1762_s21 = smov %s1550_s23 }
 0x109   : > { %p13_p9 = scmp.ge.s32.totalorder %s16_s25, 34   ;;  %s1763_s22 = smov %s1554_s24 }
 0x10a   : > { %s1764_s23 = smov %s1767_s26  ;;  %s1765_s24 = smov %s1771_s27 }
 0x10b   :  { %15 = sbr.rel (!%p13_p9) target bundleno = 3 (0x3), region = 93 }

// kernel: actor_forward.8
= control target key start
LH: loop header
LB: loop body
LE: loop exit
PB: predicated region body
PF: predicated region fallthrough
CT: control target
= control target key end

     0   :  { %s1578_s21 = smov 0   ;;  %s1580_s22 = smov 0   ;;  %s1766_s0 = inlined_call_operand.vmem [shape: bf16[2,18,13,32], index: 0, kind: input, shape index: {}, may-alias: {0,1}]   ;;  %s1767_s1 = inlined_call_operand.vmem [shape: bf16[2,18,13,32], index: 1, kind: input, shape index: {}, may-alias: {0,1}]   ;;  %s1768_s2 = inlined_call_operand.vmem [shape: bf16[2,18,13,32], index: 2, kind: input, shape index: {}, may-alias: {2,3}]   ;;  %s1769_s3 = inlined_call_operand.vmem [shape: bf16[2,18,13,32], index: 3, kind: input, shape index: {}, may-alias: {2,3}]   ;;  %s1770_s4 = inlined_call_operand.vmem [shape: bf16[3,3,32,64], index: 4, kind: input, shape index: {}]   ;;  %s1771_s5 = inlined_call_operand.vmem [shape: f32[1,64], index: 5, kind: input, shape index: {}]   ;;  %s1772_s6 = inlined_call_operand.vmem [shape: bf16[2,8,12,64], index: 6, kind: output, shape index: {}]  }
   0x1   :  { %s1582_s23 = smov 0   ;;  %s1584_s24 = smov 0  }
   0x2   :  { %s1586_s25 = smov 0  }
   0x3 LB: > { %s25_s26 = sadd.s32 1, %s1531_s23  ;;  %s28_s27 = sadd.s32 1, %s1535_s24  ;;  %s1539_s25 = sphi %s1586_s25, %s16_s25   ;;  %s1535_s24 = sphi %s1584_s24, %s1776_s24   ;;  %s1531_s23 = sphi %s1582_s23, %s1775_s23   ;;  %s1527_s22 = sphi %s1580_s22, %s1774_s22   ;;  %s1523_s21 = sphi %s1578_s21, %s1773_s21  }
   0x4   : > { %p26_p0 = scmp.ge.s32.totalorder %s25_s26, 8  ;;  %p1243_p1 = scmp.ge.s32.totalorder %s1539_s25, 1 }
   0x5   : > { %p300_p2 = scmp.lt.s32.totalorder %s1539_s25, 17 }
   0x6   : > { %s1778_s26 = smov (%p26_p0, %s25_s26), 0  ;;  %s1780_s27 = smov (!%p26_p0, %s28_s27), %s1535_s24 }
   0x7   : > { %p301_p3 = pnand %p1243_p1, %p300_p2  ;;  %p30_p4 = scmp.ge.s32.totalorder %s1780_s27, 2 }
   0x8   : > { %s1626_s10 = sshll.u32 (!%p301_p3), %s1523_s21, 1  ;;  %p372_p5 = scmp.lt.s32.totalorder (!%p301_p3), %s1527_s22, 1 }
   0x9   : > { %s1782_s27 = smov (%p30_p4, %s1780_s27), 0  ;;  %304 = sbr.rel (%p301_p3) target bundleno = 261 (0x105), region = 44 }
   0xa   : > { %p374_p6 = scmp.lt.s32.totalorder (!%p301_p3), %s1626_s10, 17  ;;  %p421_p8 = scmp.lt.s32.totalorder (!%p301_p3), %s1523_s21, 7 }
   0xe   : > { %v1477_v0 = vld [vmem:[%s1770_s4 + $0x18] sm:$0xff]   ;;  %v1541_v1 = vmov 0.0   ;;  %v1478_v2 = vld [vmem:[%s1770_s4 + $0x8] sm:$0xff]   ;;  %v1479_v3 = vld [vmem:[%s1770_s4 + $0x10] sm:$0xff]   ;;  %vm1542_vm0 = vmmov 0   ;;  %s1784_s22 = smov (!%p372_p5, %s1527_s22), 1 }
   0xf   : > { %1362 = vmatprep.subr.bf16.mxu0 %v1541_v1  ;;  %1370 = vmatprep.subr.bf16.mxu1 %v1541_v1  ;;  %v1480_v4 = vld [vmem:[%s1770_s4] sm:$0xff]   ;;  %s375_s13 = scalar_select %p374_p6, %s1626_s10, 17  ;;  %v1483_v5 = vld [vmem:[%s1770_s4 + $0x28] sm:$0xff]   ;;  %vm469_vm1 = vcmask 261120   ;;  %v1484_v6 = vld [vmem:[%s1770_s4 + $0x38] sm:$0xff]   ;;  %vm1073_vm2 = vcmask 519168  }
  0x10   : > { %1363 = vmatpush3.bf16.msra.mxu0 %v1477_v0  ;;  %1366 = vmatprep.mubr.msk.bf16.mxu0 %vm1542_vm0, %v1541_v1  ;;  %s1434_s14 = smul.u32 36, %s1784_s22  ;;  %v1485_v11 = vld [vmem:[%s1770_s4 + $0x20] sm:$0xff]   ;;  %v1486_v12 = vld [vmem:[%s1770_s4 + $0x30] sm:$0xff]   ;;  %v1488_v15 = vld [vmem:[%s1770_s4 + $0x48] sm:$0xff]   ;;  %s1788_s21 = smov (!%p421_p8, %s1523_s21), 7  ;;  %vm1075_vm3 = vcmask 517120  }
  0x11   : > { %1371 = vmatpush3.bf16.msra.mxu1 %v1478_v2  ;;  %1364 = vmatprep.subr.bf16.mxu0 %v1541_v1  ;;  %s1245_s15 = sshll.u32 %s375_s13, 1  ;;  %v1489_v18 = vld [vmem:[%s1770_s4 + $0x58] sm:$0xff]   ;;  %v1490_v19 = vld [vmem:[%s1770_s4 + $0x40] sm:$0xff]   ;;  %v1491_v22 = vld [vmem:[%s1770_s4 + $0x50] sm:$0xff]  }
  0x12   : > { %1372 = vmatprep.subr.bf16.mxu1 %v1541_v1  ;;  %1374 = vmatprep.mubr.msk.bf16.mxu1 %vm1542_vm0, %v1541_v1  ;;  %s378_s16 = sadd.s32 %s1434_s14, %s1245_s15  ;;  %v1493_v25 = vld [vmem:[%s1770_s4 + $0x68] sm:$0xff]   ;;  %v1494_v26 = vld [vmem:[%s1770_s4 + $0x78] sm:$0xff]   ;;  %v1495_v27 = vld [vmem:[%s1770_s4 + $0x60] sm:$0xff]   ;;  %s1256_s15 = sshll.u32 %s1788_s21, 1 }
  0x13   : > { %s1246_s17 = sshll.u32 %s378_s16, 2  ;;  %v1496_v28 = vld [vmem:[%s1770_s4 + $0x70] sm:$0xff]   ;;  %v1499_v32 = vld [vmem:[%s1770_s4 + $0x88] sm:$0xff]   ;;  %v1500_v35 = vld [vmem:[%s1770_s4 + $0x80] sm:$0xff]   ;;  %s1257_s16 = sshll.u32 %s1784_s22, 4 }
  0x14   : > { %1365 = vmatpush3.bf16.msra.mxu0 %v1479_v3  ;;  %s1652_s29 = scalar_lea.vmem %s1768_s2, %s1246_s17  ;;  %s380_s8 = scalar_lea.vmem %s1766_s0, %s1246_s17 }
  0x15   : > { %1373 = vmatpush3.bf16.msra.mxu1 %v1480_v4  ;;  %1378 = vmatprep.subr.bf16.mxu0 %v1541_v1  ;;  %v1481_v7 = vld [vmem:[%s1652_s29] sm:$0x7f]   ;;  %v1487_v13 = vld [vmem:[%s380_s8 + $0x8] sm:$0x7f]   ;;  %s383_s17 = sadd.s32 2, %s1626_s10 }
  0x16   : > { %1386 = vmatprep.subr.bf16.mxu1 %v1541_v1  ;;  %v1482_v8 = vld [vmem:[%s380_s8] sm:$0x7f]   ;;  %v787_v16 = vshll.u32 %v1487_v13, 16  ;;  %p386_p7 = scmp.lt.s32.totalorder %s383_s17, 17  ;;  %v785_v20 = vshrl.u32 %v1487_v13, 16 }
  0x17   : > { %1367 = vmatmul.mubr.msk.bf16.vlgmr.msra.gmra.mxu0 %vm469_vm1, %v1481_v7  ;;  %v580_v9 = vshrl.u32 %v1482_v8, 16  ;;  %v582_v10 = vshll.u32 %v1482_v8, 16  ;;  %v1492_v23 = vld [vmem:[%s1652_s29 + $0x8] sm:$0x7f]  }
  0x18   : > { %1375 = vmatmul.mubr.msk.bf16.vlgmr.msra.gmra.mxu1 %vm469_vm1, %v1482_v8  ;;  %1379 = vmatpush3.bf16.msra.mxu0 %v1483_v5  ;;  %s1786_s17 = smov (!%p386_p7, %s383_s17), 17  ;;  %v789_v21 = vrot.slane %v787_v16, 1 }
  0x19   : > { %1387 = vmatpush3.bf16.msra.mxu1 %v1484_v6  ;;  %1380 = vmatprep.subr.bf16.mxu0 %v1541_v1  ;;  %v584_v14 = vrot.slane %v582_v10, 1  ;;  %s1248_s9 = sshll.u32 %s1786_s17, 1  ;;  %s425_s17 = sadd.s32 %s1257_s16, %s1256_s15 }
  0x1a   : > { %1388 = vmatprep.subr.bf16.mxu1 %v1541_v1  ;;  %1382 = vmatprep.mubr.msk.bf16.mxu0 %vm1542_vm0, %v1541_v1  ;;  %s390_s11 = sadd.s32 %s1434_s14, %s1248_s9  ;;  %v790_v24 = vor.u32 %v789_v21, %v785_v20  ;;  %s1258_s14 = sshll.u32 %s425_s17, 2 }
  0x1b   : > { %1390 = vmatprep.mubr.msk.bf16.mxu1 %vm1542_vm0, %v1541_v1  ;;  %v585_v17 = vor.u32 %v584_v14, %v580_v9  ;;  %s1249_s12 = sshll.u32 %s390_s11, 2  ;;  %s427_s20 = scalar_lea.vmem %s1772_s6, %s1258_s14 }
  0x1c   : > { %1381 = vmatpush3.bf16.msra.mxu0 %v1485_v11  ;;  %s392_s18 = scalar_lea.vmem %s1767_s1, %s1249_s12  ;;  %s416_s28 = scalar_lea.vmem %s1769_s3, %s1249_s12 }
  0x1d   : > { %1389 = vmatpush3.bf16.msra.mxu1 %v1486_v12  ;;  %1394 = vmatprep.subr.bf16.mxu0 %v1541_v1  ;;  %v1497_v29 = vld [vmem:[%s392_s18] sm:$0x7f]  }
  0x1e   : > { %1402 = vmatprep.subr.bf16.mxu1 %v1541_v1  ;;  %v992_v30 = vshll.u32 %v1497_v29, 16  ;;  %v1498_v31 = vld [vmem:[%s416_s28] sm:$0x7f]   ;;  %v990_v33 = vshrl.u32 %v1497_v29, 16 }
  0x1f   : > { %1383 = vmatmul.mubr.msk.bf16.vlgmr.msra.gmra.mxu0 %vm469_vm1, %v585_v17 }
  0x20   : > { %1391 = vmatmul.mubr.msk.bf16.vlgmr.msra.gmra.mxu1 %vm469_vm1, %v1487_v13  ;;  %1395 = vmatpush3.bf16.msra.mxu0 %v1488_v15  ;;  %v994_v34 = vrot.slane %v992_v30, 1 }
  0x21   : > { %1403 = vmatpush3.bf16.msra.mxu1 %v1489_v18  ;;  %1396 = vmatprep.subr.bf16.mxu0 %v1541_v1 }
  0x22   : > { %1404 = vmatprep.subr.bf16.mxu1 %v1541_v1  ;;  %1398 = vmatprep.mubr.msk.bf16.mxu0 %vm1542_vm0, %v1541_v1  ;;  %v995_v36 = vor.u32 %v994_v34, %v990_v33 }
  0x23   : > { %1406 = vmatprep.mubr.msk.bf16.mxu1 %vm1542_vm0, %v1541_v1 }
  0x24   : > { %1397 = vmatpush3.bf16.msra.mxu0 %v1490_v19  ;;  %v1328_v19 = vld [vmem:[%s1771_s5] ss:$0 sm:$0xff] }
  0x25   : > { %1405 = vmatpush3.bf16.msra.mxu1 %v1491_v22  ;;  %1410 = vmatprep.subr.bf16.mxu0 %v1541_v1 }
  0x26   : > { %1418 = vmatprep.subr.bf16.mxu1 %v1541_v1 }
  0x27   : > { %1399 = vmatmul.mubr.msk.bf16.vlgmr.msra.gmra.mxu0 %vm469_vm1, %v1492_v23 }
  0x28   : > { %1407 = vmatmul.mubr.msk.bf16.vlgmr.msra.gmra.mxu1 %vm469_vm1, %v790_v24  ;;  %1411 = vmatpush3.bf16.msra.mxu0 %v1493_v25 }
  0x29   : > { %1419 = vmatpush3.bf16.msra.mxu1 %v1494_v26  ;;  %1412 = vmatprep.subr.bf16.mxu0 %v1541_v1 }
  0x2a   : > { %1420 = vmatprep.subr.bf16.mxu1 %v1541_v1  ;;  %1414 = vmatprep.mubr.msk.bf16.mxu0 %vm1542_vm0, %v1541_v1 }
  0x2b   : > { %1422 = vmatprep.mubr.msk.bf16.mxu1 %vm1542_vm0, %v1541_v1 }
  0x2c   : > { %1413 = vmatpush3.bf16.msra.mxu0 %v1495_v27 }
  0x2d   : > { %1421 = vmatpush3.bf16.msra.mxu1 %v1496_v28  ;;  %1426 = vmatprep.subr.bf16.mxu0 %v1541_v1 }
  0x2f   : > { %1415 = vmatmul.mubr.msk.bf16.vlgmr.msra.gmra.mxu0 %vm469_vm1, %v1497_v29 }
  0x30   : > { %1423 = vmatmul.mubr.msk.bf16.vlgmr.msra.gmra.mxu1 %vm469_vm1, %v1498_v31  ;;  %1427 = vmatpush3.bf16.msra.mxu0 %v1499_v32 }
  0x31   : > { %1428 = vmatprep.subr.bf16.mxu0 %v1541_v1  ;;  %1430 = vmatprep.mubr.msk.bf16.mxu0 %vm1542_vm0, %v1541_v1 }
  0x34   : > { %1429 = vmatpush3.bf16.msra.mxu0 %v1500_v35 }
  0x37   : > { %1431 = vmatmul.mubr.msk.bf16.vlgmr.msra.gmra.mxu0 %vm469_vm1, %v995_v36 }
  0xd7   : > { %v507_v37 = vpop.f32.mrf.mxu0 }
  0xd8   : > { %v568_v38 = vpop.f32.mrf.mxu1 }
  0xd9   : > { %v1368_v39 = vpop.f32.mrf.mxu0  ;;  %v569_v50 = vadd.f32 %v568_v38, %v507_v37 }
  0xda   : > { %v1376_v40 = vpop.f32.mrf.mxu1 }
  0xdb   : > { %v510_v41 = vpop.f32.mrf.mxu0 }
  0xdc   : > { %v571_v42 = vpop.f32.mrf.mxu1 }
  0xdd   : > { %v1369_v43 = vpop.f32.mrf.mxu0  ;;  %v572_v56 = vadd.f32 %v571_v42, %v510_v41 }
  0xde   : > { %v1377_v44 = vpop.f32.mrf.mxu1 }
  0xdf   : > { %v635_v45 = vpop.f32.mrf.mxu0 }
  0xe0   : > { %v703_v46 = vpop.f32.mrf.mxu1  ;;  %v642_v53 = vadd.f32 %v635_v45, %v569_v50 }
  0xe1   : > { %v1384_v47 = vpop.f32.mrf.mxu0 }
  0xe2   : > { %v1392_v48 = vpop.f32.mrf.mxu1  ;;  %v710_v59 = vadd.f32 %v703_v46, %v642_v53 }
  0xe3   : > { %v638_v49 = vpop.f32.mrf.mxu0 }
  0xe4   : > { %v706_v51 = vpop.f32.mrf.mxu1  ;;  %v643_v60 = vadd.f32 %v638_v49, %v572_v56 }
  0xe5   : > { %v1385_v52 = vpop.f32.mrf.mxu0 }
  0xe6   : > { %v1393_v54 = vpop.f32.mrf.mxu1  ;;  %v711_v2 = vadd.f32 %v706_v51, %v643_v60 }
  0xe7   : > { %v771_v55 = vpop.f32.mrf.mxu0 }
  0xe8   : > { %v840_v57 = vpop.f32.mrf.mxu1  ;;  %v778_v63 = vadd.f32 %v771_v55, %v710_v59 }
  0xe9   : > { %v1400_v58 = vpop.f32.mrf.mxu0 }
  0xea   : > { %v1408_v61 = vpop.f32.mrf.mxu1  ;;  %v847_v5 = vadd.f32 %v840_v57, %v778_v63 }
  0xeb   : > { %v774_v62 = vpop.f32.mrf.mxu0 }
  0xec   : > { %v843_v0 = vpop.f32.mrf.mxu1  ;;  %v779_v6 = vadd.f32 %v774_v62, %v711_v2 }
  0xed   : > { %v1401_v1 = vpop.f32.mrf.mxu0 }
  0xee   : > { %v1409_v3 = vpop.f32.mrf.mxu1  ;;  %v848_v12 = vadd.f32 %v843_v0, %v779_v6 }
  0xef   : > { %v908_v4 = vpop.f32.mrf.mxu0 }
  0xf0   : > { %v976_v7 = vpop.f32.mrf.mxu1  ;;  %v915_v9 = vadd.f32 %v908_v4, %v847_v5 }
  0xf1   : > { %v1416_v8 = vpop.f32.mrf.mxu0 }
  0xf2   : > { %v1424_v10 = vpop.f32.mrf.mxu1  ;;  %v983_v15 = vadd.f32 %v976_v7, %v915_v9 }
  0xf3   : > { %v911_v11 = vpop.f32.mrf.mxu0 }
  0xf4   : > { %v979_v13 = vpop.f32.mrf.mxu1  ;;  %v916_v16 = vadd.f32 %v911_v11, %v848_v12 }
  0xf5   : > { %v1417_v14 = vpop.f32.mrf.mxu0 }
  0xf6   : > { %v1425_v17 = vpop.f32.mrf.mxu1  ;;  %v984_v22 = vadd.f32 %v979_v13, %v916_v16 }
  0xf7   : > { %v1045_v18 = vpop.f32.mrf.mxu0 }
  0xf8   : > { %v1052_v20 = vadd.f32 %v1045_v18, %v983_v15 }
  0xf9   : > { %v1432_v21 = vpop.f32.mrf.mxu0 }
  0xfa   : > { %v1061_v23 = vadd.f32 %v1328_v19, %v1052_v20 }
  0xfb   : > { %v1048_v24 = vpop.f32.mrf.mxu0 }
  0xfc   : > { %v1063_v25 = vmax.f32 %v1061_v23, 0.0  ;;  %v1053_v26 = vadd.f32 %v1048_v24, %v984_v22 }
  0xfd   : > { %v1433_v27 = vpop.f32.mrf.mxu0 }
  0xfe   : > { %v1333_v28 = vpack.c.bf16 %v1063_v25, %v1063_v25  ;;  %v1062_v29 = vadd.f32 %v1328_v19, %v1053_v26 }
 0x100   : > { %1074 = vst.msk [vmem:[%s427_s20] sm:$0xf] %vm1073_vm2, %v1333_v28  ;;  %v1064_v30 = vmax.f32 %v1062_v29, 0.0 }
 0x102   : > { %v1334_v31 = vpack.c.bf16 %v1064_v30, %v1064_v30 }
 0x104   : > { %1076 = vst.msk [vmem:[%s427_s20 + $0x4] sm:$0x3] %vm1075_vm3, %v1334_v31 }
 0x105 PF: > { %s16_s25 = sadd.s32 1, %s1539_s25   ;;  %s1773_s21 = smov %s1531_s23 }
 0x106   : > { %p13_p9 = scmp.ge.s32.totalorder %s16_s25, 18   ;;  %s1774_s22 = smov %s1535_s24 }
 0x107   : > { %s1775_s23 = smov %s1778_s26  ;;  %s1776_s24 = smov %s1782_s27 }
 0x108   :  { %15 = sbr.rel (!%p13_p9) target bundleno = 3 (0x3), region = 93 }

// kernel: actor_forward.9
= control target key start
LH: loop header
LB: loop body
LE: loop exit
PB: predicated region body
PF: predicated region fallthrough
CT: control target
= control target key end

     0   :  { %s1743_s21 = smov 0   ;;  %s1745_s22 = smov 0   ;;  %s2007_s0 = inlined_call_operand.vmem [shape: bf16[2,10,7,64], index: 0, kind: input, shape index: {}, may-alias: {0,1}]   ;;  %s2008_s1 = inlined_call_operand.vmem [shape: bf16[2,10,7,64], index: 1, kind: input, shape index: {}, may-alias: {0,1}]   ;;  %s2009_s2 = inlined_call_operand.vmem [shape: bf16[2,10,7,64], index: 2, kind: input, shape index: {}, may-alias: {2,3}]   ;;  %s2010_s3 = inlined_call_operand.vmem [shape: bf16[2,10,7,64], index: 3, kind: input, shape index: {}, may-alias: {2,3}]   ;;  %s2011_s4 = inlined_call_operand.vmem [shape: bf16[3,3,64,128], index: 4, kind: input, shape index: {}]   ;;  %s2012_s5 = inlined_call_operand.vmem [shape: f32[1,128], index: 5, kind: input, shape index: {}]   ;;  %s2013_s6 = inlined_call_operand.vmem [shape: bf16[2,4,6,128], index: 6, kind: output, shape index: {}]  }
   0x1   :  { %s1747_s23 = smov 0   ;;  %s1749_s24 = smov 0  }
   0x2   :  { %s1751_s25 = smov 0  }
   0x3 LB: > { %s25_s26 = sadd.s32 1, %s1696_s23  ;;  %s28_s27 = sadd.s32 1, %s1700_s24  ;;  %s1704_s25 = sphi %s1751_s25, %s16_s25   ;;  %s1700_s24 = sphi %s1749_s24, %s2017_s24   ;;  %s1696_s23 = sphi %s1747_s23, %s2016_s23   ;;  %s1692_s22 = sphi %s1745_s22, %s2015_s22   ;;  %s1688_s21 = sphi %s1743_s21, %s2014_s21  }
   0x4   : > { %p26_p0 = scmp.ge.s32.totalorder %s25_s26, 4  ;;  %p1303_p1 = scmp.ge.s32.totalorder %s1704_s25, 1 }
   0x5   : > { %p296_p2 = scmp.lt.s32.totalorder %s1704_s25, 9 }
   0x6   : > { %s2019_s26 = smov (%p26_p0, %s25_s26), 0  ;;  %s2021_s27 = smov (!%p26_p0, %s28_s27), %s1700_s24 }
   0x7   : > { %p297_p3 = pnand %p1303_p1, %p296_p2  ;;  %p30_p4 = scmp.ge.s32.totalorder %s2021_s27, 2 }
   0x8   : > { %s1791_s10 = sshll.u32 (!%p297_p3), %s1688_s21, 1  ;;  %p363_p5 = scmp.lt.s32.totalorder (!%p297_p3), %s1692_s22, 1 }
   0x9   : > { %s2023_s27 = smov (%p30_p4, %s2021_s27), 0  ;;  %300 = sbr.rel (%p297_p3) target bundleno = 297 (0x129), region = 44 }
   0xa   : > { %p365_p6 = scmp.lt.s32.totalorder (!%p297_p3), %s1791_s10, 9  ;;  %p408_p8 = scmp.lt.s32.totalorder (!%p297_p3), %s1688_s21, 3 }
   0xe   : > { %v1627_v0 = vld [vmem:[%s2011_s4 + $0x38] sm:$0xff]   ;;  %v1706_v1 = vmov 0.0   ;;  %v1629_v3 = vld [vmem:[%s2011_s4 + $0x30] sm:$0xff]   ;;  %vm1707_vm0 = vmmov 0   ;;  %s2025_s22 = smov (!%p363_p5, %s1692_s22), 1  ;;  %v1631_v5 = vld [vmem:[%s2011_s4 + $0x28] sm:$0xff]  }
   0xf   : > { %1476 = vmatprep.subr.bf16.mxu0 %v1706_v1  ;;  %1488 = vmatprep.subr.bf16.mxu1 %v1706_v1  ;;  %v1628_v2 = vld [vmem:[%s2011_s4 + $0x18] sm:$0xff]   ;;  %v1630_v4 = vld [vmem:[%s2011_s4 + $0x10] sm:$0xff]   ;;  %s366_s15 = scalar_select %p365_p6, %s1791_s10, 9  ;;  %v1632_v6 = vld [vmem:[%s2011_s4 + $0x8] sm:$0xff]   ;;  %vm464_vm1 = vcmask 523264  }
  0x10   : > { %1477 = vmatpush3.bf16.msra.mxu0 %v1627_v0  ;;  %1484 = vmatprep.mubr.msk.bf16.mxu0 %vm1707_vm0, %v1706_v1  ;;  %s1584_s18 = smul.u32 10, %s2025_s22  ;;  %v1633_v7 = vld [vmem:[%s2011_s4 + $0x20] sm:$0xff]   ;;  %v1637_v9 = vld [vmem:[%s2011_s4 + $0x58] sm:$0xff]   ;;  %v1639_v14 = vld [vmem:[%s2011_s4 + $0x50] sm:$0xff]   ;;  %s2029_s21 = smov (!%p408_p8, %s1688_s21), 3 }
  0x11   : > { %1489 = vmatpush3.bf16.msra.mxu1 %v1628_v2  ;;  %1478 = vmatprep.subr.bf16.mxu0 %v1706_v1  ;;  %v1634_v8 = vld [vmem:[%s2011_s4] sm:$0xff]   ;;  %v1638_v12 = vld [vmem:[%s2011_s4 + $0x78] sm:$0xff]   ;;  %v1640_v15 = vld [vmem:[%s2011_s4 + $0x70] sm:$0xff]  }
  0x12   : > { %1490 = vmatprep.subr.bf16.mxu1 %v1706_v1  ;;  %1496 = vmatprep.mubr.msk.bf16.mxu1 %vm1707_vm0, %v1706_v1  ;;  %s368_s19 = sadd.s32 %s1584_s18, %s366_s15  ;;  %v1641_v17 = vld [vmem:[%s2011_s4 + $0x48] sm:$0xff]   ;;  %v1643_v21 = vld [vmem:[%s2011_s4 + $0x40] sm:$0xff]   ;;  %v1645_v25 = vld [vmem:[%s2011_s4 + $0x98] sm:$0xff]  }
  0x13   : > { %s1305_s29 = sshll.u32 %s368_s19, 2  ;;  %v1642_v18 = vld [vmem:[%s2011_s4 + $0x68] sm:$0xff]   ;;  %v1644_v22 = vld [vmem:[%s2011_s4 + $0x60] sm:$0xff]   ;;  %v1646_v26 = vld [vmem:[%s2011_s4 + $0xb8] sm:$0xff]   ;;  %s373_s19 = sadd.s32 2, %s1791_s10 }
  0x14   : > { %1479 = vmatpush3.bf16.msra.mxu0 %v1629_v3  ;;  %s1827_s11 = scalar_lea.vmem %s2009_s2, %s1305_s29  ;;  %s1833_s14 = scalar_lea.vmem %s2007_s0, %s1305_s29  ;;  %v1647_v28 = vld [vmem:[%s2011_s4 + $0x90] sm:$0xff]   ;;  %v1649_v31 = vld [vmem:[%s2011_s4 + $0x88] sm:$0xff]   ;;  %v1651_v35 = vld [vmem:[%s2011_s4 + $0x80] sm:$0xff]  }
  0x15   : > { %1491 = vmatpush3.bf16.msra.mxu1 %v1630_v4  ;;  %1480 = vmatprep.subr.bf16.mxu0 %v1706_v1  ;;  %v419_v10 = vld [vmem:[%s1827_s11] sm:$0xf]  ;;  %v1314_v23 = vld [vmem:[%s1833_s14 + $0x4] sm:$0xf]  ;;  %v1648_v29 = vld [vmem:[%s2011_s4 + $0xb0] sm:$0xff]   ;;  %p376_p7 = scmp.lt.s32.totalorder %s373_s19, 9 }
  0x16   : > { %1492 = vmatprep.subr.bf16.mxu1 %v1706_v1  ;;  %v415_v11 = vld [vmem:[%s1833_s14] sm:$0xf]  ;;  %v1382_v27 = vcombine.low %v1314_v23, %v1314_v23  ;;  %v1650_v32 = vld [vmem:[%s2011_s4 + $0xa8] sm:$0xff]   ;;  %v1315_v37 = vld [vmem:[%s1827_s11 + $0x4] sm:$0xf] }
  0x17   : > { %v1342_v13 = vcombine.low %v415_v11, %v415_v11  ;;  %v1652_v36 = vld [vmem:[%s2011_s4 + $0xa0] sm:$0xff]   ;;  %v1653_v39 = vld [vmem:[%s2011_s4 + $0xd8] sm:$0xff]   ;;  %s2027_s19 = smov (!%p376_p7, %s373_s19), 9  ;;  %v1655_v41 = vld [vmem:[%s2011_s4 + $0xd0] sm:$0xff]  }
  0x18   : > { %1481 = vmatpush3.bf16.msra.mxu0 %v1631_v5  ;;  %v831_v30 = vshll.u32 %v1382_v27, 16  ;;  %v829_v33 = vshrl.u32 %v1382_v27, 16  ;;  %v1654_v40 = vld [vmem:[%s2011_s4 + $0xf8] sm:$0xff]   ;;  %v1656_v42 = vld [vmem:[%s2011_s4 + $0xf0] sm:$0xff]   ;;  %s379_s12 = sadd.s32 %s1584_s18, %s2027_s19  ;;  %v1657_v43 = vld [vmem:[%s2011_s4 + $0xc8] sm:$0xff]   ;;  %s1312_s19 = sshll.u32 %s2025_s22, 2 }
  0x19   : > { %1493 = vmatpush3.bf16.msra.mxu1 %v1632_v6  ;;  %1482 = vmatprep.subr.bf16.mxu0 %v1706_v1  ;;  %v590_v16 = vshll.u32 %v1342_v13, 16  ;;  %v588_v19 = vshrl.u32 %v1342_v13, 16  ;;  %v1658_v44 = vld [vmem:[%s2011_s4 + $0xe8] sm:$0xff]   ;;  %s1307_s20 = sshll.u32 %s379_s12, 2  ;;  %v1659_v45 = vld [vmem:[%s2011_s4 + $0xc0] sm:$0xff]   ;;  %v1662_v48 = vld [vmem:[%s2011_s4 + $0x118] sm:$0xff]   ;;  %s411_s28 = sadd.s32 %s1312_s19, %s2029_s21 }
  0x1a   : > { %1494 = vmatprep.subr.bf16.mxu1 %v1706_v1  ;;  %v833_v34 = vrot.slane %v831_v30, 1  ;;  %v1660_v46 = vld [vmem:[%s2011_s4 + $0xe0] sm:$0xff]   ;;  %s381_s30 = scalar_lea.vmem %s2008_s1, %s1307_s20  ;;  %s403_s8 = scalar_lea.vmem %s2010_s3, %s1307_s20  ;;  %v1663_v51 = vld [vmem:[%s2011_s4 + $0x110] sm:$0xff]   ;;  %v1664_v53 = vld [vmem:[%s2011_s4 + $0x108] sm:$0xff]  }
  0x1b   : > { %v592_v20 = vrot.slane %v590_v16, 1  ;;  %v418_v47 = vld [vmem:[%s381_s30] sm:$0xf]  ;;  %s1313_s10 = sshll.u32 %s411_s28, 2 }
  0x1c   : > { %1483 = vmatpush3.bf16.msra.mxu0 %v1633_v7  ;;  %v834_v38 = vor.u32 %v833_v34, %v829_v33  ;;  %v422_v49 = vld [vmem:[%s403_s8] sm:$0xf]  ;;  %v1422_v50 = vcombine.low %v418_v47, %v418_v47  ;;  %s413_s7 = scalar_lea.vmem %s2013_s6, %s1313_s10 }
  0x1d   : > { %1495 = vmatpush3.bf16.msra.mxu1 %v1634_v8  ;;  %1500 = vmatprep.subr.bf16.mxu0 %v1706_v1  ;;  %v593_v24 = vor.u32 %v592_v20, %v588_v19  ;;  %v1665_v56 = vld [vmem:[%s2011_s4 + $0x100] sm:$0xff]  }
  0x1e   : > { %1512 = vmatprep.subr.bf16.mxu1 %v1706_v1  ;;  %v1072_v52 = vshll.u32 %v1422_v50, 16  ;;  %v1070_v54 = vshrl.u32 %v1422_v50, 16  ;;  %v1428_v34 = vld [vmem:[%s2012_s5] ss:$0 sm:$0xff] }
  0x1f   : > { %1485 = vmatmul.mubr.msk.bf16.vlgmr.msra.gmra.mxu0 %vm464_vm1, %v419_v10 }
  0x20   : > { %1497 = vmatmul.mubr.msk.bf16.vlgmr.msra.gmra.mxu1 %vm464_vm1, %v415_v11  ;;  %1501 = vmatpush3.bf16.msra.mxu0 %v1637_v9  ;;  %v1074_v55 = vrot.slane %v1072_v52, 1 }
  0x21   : > { %1513 = vmatpush3.bf16.msra.mxu1 %v1638_v12  ;;  %1502 = vmatprep.subr.bf16.mxu0 %v1706_v1 }
  0x22   : > { %1514 = vmatprep.subr.bf16.mxu1 %v1706_v1  ;;  %1508 = vmatprep.mubr.msk.bf16.mxu0 %vm1707_vm0, %v1706_v1  ;;  %v1075_v57 = vor.u32 %v1074_v55, %v1070_v54 }
  0x23   : > { %1520 = vmatprep.mubr.msk.bf16.mxu1 %vm1707_vm0, %v1706_v1 }
  0x24   : > { %1503 = vmatpush3.bf16.msra.mxu0 %v1639_v14 }
  0x25   : > { %1515 = vmatpush3.bf16.msra.mxu1 %v1640_v15  ;;  %1504 = vmatprep.subr.bf16.mxu0 %v1706_v1 }
  0x26   : > { %1516 = vmatprep.subr.bf16.mxu1 %v1706_v1 }
  0x28   : > { %1505 = vmatpush3.bf16.msra.mxu0 %v1641_v17 }
  0x29   : > { %1517 = vmatpush3.bf16.msra.mxu1 %v1642_v18  ;;  %1506 = vmatprep.subr.bf16.mxu0 %v1706_v1 }
  0x2a   : > { %1518 = vmatprep.subr.bf16.mxu1 %v1706_v1 }
  0x2c   : > { %1507 = vmatpush3.bf16.msra.mxu0 %v1643_v21 }
  0x2d   : > { %1519 = vmatpush3.bf16.msra.mxu1 %v1644_v22  ;;  %1524 = vmatprep.subr.bf16.mxu0 %v1706_v1 }
  0x2e   : > { %1536 = vmatprep.subr.bf16.mxu1 %v1706_v1 }
  0x2f   : > { %1509 = vmatmul.mubr.msk.bf16.vlgmr.msra.gmra.mxu0 %vm464_vm1, %v593_v24 }
  0x30   : > { %1525 = vmatpush3.bf16.msra.mxu0 %v1645_v25  ;;  %1521 = vmatmul.mubr.msk.bf16.vlgmr.msra.gmra.mxu1 %vm464_vm1, %v1314_v23 }
  0x31   : > { %1537 = vmatpush3.bf16.msra.mxu1 %v1646_v26  ;;  %1526 = vmatprep.subr.bf16.mxu0 %v1706_v1 }
  0x32   : > { %1538 = vmatprep.subr.bf16.mxu1 %v1706_v1  ;;  %1532 = vmatprep.mubr.msk.bf16.mxu0 %vm1707_vm0, %v1706_v1 }
  0x33   : > { %1544 = vmatprep.mubr.msk.bf16.mxu1 %vm1707_vm0, %v1706_v1 }
  0x34   : > { %1527 = vmatpush3.bf16.msra.mxu0 %v1647_v28 }
  0x35   : > { %1539 = vmatpush3.bf16.msra.mxu1 %v1648_v29  ;;  %1528 = vmatprep.subr.bf16.mxu0 %v1706_v1 }
  0x36   : > { %1540 = vmatprep.subr.bf16.mxu1 %v1706_v1 }
  0x38   : > { %1529 = vmatpush3.bf16.msra.mxu0 %v1649_v31 }
  0x39   : > { %1541 = vmatpush3.bf16.msra.mxu1 %v1650_v32  ;;  %1530 = vmatprep.subr.bf16.mxu0 %v1706_v1 }
  0x3a   : > { %1542 = vmatprep.subr.bf16.mxu1 %v1706_v1 }
  0x3c   : > { %1531 = vmatpush3.bf16.msra.mxu0 %v1651_v35 }
  0x3d   : > { %1543 = vmatpush3.bf16.msra.mxu1 %v1652_v36  ;;  %1548 = vmatprep.subr.bf16.mxu0 %v1706_v1 }
  0x3e   : > { %1560 = vmatprep.subr.bf16.mxu1 %v1706_v1 }
  0x3f   : > { %1533 = vmatmul.mubr.msk.bf16.vlgmr.msra.gmra.mxu0 %vm464_vm1, %v1315_v37 }
  0x40   : > { %1549 = vmatpush3.bf16.msra.mxu0 %v1653_v39  ;;  %1545 = vmatmul.mubr.msk.bf16.vlgmr.msra.gmra.mxu1 %vm464_vm1, %v834_v38 }
  0x41   : > { %1561 = vmatpush3.bf16.msra.mxu1 %v1654_v40  ;;  %1550 = vmatprep.subr.bf16.mxu0 %v1706_v1 }
  0x42   : > { %1562 = vmatprep.subr.bf16.mxu1 %v1706_v1  ;;  %1556 = vmatprep.mubr.msk.bf16.mxu0 %vm1707_vm0, %v1706_v1 }
  0x43   : > { %1568 = vmatprep.mubr.msk.bf16.mxu1 %vm1707_vm0, %v1706_v1 }
  0x44   : > { %1551 = vmatpush3.bf16.msra.mxu0 %v1655_v41 }
  0x45   : > { %1563 = vmatpush3.bf16.msra.mxu1 %v1656_v42  ;;  %1552 = vmatprep.subr.bf16.mxu0 %v1706_v1 }
  0x46   : > { %1564 = vmatprep.subr.bf16.mxu1 %v1706_v1 }
  0x48   : > { %1553 = vmatpush3.bf16.msra.mxu0 %v1657_v43 }
  0x49   : > { %1565 = vmatpush3.bf16.msra.mxu1 %v1658_v44  ;;  %1554 = vmatprep.subr.bf16.mxu0 %v1706_v1 }
  0x4a   : > { %1566 = vmatprep.subr.bf16.mxu1 %v1706_v1 }
  0x4c   : > { %1555 = vmatpush3.bf16.msra.mxu0 %v1659_v45 }
  0x4d   : > { %1567 = vmatpush3.bf16.msra.mxu1 %v1660_v46  ;;  %1572 = vmatprep.subr.bf16.mxu0 %v1706_v1 }
  0x4f   : > { %1557 = vmatmul.mubr.msk.bf16.vlgmr.msra.gmra.mxu0 %vm464_vm1, %v418_v47 }
  0x50   : > { %1573 = vmatpush3.bf16.msra.mxu0 %v1662_v48  ;;  %1569 = vmatmul.mubr.msk.bf16.vlgmr.msra.gmra.mxu1 %vm464_vm1, %v422_v49 }
  0x51   : > { %1574 = vmatprep.subr.bf16.mxu0 %v1706_v1  ;;  %1580 = vmatprep.mubr.msk.bf16.mxu0 %vm1707_vm0, %v1706_v1 }
  0x54   : > { %1575 = vmatpush3.bf16.msra.mxu0 %v1663_v51 }
  0x55   : > { %1576 = vmatprep.subr.bf16.mxu0 %v1706_v1 }
  0x58   : > { %1577 = vmatpush3.bf16.msra.mxu0 %v1664_v53 }
  0x59   : > { %1578 = vmatprep.subr.bf16.mxu0 %v1706_v1 }
  0x5c   : > { %1579 = vmatpush3.bf16.msra.mxu0 %v1665_v56 }
  0x5f   : > { %1581 = vmatmul.mubr.msk.bf16.vlgmr.msra.gmra.mxu0 %vm464_vm1, %v1075_v57 }
  0xdf   : > { %v502_v58 = vpop.f32.mrf.mxu0 }
  0xe0   : > { %v569_v59 = vpop.f32.mrf.mxu1 }
  0xe1   : > { %v1486_v60 = vpop.f32.mrf.mxu0  ;;  %v570_v18 = vadd.f32 %v569_v59, %v502_v58 }
  0xe2   : > { %v1498_v61 = vpop.f32.mrf.mxu1 }
  0xe3   : > { %v505_v62 = vpop.f32.mrf.mxu0 }
  0xe4   : > { %v572_v63 = vpop.f32.mrf.mxu1 }
  0xe5   : > { %v1487_v0 = vpop.f32.mrf.mxu0 }
  0xe6   : > { %v1499_v2 = vpop.f32.mrf.mxu1 }
  0xef   : > { %v655_v3 = vpop.f32.mrf.mxu0 }
  0xf0   : > { %v732_v4 = vpop.f32.mrf.mxu1  ;;  %v661_v19 = vadd.f32 %v655_v3, %v570_v18 }
  0xf1   : > { %v1510_v5 = vpop.f32.mrf.mxu0 }
  0xf2   : > { %v1522_v6 = vpop.f32.mrf.mxu1  ;;  %v738_v23 = vadd.f32 %v732_v4, %v661_v19 }
  0xf3   : > { %v658_v7 = vpop.f32.mrf.mxu0 }
  0xf4   : > { %v735_v8 = vpop.f32.mrf.mxu1 }
  0xf5   : > { %v1511_v9 = vpop.f32.mrf.mxu0 }
  0xf6   : > { %v1523_v1 = vpop.f32.mrf.mxu1 }
  0xff   : > { %v809_v10 = vpop.f32.mrf.mxu0 }
 0x100   : > { %v896_v11 = vpop.f32.mrf.mxu1  ;;  %v815_v26 = vadd.f32 %v809_v10, %v738_v23 }
 0x101   : > { %v1534_v12 = vpop.f32.mrf.mxu0 }
 0x102   : > { %v1546_v13 = vpop.f32.mrf.mxu1  ;;  %v902_v30 = vadd.f32 %v896_v11, %v815_v26 }
 0x103   : > { %v812_v14 = vpop.f32.mrf.mxu0 }
 0x104   : > { %v899_v15 = vpop.f32.mrf.mxu1 }
 0x105   : > { %v1535_v16 = vpop.f32.mrf.mxu0 }
 0x106   : > { %v1547_v17 = vpop.f32.mrf.mxu1 }
 0x10f   : > { %v973_v20 = vpop.f32.mrf.mxu0 }
 0x110   : > { %v1050_v21 = vpop.f32.mrf.mxu1  ;;  %v979_v31 = vadd.f32 %v973_v20, %v902_v30 }
 0x111   : > { %v1558_v22 = vpop.f32.mrf.mxu0 }
 0x112   : > { %v1570_v24 = vpop.f32.mrf.mxu1  ;;  %v1056_v32 = vadd.f32 %v1050_v21, %v979_v31 }
 0x113   : > { %v976_v25 = vpop.f32.mrf.mxu0 }
 0x114   : > { %v1053_v27 = vpop.f32.mrf.mxu1 }
 0x115   : > { %v1559_v28 = vpop.f32.mrf.mxu0 }
 0x116   : > { %v1571_v29 = vpop.f32.mrf.mxu1 }
 0x11f   : > { %v1137_v33 = vpop.f32.mrf.mxu0 }
 0x120   : > { %v1143_v35 = vadd.f32 %v1137_v33, %v1056_v32 }
 0x121   : > { %v1582_v36 = vpop.f32.mrf.mxu0 }
 0x122   : > { %v1151_v37 = vadd.f32 %v1428_v34, %v1143_v35 }
 0x123   : > { %v1140_v38 = vpop.f32.mrf.mxu0 }
 0x124   : > { %v1152_v39 = vmax.f32 %v1151_v37, 0.0 }
 0x125   : > { %v1583_v40 = vpop.f32.mrf.mxu0 }
 0x126   : > { %v1153_v41 = vpack.c.bf16 %v1152_v39, %v1152_v39 }
 0x128   : > { %1154 = vst [vmem:[%s413_s7] sm:$0x7] %v1153_v41 }
 0x129 PF: > { %s16_s25 = sadd.s32 1, %s1704_s25   ;;  %s2014_s21 = smov %s1696_s23 }
 0x12a   : > { %p13_p9 = scmp.ge.s32.totalorder %s16_s25, 10   ;;  %s2015_s22 = smov %s1700_s24 }
 0x12b   : > { %s2016_s23 = smov %s2019_s26  ;;  %s2017_s24 = smov %s2023_s27 }
 0x12c   :  { %15 = sbr.rel (!%p13_p9) target bundleno = 3 (0x3), region = 93 }

// kernel: actor_forward.10
= control target key start
LH: loop header
LB: loop body
LE: loop exit
PB: predicated region body
PF: predicated region fallthrough
CT: control target
= control target key end

     0   :  { %s2546_s21 = smov 0   ;;  %s2548_s22 = smov 0   ;;  %s3085_s0 = inlined_call_operand.vmem [shape: bf16[2,6,4,128], index: 0, kind: input, shape index: {}, may-alias: {0,1}]   ;;  %s3086_s1 = inlined_call_operand.vmem [shape: bf16[2,6,4,128], index: 1, kind: input, shape index: {}, may-alias: {0,1}]   ;;  %s3087_s2 = inlined_call_operand.vmem [shape: bf16[2,6,4,128], index: 2, kind: input, shape index: {}, may-alias: {2,3}]   ;;  %s3088_s3 = inlined_call_operand.vmem [shape: bf16[2,6,4,128], index: 3, kind: input, shape index: {}, may-alias: {2,3}]   ;;  %s3089_s4 = inlined_call_operand.vmem [shape: bf16[3,3,128,256], index: 4, kind: input, shape index: {}]   ;;  %s3090_s5 = inlined_call_operand.vmem [shape: f32[1,256], index: 5, kind: input, shape index: {}]   ;;  %s3091_s6 = inlined_call_operand.vmem [shape: bf16[2,2,3,256], index: 6, kind: output, shape index: {}]  }
   0x1   :  { %s2550_s23 = smov 0   ;;  %s2552_s24 = smov 0  }
   0x2   :  { %s2554_s25 = smov 0  }
   0x3 LB: > { %s25_s26 = sadd.s32 1, %s2499_s23  ;;  %s28_s27 = sadd.s32 1, %s2503_s24  ;;  %s2507_s25 = sphi %s2554_s25, %s16_s25   ;;  %s2503_s24 = sphi %s2552_s24, %s3095_s24   ;;  %s2499_s23 = sphi %s2550_s23, %s3094_s23   ;;  %s2495_s22 = sphi %s2548_s22, %s3093_s22   ;;  %s2491_s21 = sphi %s2546_s21, %s3092_s21  }
   0x4   : > { %p26_p0 = scmp.ge.s32.totalorder %s25_s26, 2  ;;  %p1921_p1 = scmp.ge.s32.totalorder %s2507_s25, 1 }
   0x5   : > { %p296_p2 = scmp.lt.s32.totalorder %s2507_s25, 5 }
   0x6   : > { %s3097_s26 = smov (%p26_p0, %s25_s26), 0  ;;  %s3099_s27 = smov (!%p26_p0, %s28_s27), %s2503_s24 }
   0x7   : > { %p297_p3 = pnand %p1921_p1, %p296_p2  ;;  %p30_p4 = scmp.ge.s32.totalorder %s3099_s27, 2 }
   0x8   : > { %p364_p5 = scmp.lt.s32.totalorder (!%p297_p3), %s2495_s22, 1  ;;  %s1922_s15 = sshll.u32 (!%p297_p3), %s2491_s21, 1 }
   0x9   : > { %s3101_s27 = smov (%p30_p4, %s3099_s27), 0  ;;  %300 = sbr.rel (%p297_p3) target bundleno = 383 (0x17f), region = 44 }
   0xa   : > { %s374_s18 = sadd.s32 (!%p297_p3), 2, %s1922_s15  ;;  %p366_p7 = scmp.lt.s32.totalorder (!%p297_p3), %s1922_s15, 5 }
   0xb   : > { %p377_p6 = scmp.lt.s32.totalorder (!%p297_p3), %s374_s18, 5  ;;  %p409_p8 = scmp.lt.s32.totalorder (!%p297_p3), %s2491_s21, 1 }
   0xe   : > { %v2253_v0 = vld [vmem:[%s3089_s4 + $0xf4] ss:$8 sps:$4 sm:$0xff]   ;;  %v2509_v2 = vmov 0   ;;  %v2257_v3 = vld [vmem:[%s3089_s4 + $0xf0] ss:$8 sps:$4 sm:$0xff]   ;;  %s3103_s22 = smov (!%p364_p5, %s2495_s22), 1  ;;  %v721_v47 = vlaneseq }
   0xf   : > { %v2255_v1 = vld [vmem:[%s3089_s4 + $0x74] ss:$8 sps:$4 sm:$0xff]   ;;  %570 = vmatprep.mubr.bf16.mxu0 %v2509_v2  ;;  %691 = vmatprep.mubr.bf16.mxu1 %v2509_v2  ;;  %v2258_v4 = vld [vmem:[%s3089_s4 + $0x70] ss:$8 sps:$4 sm:$0xff]   ;;  %v2259_v5 = vld [vmem:[%s3089_s4 + $0xe4] ss:$8 sps:$4 sm:$0xff]  }
  0x10   : > { %538 = vmatprep.subr.bf16.mxu0 %v2253_v0  ;;  %659 = vmatprep.subr.bf16.mxu1 %v2255_v1  ;;  %v2261_v6 = vld [vmem:[%s3089_s4 + $0x64] ss:$8 sps:$4 sm:$0xff]   ;;  %v2263_v7 = vld [vmem:[%s3089_s4 + $0xe0] ss:$8 sps:$4 sm:$0xff]   ;;  %v2265_v9 = vld [vmem:[%s3089_s4 + $0xd4] ss:$8 sps:$4 sm:$0xff]  }
  0x11   : > { %539 = vmatpush1.bf16.msra.mxu0 %v2257_v3  ;;  %660 = vmatpush1.bf16.msra.mxu1 %v2258_v4  ;;  %v2264_v8 = vld [vmem:[%s3089_s4 + $0x60] ss:$8 sps:$4 sm:$0xff]   ;;  %v2267_v10 = vld [vmem:[%s3089_s4 + $0x54] ss:$8 sps:$4 sm:$0xff]   ;;  %v2269_v11 = vld [vmem:[%s3089_s4 + $0xd0] ss:$8 sps:$4 sm:$0xff]  }
  0x12   : > { %540 = vmatprep.subr.bf16.mxu0 %v2259_v5  ;;  %661 = vmatprep.subr.bf16.mxu1 %v2261_v6  ;;  %v2270_v12 = vld [vmem:[%s3089_s4 + $0x50] ss:$8 sps:$4 sm:$0xff]   ;;  %v2271_v13 = vld [vmem:[%s3089_s4 + $0xc4] ss:$8 sps:$4 sm:$0xff]   ;;  %v2275_v15 = vld [vmem:[%s3089_s4 + $0xc0] ss:$8 sps:$4 sm:$0xff]  }
  0x13   : > { %v2273_v14 = vld [vmem:[%s3089_s4 + $0x44] ss:$8 sps:$4 sm:$0xff]   ;;  %v2276_v16 = vld [vmem:[%s3089_s4 + $0x40] ss:$8 sps:$4 sm:$0xff]   ;;  %v2277_v17 = vld [vmem:[%s3089_s4 + $0xb4] ss:$8 sps:$4 sm:$0xff]  }
  0x14   : > { %v2279_v18 = vld [vmem:[%s3089_s4 + $0x34] ss:$8 sps:$4 sm:$0xff]   ;;  %s2210_s8 = smul.u32 6, %s3103_s22  ;;  %s3105_s18 = smov (!%p377_p6, %s374_s18), 5  ;;  %v2281_v19 = vld [vmem:[%s3089_s4 + $0xb0] ss:$8 sps:$4 sm:$0xff]  }
  0x15   : > { %541 = vmatpush1.bf16.msra.mxu0 %v2263_v7  ;;  %662 = vmatpush1.bf16.msra.mxu1 %v2264_v8  ;;  %v2282_v20 = vld [vmem:[%s3089_s4 + $0x30] ss:$8 sps:$4 sm:$0xff]   ;;  %v2283_v21 = vld [vmem:[%s3089_s4 + $0xa4] ss:$8 sps:$4 sm:$0xff]   ;;  %s3107_s15 = smov (!%p366_p7, %s1922_s15), 5  ;;  %v2742_v53 = vshrl.u32 %v721_v47, 7 }
  0x16   : > { %542 = vmatprep.subr.bf16.mxu0 %v2265_v9  ;;  %663 = vmatprep.subr.bf16.mxu1 %v2267_v10  ;;  %s2651_s16 = sadd.s32 %s2210_s8, %s3105_s18  ;;  %v2285_v22 = vld [vmem:[%s3089_s4 + $0x24] ss:$8 sps:$4 sm:$0xff]   ;;  %v2287_v23 = vld [vmem:[%s3089_s4 + $0xa0] ss:$8 sps:$4 sm:$0xff]   ;;  %v2289_v25 = vld [vmem:[%s3089_s4 + $0x94] ss:$8 sps:$4 sm:$0xff]   ;;  %s369_s11 = sadd.s32 %s2210_s8, %s3107_s15 }
  0x17   : > { %v2288_v24 = vld [vmem:[%s3089_s4 + $0x20] ss:$8 sps:$4 sm:$0xff]   ;;  %v2291_v26 = vld [vmem:[%s3089_s4 + $0x14] ss:$8 sps:$4 sm:$0xff]   ;;  %v2293_v27 = vld [vmem:[%s3089_s4 + $0x90] ss:$8 sps:$4 sm:$0xff]  }
  0x18   : > { %v2294_v28 = vld [vmem:[%s3089_s4 + $0x10] ss:$8 sps:$4 sm:$0xff]   ;;  %v2295_v29 = vld [vmem:[%s3089_s4 + $0x84] ss:$8 sps:$4 sm:$0xff]   ;;  %s1923_s28 = sshll.u32 %s369_s11, 1  ;;  %s3109_s21 = smov (!%p409_p8, %s2491_s21), 1 }
  0x19   : > { %543 = vmatpush1.bf16.msra.mxu0 %v2269_v11  ;;  %664 = vmatpush1.bf16.msra.mxu1 %v2270_v12  ;;  %v2297_v30 = vld [vmem:[%s3089_s4 + $0x4] ss:$8 sps:$4 sm:$0xff]   ;;  %v2299_v31 = vld [vmem:[%s3089_s4 + $0x80] ss:$8 sps:$4 sm:$0xff]   ;;  %s2686_s9 = scalar_lea.vmem %s3087_s2, %s1923_s28  ;;  %s2694_s14 = scalar_lea.vmem %s3085_s0, %s1923_s28  ;;  %v2303_v33 = vld [vmem:[%s3089_s4 + $0x174] ss:$8 sps:$4 sm:$0xff]  }
  0x1a   : > { %544 = vmatprep.subr.bf16.mxu0 %v2271_v13  ;;  %665 = vmatprep.subr.bf16.mxu1 %v2273_v14  ;;  %v2300_v32 = vld [vmem:[%s3089_s4] ss:$8 sps:$4 sm:$0xff]   ;;  %v2306_v34 = vld [vmem:[%s3089_s4 + $0x1f4] ss:$8 sps:$4 sm:$0xff]   ;;  %v2301_v37 = vld [vmem:[%s3089_s4 + $0x170] ss:$8 sps:$4 sm:$0xff]  }
  0x1b   : > { %v421_v35 = vld [vmem:[%s2686_s9] sm:$0x3]  ;;  %v2304_v38 = vld [vmem:[%s3089_s4 + $0x1f0] ss:$8 sps:$4 sm:$0xff]   ;;  %v2309_v39 = vld [vmem:[%s3089_s4 + $0x164] ss:$8 sps:$4 sm:$0xff]  }
  0x1c   : > { %v417_v36 = vld [vmem:[%s2694_s14] sm:$0x3]  ;;  %v2312_v40 = vld [vmem:[%s3089_s4 + $0x1e4] ss:$8 sps:$4 sm:$0xff]   ;;  %v2315_v43 = vld [vmem:[%s3089_s4 + $0x154] ss:$8 sps:$4 sm:$0xff]  }
  0x1d   : > { %545 = vmatpush1.bf16.msra.mxu0 %v2275_v15  ;;  %666 = vmatpush1.bf16.msra.mxu1 %v2276_v16  ;;  %v2307_v41 = vld [vmem:[%s3089_s4 + $0x160] ss:$8 sps:$4 sm:$0xff]   ;;  %v2318_v44 = vld [vmem:[%s3089_s4 + $0x1d4] ss:$8 sps:$4 sm:$0xff]   ;;  %v2510_v45 = vmov 1983009808  }
  0x1e   : > { %546 = vmatprep.subr.bf16.mxu0 %v2277_v17  ;;  %667 = vmatprep.subr.bf16.mxu1 %v2279_v18  ;;  %v2310_v42 = vld [vmem:[%s3089_s4 + $0x1e0] ss:$8 sps:$4 sm:$0xff]   ;;  %v719_v46 = vunpack.c.l.s4 %v2510_v45  ;;  %v2313_v48 = vld [vmem:[%s3089_s4 + $0x150] ss:$8 sps:$4 sm:$0xff]   ;;  %v2321_v50 = vld [vmem:[%s3089_s4 + $0x144] ss:$8 sps:$4 sm:$0xff]  }
  0x1f   : > { %v2316_v49 = vld [vmem:[%s3089_s4 + $0x1d0] ss:$8 sps:$4 sm:$0xff]   ;;  %v2324_v51 = vld [vmem:[%s3089_s4 + $0x1c4] ss:$8 sps:$4 sm:$0xff]   ;;  %v2319_v54 = vld [vmem:[%s3089_s4 + $0x140] ss:$8 sps:$4 sm:$0xff]  }
  0x20   : > { %v720_v52 = vunpack.c.0.s8 %v719_v46  ;;  %v2322_v55 = vld [vmem:[%s3089_s4 + $0x1c0] ss:$8 sps:$4 sm:$0xff]   ;;  %v2327_v56 = vld [vmem:[%s3089_s4 + $0x134] ss:$8 sps:$4 sm:$0xff]   ;;  %v2325_v59 = vld [vmem:[%s3089_s4 + $0x130] ss:$8 sps:$4 sm:$0xff]  }
  0x21   : > { %547 = vmatpush1.bf16.msra.mxu0 %v2281_v19  ;;  %668 = vmatpush1.bf16.msra.mxu1 %v2282_v20  ;;  %v2330_v57 = vld [vmem:[%s3089_s4 + $0x1b4] ss:$8 sps:$4 sm:$0xff]   ;;  %v2328_v60 = vld [vmem:[%s3089_s4 + $0x1b0] ss:$8 sps:$4 sm:$0xff]   ;;  %v2333_v61 = vld [vmem:[%s3089_s4 + $0x124] ss:$8 sps:$4 sm:$0xff]  }
  0x22   : > { %548 = vmatprep.subr.bf16.mxu0 %v2283_v21  ;;  %669 = vmatprep.subr.bf16.mxu1 %v2285_v22  ;;  %v2757_v58 = vsub.s32 %v720_v52, %v2742_v53  ;;  %v2336_v62 = vld [vmem:[%s3089_s4 + $0x1a4] ss:$8 sps:$4 sm:$0xff]   ;;  %v2331_v0 = vld [vmem:[%s3089_s4 + $0x120] ss:$8 sps:$4 sm:$0xff]   ;;  %v2339_v3 = vld [vmem:[%s3089_s4 + $0x114] ss:$8 sps:$4 sm:$0xff]  }
  0x23   : > { %v2334_v1 = vld [vmem:[%s3089_s4 + $0x1a0] ss:$8 sps:$4 sm:$0xff]   ;;  %v2342_v4 = vld [vmem:[%s3089_s4 + $0x194] ss:$8 sps:$4 sm:$0xff]   ;;  %v2337_v6 = vld [vmem:[%s3089_s4 + $0x110] ss:$8 sps:$4 sm:$0xff]  }
  0x24   : > { %v724_v63 = vrot.slane %v417_v36, %v2757_v58  ;;  %v2340_v7 = vld [vmem:[%s3089_s4 + $0x190] ss:$8 sps:$4 sm:$0xff]   ;;  %v2345_v8 = vld [vmem:[%s3089_s4 + $0x104] ss:$8 sps:$4 sm:$0xff]   ;;  %v2343_v12 = vld [vmem:[%s3089_s4 + $0x100] ss:$8 sps:$4 sm:$0xff]  }
  0x25   : > { %549 = vmatpush1.bf16.msra.mxu0 %v2287_v23  ;;  %670 = vmatpush1.bf16.msra.mxu1 %v2288_v24  ;;  %v2348_v9 = vld [vmem:[%s3089_s4 + $0x184] ss:$8 sps:$4 sm:$0xff]   ;;  %v2346_v13 = vld [vmem:[%s3089_s4 + $0x180] ss:$8 sps:$4 sm:$0xff]   ;;  %v2351_v14 = vld [vmem:[%s3089_s4 + $0x274] ss:$8 sps:$4 sm:$0xff]  }
  0x26   : > { %550 = vmatprep.subr.bf16.mxu0 %v2289_v25  ;;  %671 = vmatprep.subr.bf16.mxu1 %v2291_v26  ;;  %v728_v5 = vshll.u32 %v724_v63, 16  ;;  %v726_v10 = vshrl.u32 %v724_v63, 16  ;;  %v2354_v15 = vld [vmem:[%s3089_s4 + $0x2f4] ss:$8 sps:$4 sm:$0xff]   ;;  %v2349_v17 = vld [vmem:[%s3089_s4 + $0x270] ss:$8 sps:$4 sm:$0xff]  }
  0x27   : > { %v1933_v18 = vld [vmem:[%s2694_s14 + $0x2] sm:$0x3]  ;;  %v2352_v19 = vld [vmem:[%s3089_s4 + $0x2f0] ss:$8 sps:$4 sm:$0xff]   ;;  %v2357_v20 = vld [vmem:[%s3089_s4 + $0x264] ss:$8 sps:$4 sm:$0xff]  }
  0x28   : > { %v730_v11 = vrot.slane %v728_v5, 1  ;;  %v2360_v21 = vld [vmem:[%s3089_s4 + $0x2e4] ss:$8 sps:$4 sm:$0xff]   ;;  %v2355_v22 = vld [vmem:[%s3089_s4 + $0x260] ss:$8 sps:$4 sm:$0xff]   ;;  %s1930_s30 = sshll.u32 %s3109_s21, 1 }
  0x29   : > { %551 = vmatpush1.bf16.msra.mxu0 %v2293_v27  ;;  %672 = vmatpush1.bf16.msra.mxu1 %v2294_v28  ;;  %v2358_v23 = vld [vmem:[%s3089_s4 + $0x2e0] ss:$8 sps:$4 sm:$0xff]   ;;  %v2363_v24 = vld [vmem:[%s3089_s4 + $0x254] ss:$8 sps:$4 sm:$0xff]   ;;  %v2361_v26 = vld [vmem:[%s3089_s4 + $0x250] ss:$8 sps:$4 sm:$0xff]  }
  0x2a   : > { %552 = vmatprep.subr.bf16.mxu0 %v2295_v29  ;;  %673 = vmatprep.subr.bf16.mxu1 %v2297_v30  ;;  %v731_v16 = vor.u32 %v730_v11, %v726_v10  ;;  %v2366_v25 = vld [vmem:[%s3089_s4 + $0x2d4] ss:$8 sps:$4 sm:$0xff]   ;;  %v2364_v27 = vld [vmem:[%s3089_s4 + $0x2d0] ss:$8 sps:$4 sm:$0xff]   ;;  %v2369_v28 = vld [vmem:[%s3089_s4 + $0x244] ss:$8 sps:$4 sm:$0xff]  }
  0x2b   : > { %v2372_v29 = vld [vmem:[%s3089_s4 + $0x2c4] ss:$8 sps:$4 sm:$0xff]   ;;  %v2367_v30 = vld [vmem:[%s3089_s4 + $0x240] ss:$8 sps:$4 sm:$0xff]   ;;  %v2388_v45 = vld [vmem:[%s3089_s4 + $0x290] ss:$8 sps:$4 sm:$0xff]  }
  0x2c   : > { %v2393_v46 = vld [vmem:[%s3089_s4 + $0x204] ss:$8 sps:$4 sm:$0xff]   ;;  %v2399_v52 = vld [vmem:[%s3089_s4 + $0x374] ss:$8 sps:$4 sm:$0xff]   ;;  %v2406_v63 = vld [vmem:[%s3089_s4 + $0x3e0] ss:$8 sps:$4 sm:$0xff]  }
  0x2d   : > { %553 = vmatpush1.bf16.msra.mxu0 %v2299_v31  ;;  %674 = vmatpush1.bf16.msra.mxu1 %v2300_v32  ;;  %v2370_v31 = vld [vmem:[%s3089_s4 + $0x2c0] ss:$8 sps:$4 sm:$0xff]   ;;  %v2375_v32 = vld [vmem:[%s3089_s4 + $0x234] ss:$8 sps:$4 sm:$0xff]   ;;  %v2396_v47 = vld [vmem:[%s3089_s4 + $0x284] ss:$8 sps:$4 sm:$0xff]  }
  0x2e   : > { %813 = vmatprep.subr.bf16.mxu0 %v2303_v33  ;;  %953 = vmatprep.subr.bf16.mxu1 %v2306_v34  ;;  %v2378_v33 = vld [vmem:[%s3089_s4 + $0x2b4] ss:$8 sps:$4 sm:$0xff]   ;;  %v2373_v34 = vld [vmem:[%s3089_s4 + $0x230] ss:$8 sps:$4 sm:$0xff]   ;;  %v2417_v5 = vld [vmem:[%s3089_s4 + $0x344] ss:$8 sps:$4 sm:$0xff]  }
  0x2f   : > { %v2426_v10 = vld [vmem:[%s3089_s4 + $0x3b4] ss:$8 sps:$4 sm:$0xff]   ;;  %v2421_v11 = vld [vmem:[%s3089_s4 + $0x330] ss:$8 sps:$4 sm:$0xff]   ;;  %vm1757_vm0 = vcmask 1041408   ;;  %vm1760_vm2 = vcmask 1043458  }
  0x30   : > { %571 = vmatmul.mubr.bf16.vlgmr.msra.gmra.mxu0 %v421_v35  ;;  %692 = vmatmul.mubr.bf16.vlgmr.msra.gmra.mxu1 %v417_v36  ;;  %v2376_v35 = vld [vmem:[%s3089_s4 + $0x2b0] ss:$8 sps:$4 sm:$0xff]   ;;  %v2381_v36 = vld [vmem:[%s3089_s4 + $0x224] ss:$8 sps:$4 sm:$0xff]   ;;  %vm1758_vm1 = vsmask.f32 1280 }
  0x31   : > { %814 = vmatpush1.bf16.msra.mxu0 %v2301_v37  ;;  %954 = vmatpush1.bf16.msra.mxu1 %v2304_v38  ;;  %v2384_v37 = vld [vmem:[%s3089_s4 + $0x2a4] ss:$8 sps:$4 sm:$0xff]   ;;  %v1160_v38 = vrot.slane %v1933_v18, %v2757_v58  ;;  %vm1761_vm3 = vsmask.f32 3328  ;;  %vm1759_vm4 = vmand %vm1757_vm0, %vm1758_vm1 }
  0x32   : > { %815 = vmatprep.subr.bf16.mxu0 %v2309_v39  ;;  %955 = vmatprep.subr.bf16.mxu1 %v2312_v40  ;;  %v2379_v39 = vld [vmem:[%s3089_s4 + $0x220] ss:$8 sps:$4 sm:$0xff]   ;;  %vm1762_vm5 = vmand %vm1760_vm2, %vm1761_vm3 }
  0x33   : > { %845 = vmatprep.mubr.bf16.mxu0 %v2509_v2  ;;  %985 = vmatprep.mubr.bf16.mxu1 %v2509_v2  ;;  %v2382_v40 = vld [vmem:[%s3089_s4 + $0x2a0] ss:$8 sps:$4 sm:$0xff]   ;;  %vm1763_vm6 = vmor %vm1762_vm5, %vm1759_vm4 }
  0x35   : > { %816 = vmatpush1.bf16.msra.mxu0 %v2307_v41  ;;  %956 = vmatpush1.bf16.msra.mxu1 %v2310_v42  ;;  %v2387_v41 = vld [vmem:[%s3089_s4 + $0x214] ss:$8 sps:$4 sm:$0xff]  }
  0x36   : > { %817 = vmatprep.subr.bf16.mxu0 %v2315_v43  ;;  %957 = vmatprep.subr.bf16.mxu1 %v2318_v44  ;;  %v2390_v42 = vld [vmem:[%s3089_s4 + $0x294] ss:$8 sps:$4 sm:$0xff]   ;;  %v1164_v43 = vshll.u32 %v1160_v38, 16  ;;  %v2385_v44 = vld [vmem:[%s3089_s4 + $0x210] ss:$8 sps:$4 sm:$0xff]  }
  0x39   : > { %818 = vmatpush1.bf16.msra.mxu0 %v2313_v48  ;;  %958 = vmatpush1.bf16.msra.mxu1 %v2316_v49  ;;  %v1162_v48 = vshrl.u32 %v1160_v38, 16  ;;  %v1166_v49 = vrot.slane %v1164_v43, 1  ;;  %v2460_v38 = vld [vmem:[%s3089_s4 + $0x420] ss:$8 sps:$4 sm:$0xff]  }
  0x3a   : > { %819 = vmatprep.subr.bf16.mxu0 %v2321_v50  ;;  %959 = vmatprep.subr.bf16.mxu1 %v2324_v51  ;;  %v2391_v50 = vld [vmem:[%s3089_s4 + $0x200] ss:$8 sps:$4 sm:$0xff]  }
  0x3b   : > { %v2394_v51 = vld [vmem:[%s3089_s4 + $0x280] ss:$8 sps:$4 sm:$0xff]  }
  0x3d   : > { %820 = vmatpush1.bf16.msra.mxu0 %v2319_v54  ;;  %960 = vmatpush1.bf16.msra.mxu1 %v2322_v55  ;;  %v2402_v54 = vld [vmem:[%s3089_s4 + $0x3f4] ss:$8 sps:$4 sm:$0xff]   ;;  %v1934_v55 = vld [vmem:[%s2686_s9 + $0x2] sm:$0x3]  ;;  %s1925_s9 = sshll.u32 %s2651_s16, 1 }
  0x3e   : > { %821 = vmatprep.subr.bf16.mxu0 %v2327_v56  ;;  %961 = vmatprep.subr.bf16.mxu1 %v2330_v57  ;;  %v2397_v56 = vld [vmem:[%s3089_s4 + $0x370] ss:$8 sps:$4 sm:$0xff]   ;;  %v1167_v57 = vor.u32 %v1166_v49, %v1162_v48  ;;  %s382_s19 = scalar_lea.vmem %s3086_s1, %s1925_s9  ;;  %s404_s15 = scalar_lea.vmem %s3088_s3, %s1925_s9 }
  0x41   : > { %822 = vmatpush1.bf16.msra.mxu0 %v2325_v59  ;;  %962 = vmatpush1.bf16.msra.mxu1 %v2328_v60  ;;  %v2400_v59 = vld [vmem:[%s3089_s4 + $0x3f0] ss:$8 sps:$4 sm:$0xff]   ;;  %v2405_v60 = vld [vmem:[%s3089_s4 + $0x364] ss:$8 sps:$4 sm:$0xff]  }
  0x42   : > { %823 = vmatprep.subr.bf16.mxu0 %v2333_v61  ;;  %963 = vmatprep.subr.bf16.mxu1 %v2336_v62  ;;  %v2408_v61 = vld [vmem:[%s3089_s4 + $0x3e4] ss:$8 sps:$4 sm:$0xff]   ;;  %v2403_v62 = vld [vmem:[%s3089_s4 + $0x360] ss:$8 sps:$4 sm:$0xff]  }
  0x45   : > { %824 = vmatpush1.bf16.msra.mxu0 %v2331_v0  ;;  %964 = vmatpush1.bf16.msra.mxu1 %v2334_v1  ;;  %v2411_v0 = vld [vmem:[%s3089_s4 + $0x354] ss:$8 sps:$4 sm:$0xff]  }
  0x46   : > { %825 = vmatprep.subr.bf16.mxu0 %v2339_v3  ;;  %965 = vmatprep.subr.bf16.mxu1 %v2342_v4  ;;  %v2414_v1 = vld [vmem:[%s3089_s4 + $0x3d4] ss:$8 sps:$4 sm:$0xff]   ;;  %v2409_v3 = vld [vmem:[%s3089_s4 + $0x350] ss:$8 sps:$4 sm:$0xff]  }
  0x47   : > { %v2412_v4 = vld [vmem:[%s3089_s4 + $0x3d0] ss:$8 sps:$4 sm:$0xff]  }
  0x49   : > { %826 = vmatpush1.bf16.msra.mxu0 %v2337_v6  ;;  %966 = vmatpush1.bf16.msra.mxu1 %v2340_v7  ;;  %v2420_v6 = vld [vmem:[%s3089_s4 + $0x3c4] ss:$8 sps:$4 sm:$0xff]   ;;  %v2415_v7 = vld [vmem:[%s3089_s4 + $0x340] ss:$8 sps:$4 sm:$0xff]  }
  0x4a   : > { %827 = vmatprep.subr.bf16.mxu0 %v2345_v8  ;;  %967 = vmatprep.subr.bf16.mxu1 %v2348_v9  ;;  %v2418_v8 = vld [vmem:[%s3089_s4 + $0x3c0] ss:$8 sps:$4 sm:$0xff]   ;;  %v2423_v9 = vld [vmem:[%s3089_s4 + $0x334] ss:$8 sps:$4 sm:$0xff]  }
  0x4d   : > { %828 = vmatpush1.bf16.msra.mxu0 %v2343_v12  ;;  %968 = vmatpush1.bf16.msra.mxu1 %v2346_v13  ;;  %v2424_v12 = vld [vmem:[%s3089_s4 + $0x3b0] ss:$8 sps:$4 sm:$0xff]   ;;  %v2429_v13 = vld [vmem:[%s3089_s4 + $0x324] ss:$8 sps:$4 sm:$0xff]  }
  0x4e   : > { %1093 = vmatprep.subr.bf16.mxu0 %v2351_v14  ;;  %1249 = vmatprep.subr.bf16.mxu1 %v2354_v15  ;;  %v2432_v14 = vld [vmem:[%s3089_s4 + $0x3a4] ss:$8 sps:$4 sm:$0xff]   ;;  %v2427_v15 = vld [vmem:[%s3089_s4 + $0x320] ss:$8 sps:$4 sm:$0xff]  }
  0x50   : > { %846 = vmatmul.mubr.bf16.vlgmr.msra.gmra.mxu0 %v731_v16  ;;  %986 = vmatmul.mubr.bf16.vlgmr.msra.gmra.mxu1 %v1933_v18  ;;  %v2430_v16 = vld [vmem:[%s3089_s4 + $0x3a0] ss:$8 sps:$4 sm:$0xff]   ;;  %v2438_v18 = vld [vmem:[%s3089_s4 + $0x394] ss:$8 sps:$4 sm:$0xff]  }
  0x51   : > { %1094 = vmatpush1.bf16.msra.mxu0 %v2349_v17  ;;  %1250 = vmatpush1.bf16.msra.mxu1 %v2352_v19  ;;  %v2435_v17 = vld [vmem:[%s3089_s4 + $0x314] ss:$8 sps:$4 sm:$0xff]   ;;  %v2433_v19 = vld [vmem:[%s3089_s4 + $0x310] ss:$8 sps:$4 sm:$0xff]  }
  0x52   : > { %1095 = vmatprep.subr.bf16.mxu0 %v2357_v20  ;;  %1251 = vmatprep.subr.bf16.mxu1 %v2360_v21  ;;  %v2436_v20 = vld [vmem:[%s3089_s4 + $0x390] ss:$8 sps:$4 sm:$0xff]   ;;  %v2441_v21 = vld [vmem:[%s3089_s4 + $0x304] ss:$8 sps:$4 sm:$0xff]  }
  0x53   : > { %1125 = vmatprep.mubr.bf16.mxu0 %v2509_v2  ;;  %1281 = vmatprep.mubr.bf16.mxu1 %v2509_v2 }
  0x55   : > { %1096 = vmatpush1.bf16.msra.mxu0 %v2355_v22  ;;  %1252 = vmatpush1.bf16.msra.mxu1 %v2358_v23  ;;  %v2444_v22 = vld [vmem:[%s3089_s4 + $0x384] ss:$8 sps:$4 sm:$0xff]   ;;  %v2439_v23 = vld [vmem:[%s3089_s4 + $0x300] ss:$8 sps:$4 sm:$0xff]  }
  0x56   : > { %1097 = vmatprep.subr.bf16.mxu0 %v2363_v24  ;;  %1253 = vmatprep.subr.bf16.mxu1 %v2366_v25  ;;  %v2442_v24 = vld [vmem:[%s3089_s4 + $0x380] ss:$8 sps:$4 sm:$0xff]   ;;  %v2447_v25 = vld [vmem:[%s3089_s4 + $0x474] ss:$8 sps:$4 sm:$0xff]  }
  0x59   : > { %1098 = vmatpush1.bf16.msra.mxu0 %v2361_v26  ;;  %1254 = vmatpush1.bf16.msra.mxu1 %v2364_v27  ;;  %v420_v26 = vld [vmem:[%s382_s19] sm:$0x3]  ;;  %v2445_v27 = vld [vmem:[%s3089_s4 + $0x470] ss:$8 sps:$4 sm:$0xff]  }
  0x5a   : > { %1099 = vmatprep.subr.bf16.mxu0 %v2369_v28  ;;  %1255 = vmatprep.subr.bf16.mxu1 %v2372_v29  ;;  %v424_v28 = vld [vmem:[%s404_s15] sm:$0x3]  ;;  %v2450_v29 = vld [vmem:[%s3089_s4 + $0x464] ss:$8 sps:$4 sm:$0xff]   ;;  %s1931_s15 = sshll.u32 %s3103_s22, 2 }
  0x5b   : > { %s413_s28 = sadd.s32 %s1931_s15, %s1930_s30 }
  0x5c   : > { %s1932_s14 = sshll.u32 %s413_s28, 1 }
  0x5d   : > { %1100 = vmatpush1.bf16.msra.mxu0 %v2367_v30  ;;  %1256 = vmatpush1.bf16.msra.mxu1 %v2370_v31  ;;  %v2448_v30 = vld [vmem:[%s3089_s4 + $0x460] ss:$8 sps:$4 sm:$0xff]   ;;  %v2453_v31 = vld [vmem:[%s3089_s4 + $0x454] ss:$8 sps:$4 sm:$0xff]   ;;  %s415_s8 = scalar_lea.vmem %s3091_s6, %s1932_s14 }
  0x5e   : > { %1101 = vmatprep.subr.bf16.mxu0 %v2375_v32  ;;  %1257 = vmatprep.subr.bf16.mxu1 %v2378_v33  ;;  %v2451_v32 = vld [vmem:[%s3089_s4 + $0x450] ss:$8 sps:$4 sm:$0xff]   ;;  %v2456_v33 = vld [vmem:[%s3089_s4 + $0x444] ss:$8 sps:$4 sm:$0xff]  }
  0x61   : > { %1102 = vmatpush1.bf16.msra.mxu0 %v2373_v34  ;;  %1258 = vmatpush1.bf16.msra.mxu1 %v2376_v35  ;;  %v2459_v34 = vld [vmem:[%s3089_s4 + $0x434] ss:$8 sps:$4 sm:$0xff]   ;;  %v2457_v35 = vld [vmem:[%s3089_s4 + $0x430] ss:$8 sps:$4 sm:$0xff]  }
  0x62   : > { %1103 = vmatprep.subr.bf16.mxu0 %v2381_v36  ;;  %1259 = vmatprep.subr.bf16.mxu1 %v2384_v37  ;;  %v2462_v36 = vld [vmem:[%s3089_s4 + $0x424] ss:$8 sps:$4 sm:$0xff]   ;;  %v1596_v37 = vrot.slane %v420_v26, %v2757_v58 }
  0x64   : > { %v1598_v43 = vshrl.u32 %v1596_v37, 16 }
  0x65   : > { %1104 = vmatpush1.bf16.msra.mxu0 %v2379_v39  ;;  %1260 = vmatpush1.bf16.msra.mxu1 %v2382_v40  ;;  %v2465_v39 = vld [vmem:[%s3089_s4 + $0x414] ss:$8 sps:$4 sm:$0xff]   ;;  %v1600_v40 = vshll.u32 %v1596_v37, 16 }
  0x66   : > { %1105 = vmatprep.subr.bf16.mxu0 %v2387_v41  ;;  %1261 = vmatprep.subr.bf16.mxu1 %v2390_v42  ;;  %v2463_v41 = vld [vmem:[%s3089_s4 + $0x410] ss:$8 sps:$4 sm:$0xff]   ;;  %v2468_v42 = vld [vmem:[%s3089_s4 + $0x404] ss:$8 sps:$4 sm:$0xff]  }
  0x69   : > { %1106 = vmatpush1.bf16.msra.mxu0 %v2385_v44  ;;  %1262 = vmatpush1.bf16.msra.mxu1 %v2388_v45  ;;  %v1602_v44 = vrot.slane %v1600_v40, 1  ;;  %v2466_v45 = vld [vmem:[%s3089_s4 + $0x400] ss:$8 sps:$4 sm:$0xff]  }
  0x6a   : > { %1107 = vmatprep.subr.bf16.mxu0 %v2393_v46  ;;  %1263 = vmatprep.subr.bf16.mxu1 %v2396_v47 }
  0x6b   : > { %v1603_v46 = vor.u32 %v1602_v44, %v1598_v43 }
  0x6d   : > { %1108 = vmatpush1.bf16.msra.mxu0 %v2391_v50  ;;  %1264 = vmatpush1.bf16.msra.mxu1 %v2394_v51 }
  0x6e   : > { %1389 = vmatprep.subr.bf16.mxu0 %v2399_v52  ;;  %1529 = vmatprep.subr.bf16.mxu1 %v2402_v54 }
  0x70   : > { %1126 = vmatmul.mubr.bf16.vlgmr.msra.gmra.mxu0 %v1934_v55  ;;  %1282 = vmatmul.mubr.bf16.vlgmr.msra.gmra.mxu1 %v1167_v57 }
  0x71   : > { %1390 = vmatpush1.bf16.msra.mxu0 %v2397_v56  ;;  %1530 = vmatpush1.bf16.msra.mxu1 %v2400_v59 }
  0x72   : > { %1391 = vmatprep.subr.bf16.mxu0 %v2405_v60  ;;  %1531 = vmatprep.subr.bf16.mxu1 %v2408_v61 }
  0x73   : > { %1421 = vmatprep.mubr.bf16.mxu0 %v2509_v2  ;;  %1561 = vmatprep.mubr.bf16.mxu1 %v2509_v2 }
  0x75   : > { %1392 = vmatpush1.bf16.msra.mxu0 %v2403_v62  ;;  %1532 = vmatpush1.bf16.msra.mxu1 %v2406_v63 }
  0x76   : > { %1393 = vmatprep.subr.bf16.mxu0 %v2411_v0  ;;  %1533 = vmatprep.subr.bf16.mxu1 %v2414_v1 }
  0x79   : > { %1394 = vmatpush1.bf16.msra.mxu0 %v2409_v3  ;;  %1534 = vmatpush1.bf16.msra.mxu1 %v2412_v4 }
  0x7a   : > { %1395 = vmatprep.subr.bf16.mxu0 %v2417_v5  ;;  %1535 = vmatprep.subr.bf16.mxu1 %v2420_v6 }
  0x7d   : > { %1396 = vmatpush1.bf16.msra.mxu0 %v2415_v7  ;;  %1536 = vmatpush1.bf16.msra.mxu1 %v2418_v8 }
  0x7e   : > { %1397 = vmatprep.subr.bf16.mxu0 %v2423_v9  ;;  %1537 = vmatprep.subr.bf16.mxu1 %v2426_v10 }
  0x81   : > { %1398 = vmatpush1.bf16.msra.mxu0 %v2421_v11  ;;  %1538 = vmatpush1.bf16.msra.mxu1 %v2424_v12 }
  0x82   : > { %1399 = vmatprep.subr.bf16.mxu0 %v2429_v13  ;;  %1539 = vmatprep.subr.bf16.mxu1 %v2432_v14 }
  0x85   : > { %1400 = vmatpush1.bf16.msra.mxu0 %v2427_v15  ;;  %1540 = vmatpush1.bf16.msra.mxu1 %v2430_v16 }
  0x86   : > { %1401 = vmatprep.subr.bf16.mxu0 %v2435_v17  ;;  %1541 = vmatprep.subr.bf16.mxu1 %v2438_v18 }
  0x89   : > { %1402 = vmatpush1.bf16.msra.mxu0 %v2433_v19  ;;  %1542 = vmatpush1.bf16.msra.mxu1 %v2436_v20 }
  0x8a   : > { %1403 = vmatprep.subr.bf16.mxu0 %v2441_v21  ;;  %1543 = vmatprep.subr.bf16.mxu1 %v2444_v22 }
  0x8d   : > { %1404 = vmatpush1.bf16.msra.mxu0 %v2439_v23  ;;  %1544 = vmatpush1.bf16.msra.mxu1 %v2442_v24 }
  0x8e   : > { %1685 = vmatprep.subr.bf16.mxu0 %v2447_v25 }
  0x90   : > { %1422 = vmatmul.mubr.bf16.vlgmr.msra.gmra.mxu0 %v420_v26  ;;  %1562 = vmatmul.mubr.bf16.vlgmr.msra.gmra.mxu1 %v424_v28 }
  0x91   : > { %1686 = vmatpush1.bf16.msra.mxu0 %v2445_v27  ;;  %1717 = vmatprep.mubr.bf16.mxu0 %v2509_v2  ;;  %v2454_v2 = vld [vmem:[%s3089_s4 + $0x440] ss:$8 sps:$4 sm:$0xff]  }
  0x92   : > { %1687 = vmatprep.subr.bf16.mxu0 %v2450_v29  ;;  %v1732_v29 = vsub.s32 0, %v2742_v53 }
  0x95   : > { %1688 = vmatpush1.bf16.msra.mxu0 %v2448_v30  ;;  %v1728_v30 = vld [vmem:[%s3090_s5] sm:$0x3] }
  0x96   : > { %1689 = vmatprep.subr.bf16.mxu0 %v2453_v31 }
  0x99   : > { %1690 = vmatpush1.bf16.msra.mxu0 %v2451_v32  ;;  %v1736_v32 = vsub.s32 1, %v2742_v53 }
  0x9a   : > { %1691 = vmatprep.subr.bf16.mxu0 %v2456_v33 }
  0x9b   : > { %v1737_v37 = vrot.slane %v1728_v30, %v1736_v32 }
  0x9d   : > { %1692 = vmatpush1.bf16.msra.mxu0 %v2454_v2  ;;  %v1733_v2 = vrot.slane %v1728_v30, %v1732_v29 }
  0x9e   : > { %1693 = vmatprep.subr.bf16.mxu0 %v2459_v34 }
  0xa1   : > { %1694 = vmatpush1.bf16.msra.mxu0 %v2457_v35 }
  0xa2   : > { %1695 = vmatprep.subr.bf16.mxu0 %v2462_v36 }
  0xa5   : > { %1696 = vmatpush1.bf16.msra.mxu0 %v2460_v38 }
  0xa6   : > { %1697 = vmatprep.subr.bf16.mxu0 %v2465_v39 }
  0xa9   : > { %1698 = vmatpush1.bf16.msra.mxu0 %v2463_v41 }
  0xaa   : > { %1699 = vmatprep.subr.bf16.mxu0 %v2468_v42 }
  0xad   : > { %1700 = vmatpush1.bf16.msra.mxu0 %v2466_v45 }
  0xb0   : > { %1718 = vmatmul.mubr.bf16.vlgmr.msra.gmra.mxu0 %v1603_v46  ;;  %v1764_v46 = vld [vmem:[%s415_s8] sm:$0xf] }
  0xf0   : > { %v572_v47 = vpop.f32.mrf.mxu0  ;;  %v693_v48 = vpop.f32.mrf.mxu1 }
  0xf1   : > { %v694_v49 = vadd.f32 %v693_v48, %v572_v47 }
  0xf2   : > { %v574_v50 = vpop.f32.mrf.mxu0  ;;  %v695_v51 = vpop.f32.mrf.mxu1 }
  0xf3   : > { %v696_v52 = vadd.f32 %v695_v51, %v574_v50 }
  0xf4   : > { %v576_v54 = vpop.f32.mrf.mxu0  ;;  %v697_v55 = vpop.f32.mrf.mxu1 }
  0xf6   : > { %v577_v56 = vpop.f32.mrf.mxu0  ;;  %v698_v57 = vpop.f32.mrf.mxu1 }
 0x110   : > { %v847_v59 = vpop.f32.mrf.mxu0  ;;  %v987_v60 = vpop.f32.mrf.mxu1 }
 0x111   : > { %v854_v61 = vadd.f32 %v847_v59, %v694_v49 }
 0x112   : > { %v849_v62 = vpop.f32.mrf.mxu0  ;;  %v989_v63 = vpop.f32.mrf.mxu1 }
 0x113   : > { %v855_v0 = vadd.f32 %v849_v62, %v696_v52  ;;  %v994_v1 = vadd.f32 %v987_v60, %v854_v61 }
 0x114   : > { %v851_v3 = vpop.f32.mrf.mxu0  ;;  %v991_v4 = vpop.f32.mrf.mxu1 }
 0x115   : > { %v995_v5 = vadd.f32 %v989_v63, %v855_v0 }
 0x116   : > { %v852_v6 = vpop.f32.mrf.mxu0  ;;  %v992_v7 = vpop.f32.mrf.mxu1 }
 0x130   : > { %v1127_v8 = vpop.f32.mrf.mxu0  ;;  %v1283_v9 = vpop.f32.mrf.mxu1 }
 0x131   : > { %v1134_v24 = vadd.f32 %v1127_v8, %v994_v1 }
 0x132   : > { %v1129_v10 = vpop.f32.mrf.mxu0  ;;  %v1285_v11 = vpop.f32.mrf.mxu1 }
 0x133   : > { %v1135_v25 = vadd.f32 %v1129_v10, %v995_v5  ;;  %v1290_v26 = vadd.f32 %v1283_v9, %v1134_v24 }
 0x134   : > { %v1131_v12 = vpop.f32.mrf.mxu0  ;;  %v1287_v13 = vpop.f32.mrf.mxu1 }
 0x135   : > { %v1291_v27 = vadd.f32 %v1285_v11, %v1135_v25 }
 0x136   : > { %v1132_v14 = vpop.f32.mrf.mxu0  ;;  %v1288_v15 = vpop.f32.mrf.mxu1 }
 0x150   : > { %v1423_v16 = vpop.f32.mrf.mxu0  ;;  %v1563_v17 = vpop.f32.mrf.mxu1 }
 0x151   : > { %v1430_v28 = vadd.f32 %v1423_v16, %v1290_v26 }
 0x152   : > { %v1425_v18 = vpop.f32.mrf.mxu0  ;;  %v1565_v19 = vpop.f32.mrf.mxu1 }
 0x153   : > { %v1431_v31 = vadd.f32 %v1425_v18, %v1291_v27  ;;  %v1570_v33 = vadd.f32 %v1563_v17, %v1430_v28 }
 0x154   : > { %v1427_v20 = vpop.f32.mrf.mxu0  ;;  %v1567_v21 = vpop.f32.mrf.mxu1 }
 0x155   : > { %v1571_v35 = vadd.f32 %v1565_v19, %v1431_v31 }
 0x156   : > { %v1428_v22 = vpop.f32.mrf.mxu0  ;;  %v1568_v23 = vpop.f32.mrf.mxu1 }
 0x170   : > { %v1719_v34 = vpop.f32.mrf.mxu0 }
 0x171   : > { %v1726_v36 = vadd.f32 %v1719_v34, %v1570_v33 }
 0x172   : > { %v1721_v38 = vpop.f32.mrf.mxu0 }
 0x173   : > { %v1740_v39 = vadd.f32 %v1733_v2, %v1726_v36  ;;  %v1727_v40 = vadd.f32 %v1721_v38, %v1571_v35 }
 0x174   : > { %v1723_v41 = vpop.f32.mrf.mxu0 }
 0x175   : > { %v1741_v42 = vadd.f32 %v1737_v37, %v1727_v40  ;;  %v1742_v43 = vmax.f32 %v1740_v39, 0.0 }
 0x176   : > { %v1724_v53 = vpop.f32.mrf.mxu0 }
 0x177   : > { %v1743_v44 = vmax.f32 %v1741_v42, 0.0 }
 0x179   : > { %v2207_v45 = vpack.c.bf16 %v1743_v44, %v1742_v43 }
 0x17b   : > { %v1755_v47 = vrot.slane %v2207_v45, %v2757_v58 }
 0x17d   : > { %v1765_v48 = vsel %vm1763_vm6, %v1755_v47, %v1764_v46 }
 0x17e   : > { %1766 = vst [vmem:[%s415_s8] sm:$0xf] %v1765_v48 }
 0x17f PF: > { %s16_s25 = sadd.s32 1, %s2507_s25   ;;  %s3092_s21 = smov %s2499_s23 }
 0x180   : > { %p13_p9 = scmp.ge.s32.totalorder %s16_s25, 6   ;;  %s3093_s22 = smov %s2503_s24 }
 0x181   : > { %s3094_s23 = smov %s3097_s26  ;;  %s3095_s24 = smov %s3101_s27 }
 0x182   :  { %15 = sbr.rel (!%p13_p9) target bundleno = 3 (0x3), region = 93 }

// kernel: actor_forward.11
= control target key start
LH: loop header
LB: loop body
LE: loop exit
PB: predicated region body
PF: predicated region fallthrough
CT: control target
= control target key end

     0   :  { %10 = vsyncpa [#allocation4], 0  ;;  %s1052_s18 = smov 0   ;;  %s1186_s0 = inlined_call_operand.vmem [shape: bf16[2,1536], index: 0, kind: input, shape index: {}]   ;;  %s1187_s1 = inlined_call_operand.vmem [shape: bf16[1536,128], index: 1, kind: input, shape index: {}]   ;;  %s1188_s2 = inlined_call_operand.vmem [shape: f32[1,128], index: 2, kind: input, shape index: {}]   ;;  %s1189_s3 = inlined_call_operand.vmem [shape: f32[128,6], index: 3, kind: input, shape index: {}]   ;;  %s1190_s4 = inlined_call_operand.vmem [shape: f32[1,6], index: 4, kind: input, shape index: {}]   ;;  %s1191_s5 = inlined_call_operand.hbm [shape: f32[2,6], index: 5, kind: output, shape index: {}]  }
   0x1 LB: > { %s1058_s19 = sadd.s32 4294967295, %s1015_s18   ;;  %p785_p0 = scmp.ge.s32.totalorder %s1015_s18, 1  ;;  %s1015_s18 = sphi %s1052_s18, %s16_s18  }
   0x2   : > { %p194_p1 = scmp.lt.s32.totalorder %s1015_s18, 4 }
   0x4   : > { %p195_p2 = pnand %p785_p0, %p194_p1 }
   0x5   : > { %s786_s20 = sshll.u32 (!%p195_p2), %s1058_s19, 2  ;;  %s787_s21 = sshll.u32 (!%p195_p2), %s1058_s19, 6 }
   0x6   : > { %198 = sbr.rel (%p195_p2) target bundleno = 813 (0x32d), region = 40  ;;  %p222_p3 = scmp.lt.s32.totalorder (!%p195_p2), %s786_s20, 11 }
   0x7   : > { %p227_p4 = scmp.lt.s32.totalorder (!%p195_p2), %s787_s21, 191  ;;  %p789_p5 = scmp.ne.s32.totalorder (!%p195_p2), %s1058_s19, 0 }
   0xb   : > { %s1193_s20 = smov (!%p222_p3, %s786_s20), 11  ;;  %s1195_s21 = smov (!%p227_p4, %s787_s21), 191 }
   0xc   : > { %s224_s24 = scalar_lea.vmem %s1186_s0, %s1193_s20  ;;  %s788_s25 = sshll.u32 %s1195_s21, 2 }
   0xd   : > { %s1073_s28 = scalar_lea.vmem %s1187_s1, %s788_s25  ;;  %236 = sbr.rel (%p789_p5) target bundleno = 20 (0x14), region = 44 }
  0x12   : > { %v1017_v0 = vmov 0.0  }
  0x13   : > { %237 = vst [vmem:[#allocation2] sm:$0x3] %v1017_v0 }
  0x14 PF: > { %v945_v1 = vld [vmem:[%s1073_s28 + $0x78] sm:$0xff]   ;;  %v949_v5 = vld [vmem:[%s1073_s28 + $0x70] sm:$0xff]   ;;  %v953_v9 = vld [vmem:[%s1073_s28 + $0x68] sm:$0xff]   ;;  %v316_v31 = vlaneseq  ;;  %v1018_v35 = vmov 1966171168   ;;  %p823_p6 = scmp.ne.s32.totalorder %s1058_s19, 2 }
  0x15   : > { %v946_v2 = vld [vmem:[%s1073_s28 + $0xf8] sm:$0xff]   ;;  %830 = vmatprep.subr.bf16.mxu0 %v945_v1  ;;  %v950_v6 = vld [vmem:[%s1073_s28 + $0xf0] sm:$0xff]   ;;  %v954_v10 = vld [vmem:[%s1073_s28 + $0xe8] sm:$0xff]   ;;  %v314_v36 = vunpack.c.l.s4 %v1018_v35 }
  0x16   : > { %v947_v3 = vld [vmem:[%s1073_s28 + $0x38] sm:$0xff]   ;;  %852 = vmatprep.subr.bf16.mxu1 %v946_v2  ;;  %v951_v7 = vld [vmem:[%s1073_s28 + $0x30] sm:$0xff]   ;;  %v955_v11 = vld [vmem:[%s1073_s28 + $0x28] sm:$0xff]   ;;  %v317_v37 = vshrl.u32 %v316_v31, 7 }
  0x17   : > { %v948_v4 = vld [vmem:[%s1073_s28 + $0xb8] sm:$0xff]   ;;  %831 = vmatpush3.bf16.msra.mxu0 %v947_v3  ;;  %v952_v8 = vld [vmem:[%s1073_s28 + $0xb0] sm:$0xff]   ;;  %v956_v12 = vld [vmem:[%s1073_s28 + $0xa8] sm:$0xff]   ;;  %v315_v39 = vunpack.c.0.s8 %v314_v36 }
  0x18   : > { %853 = vmatpush3.bf16.msra.mxu1 %v948_v4  ;;  %832 = vmatprep.subr.bf16.mxu0 %v949_v5  ;;  %v957_v13 = vld [vmem:[%s1073_s28 + $0x60] sm:$0xff]   ;;  %v961_v17 = vld [vmem:[%s1073_s28 + $0x58] sm:$0xff]   ;;  %v965_v21 = vld [vmem:[%s1073_s28 + $0x50] sm:$0xff]  }
  0x19   : > { %854 = vmatprep.subr.bf16.mxu1 %v950_v6  ;;  %v958_v14 = vld [vmem:[%s1073_s28 + $0xe0] sm:$0xff]   ;;  %v962_v18 = vld [vmem:[%s1073_s28 + $0xd8] sm:$0xff]   ;;  %v966_v22 = vld [vmem:[%s1073_s28 + $0xd0] sm:$0xff]   ;;  %v318_v40 = vsub.s32 %v315_v39, %v317_v37 }
  0x1a   : > { %v959_v15 = vld [vmem:[%s1073_s28 + $0x20] sm:$0xff]   ;;  %v963_v19 = vld [vmem:[%s1073_s28 + $0x18] sm:$0xff]   ;;  %v967_v23 = vld [vmem:[%s1073_s28 + $0x10] sm:$0xff]  }
  0x1b   : > { %833 = vmatpush3.bf16.msra.mxu0 %v951_v7  ;;  %v960_v16 = vld [vmem:[%s1073_s28 + $0xa0] sm:$0xff]   ;;  %v964_v20 = vld [vmem:[%s1073_s28 + $0x98] sm:$0xff]   ;;  %v968_v24 = vld [vmem:[%s1073_s28 + $0x90] sm:$0xff]  }
  0x1c   : > { %855 = vmatpush3.bf16.msra.mxu1 %v952_v8  ;;  %834 = vmatprep.subr.bf16.mxu0 %v953_v9  ;;  %v969_v25 = vld [vmem:[%s1073_s28 + $0x48] sm:$0xff]   ;;  %v973_v29 = vld [vmem:[%s1073_s28 + $0x40] sm:$0xff]  }
  0x1d   : > { %856 = vmatprep.subr.bf16.mxu1 %v954_v10  ;;  %v970_v26 = vld [vmem:[%s1073_s28 + $0xc8] sm:$0xff]   ;;  %v974_v30 = vld [vmem:[%s1073_s28 + $0xc0] sm:$0xff]  }
  0x1e   : > { %v971_v27 = vld [vmem:[%s1073_s28 + $0x8] sm:$0xff]   ;;  %v975_v32 = vld [vmem:[%s1073_s28] sm:$0xff]  }
  0x1f   : > { %835 = vmatpush3.bf16.msra.mxu0 %v955_v11  ;;  %v972_v28 = vld [vmem:[%s1073_s28 + $0x88] sm:$0xff]   ;;  %v976_v33 = vld [vmem:[%s1073_s28 + $0x80] sm:$0xff]  }
  0x20   : > { %857 = vmatpush3.bf16.msra.mxu1 %v956_v12  ;;  %836 = vmatprep.subr.bf16.mxu0 %v957_v13  ;;  %v790_v34 = vld.sshfl [vmem:[%s224_s24] sm:$0x33 pattern:$0x75316420] }
  0x21   : > { %858 = vmatprep.subr.bf16.mxu1 %v958_v14  ;;  %v312_v38 = vcombine.high %v790_v34, %v790_v34  ;;  %v319_v42 = vrot.slane %v790_v34, %v318_v40  ;;  %v238_v52 = vld [vmem:[#allocation2] sm:$0x3] }
  0x23   : > { %837 = vmatpush3.bf16.msra.mxu0 %v959_v15  ;;  %v326_v41 = vrot.slane %v312_v38, %v318_v40  ;;  %v327_v44 = vcombine.high %v319_v42, %v319_v42 }
  0x24   : > { %859 = vmatpush3.bf16.msra.mxu1 %v960_v16  ;;  %838 = vmatprep.subr.bf16.mxu0 %v961_v17 }
  0x25   : > { %860 = vmatprep.subr.bf16.mxu1 %v962_v18  ;;  %557 = vmatprep.mubr.bf16.mxu0 %v326_v41  ;;  %v328_v43 = vcombine.high %v326_v41, %v326_v41 }
  0x27   : > { %839 = vmatpush3.bf16.msra.mxu0 %v963_v19  ;;  %597 = vmatprep.mubr.bf16.mxu1 %v328_v43 }
  0x28   : > { %861 = vmatpush3.bf16.msra.mxu1 %v964_v20  ;;  %840 = vmatprep.subr.bf16.mxu0 %v965_v21 }
  0x29   : > { %862 = vmatprep.subr.bf16.mxu1 %v966_v22 }
  0x2b   : > { %841 = vmatpush3.bf16.msra.mxu0 %v967_v23 }
  0x2c   : > { %863 = vmatpush3.bf16.msra.mxu1 %v968_v24  ;;  %842 = vmatprep.subr.bf16.mxu0 %v969_v25 }
  0x2d   : > { %864 = vmatprep.subr.bf16.mxu1 %v970_v26 }
  0x2f   : > { %843 = vmatpush3.bf16.msra.mxu0 %v971_v27 }
  0x30   : > { %865 = vmatpush3.bf16.msra.mxu1 %v972_v28  ;;  %844 = vmatprep.subr.bf16.mxu0 %v973_v29 }
  0x31   : > { %866 = vmatprep.subr.bf16.mxu1 %v974_v30 }
  0x33   : > { %845 = vmatpush3.bf16.msra.mxu0 %v975_v32 }
  0x34   : > { %867 = vmatpush3.bf16.msra.mxu1 %v976_v33 }
  0x36   : > { %558 = vmatmul.mubr.bf16.vlgmr.msra.gmra.mxu0 %v319_v42 }
  0x37   : > { %598 = vmatmul.mubr.bf16.vlgmr.msra.gmra.mxu1 %v327_v44 }
  0xf6   : > { %v846_v45 = vpop.f32.mrf.mxu0 }
  0xf7   : > { %v868_v46 = vpop.f32.mrf.mxu1 }
  0xf8   : > { %v847_v47 = vpop.f32.mrf.mxu0 }
  0xf9   : > { %v848_v48 = vadd.f32 %v847_v47, %v846_v45  ;;  %v869_v49 = vpop.f32.mrf.mxu1 }
  0xfa   : > { %v849_v50 = vpop.f32.mrf.mxu0  ;;  %v870_v51 = vadd.f32 %v869_v49, %v868_v46 }
  0xfb   : > { %v871_v53 = vpop.f32.mrf.mxu1 }
  0xfc   : > { %v850_v54 = vpop.f32.mrf.mxu0  ;;  %v600_v55 = vadd.f32 %v870_v51, %v848_v48  ;;  %610 = sbr.rel (%p823_p6) target bundleno = 798 (0x31e), region = 48 }
  0xfd   : > { %v872_v56 = vpop.f32.mrf.mxu1 }
  0xfe   : > { %v605_v57 = vadd.f32 %v600_v55, %v238_v52 }
 0x100   : > { %606 = vst [vmem:[#allocation2] sm:$0x3] %v605_v57 }
 0x101   : > { %v636_v58 = vld [vmem:[%s1189_s3 + $0x78] sm:$0xff]  ;;  %v1019_v59 = vmov 0.0   ;;  %v635_v60 = vld [vmem:[%s1189_s3 + $0x70] sm:$0xff]  ;;  %vm1020_vm0 = vmmov 0   ;;  %v634_v61 = vld [vmem:[%s1189_s3 + $0x68] sm:$0xff]  ;;  %vm714_vm1 = vcmask 41984  }
 0x102   : > { %891 = vmatprep.subr.mxu0 %v1019_v59  ;;  %923 = vmatprep.mubr.msk.f32.mxu0 %vm1020_vm0, %v1019_v59  ;;  %v633_v62 = vld [vmem:[%s1189_s3 + $0x60] sm:$0xff]  ;;  %v632_v63 = vld [vmem:[%s1189_s3 + $0x58] sm:$0xff]  ;;  %v631_v0 = vld [vmem:[%s1189_s3 + $0x50] sm:$0xff] }
 0x103   : > { %892 = vmatpush3.msra.mxu0 %v636_v58  ;;  %v630_v1 = vld [vmem:[%s1189_s3 + $0x48] sm:$0xff]  ;;  %v629_v2 = vld [vmem:[%s1189_s3 + $0x40] sm:$0xff]  ;;  %v628_v3 = vld [vmem:[%s1189_s3 + $0x38] sm:$0xff] }
 0x104   : > { %893 = vmatprep.subr.mxu0 %v1019_v59  ;;  %v627_v4 = vld [vmem:[%s1189_s3 + $0x30] sm:$0xff]  ;;  %v626_v5 = vld [vmem:[%s1189_s3 + $0x28] sm:$0xff]  ;;  %v625_v6 = vld [vmem:[%s1189_s3 + $0x20] sm:$0xff] }
 0x105   : > { %894 = vmatpush3.msra.mxu0 %v635_v60  ;;  %v824_v8 = vld [vmem:[%s1188_s2] ss:$0 sm:$0xff]  ;;  %v624_v9 = vld [vmem:[%s1189_s3 + $0x18] sm:$0xff]  ;;  %v623_v10 = vld [vmem:[%s1189_s3 + $0x10] sm:$0xff] }
 0x106   : > { %895 = vmatprep.subr.mxu0 %v1019_v59  ;;  %v622_v12 = vld [vmem:[%s1189_s3 + $0x8] sm:$0xff]  ;;  %v621_v13 = vld [vmem:[%s1189_s3] sm:$0xff] }
 0x107   : > { %896 = vmatpush3.msra.mxu0 %v634_v61  ;;  %v611_v7 = vld [vmem:[#allocation2] sm:$0x3] }
 0x108   : > { %897 = vmatprep.subr.mxu0 %v1019_v59  ;;  %v619_v11 = vadd.f32 %v824_v8, %v611_v7  ;;  %v825_v15 = vld [vmem:[%s1190_s4] ss:$0 sm:$0xff] }
 0x109   : > { %898 = vmatpush3.msra.mxu0 %v633_v62 }
 0x10a   : > { %899 = vmatprep.subr.mxu0 %v1019_v59  ;;  %v620_v14 = vmax.f32 %v619_v11, 0.0 }
 0x10b   : > { %900 = vmatpush3.msra.mxu0 %v632_v63 }
 0x10c   : > { %901 = vmatprep.subr.mxu0 %v1019_v59 }
 0x10d   : > { %902 = vmatpush3.msra.mxu0 %v631_v0 }
 0x10e   : > { %903 = vmatprep.subr.mxu0 %v1019_v59 }
 0x10f   : > { %904 = vmatpush3.msra.mxu0 %v630_v1 }
 0x110   : > { %905 = vmatprep.subr.mxu0 %v1019_v59 }
 0x111   : > { %906 = vmatpush3.msra.mxu0 %v629_v2 }
 0x112   : > { %907 = vmatprep.subr.mxu0 %v1019_v59 }
 0x113   : > { %908 = vmatpush3.msra.mxu0 %v628_v3 }
 0x114   : > { %909 = vmatprep.subr.mxu0 %v1019_v59 }
 0x115   : > { %910 = vmatpush3.msra.mxu0 %v627_v4 }
 0x116   : > { %911 = vmatprep.subr.mxu0 %v1019_v59 }
 0x117   : > { %912 = vmatpush3.msra.mxu0 %v626_v5 }
 0x118   : > { %913 = vmatprep.subr.mxu0 %v1019_v59 }
 0x119   : > { %914 = vmatpush3.msra.mxu0 %v625_v6 }
 0x11a   : > { %915 = vmatprep.subr.mxu0 %v1019_v59 }
 0x11b   : > { %916 = vmatpush3.msra.mxu0 %v624_v9 }
 0x11c   : > { %917 = vmatprep.subr.mxu0 %v1019_v59 }
 0x11d   : > { %918 = vmatpush3.msra.mxu0 %v623_v10 }
 0x11e   : > { %919 = vmatprep.subr.mxu0 %v1019_v59 }
 0x11f   : > { %920 = vmatpush3.msra.mxu0 %v622_v12 }
 0x120   : > { %921 = vmatprep.subr.mxu0 %v1019_v59 }
 0x121   : > { %922 = vmatpush3.msra.mxu0 %v621_v13 }
 0x122   : > { %924 = vmatmul.mubr.f32.vlgmr.msra.gmra.mxu0 %v620_v14 }
 0x1e2   : > { %v710_v16 = vpop.f32.mrf.mxu0 }
 0x1e3   : > { %v711_v17 = vadd.f32 %v825_v15, %v710_v16 }
 0x1e4   : > { %v925_v18 = vpop.f32.mrf.mxu0 }
 0x1e5   : > { %v715_v19 = vsel %vm714_vm1, %v711_v17, -inf }
 0x1e6   : > { %716 = vmax.xlane.f32.xlu0 %v715_v19 }
 0x26f   : > { %v717_v20 = vpop.xlane.xlu0 %716 }
 0x270   : > { %v718_v21 = vsub.f32 %v711_v17, %v717_v20 }
 0x272   : > { %v719_v22 = vmul.f32 1.442695, %v718_v21 }
 0x274   : > { %977 = vpow2.f32 %v719_v22 }
 0x281   : > { %v978_v23 = vpop.eup %977 }
 0x282   : > { %v721_v24 = vsel %vm714_vm1, %v978_v23, 0.0 }
 0x283   : > { %722 = vadd.xlane.f32.xlu0 %v721_v24 }
 0x30c   : > { %v723_v25 = vpop.xlane.xlu0 %722 }
 0x30d   : > { %979 = vrcp.f32 %v723_v25 }
 0x31a   : > { %v980_v26 = vpop.eup %979 }
 0x31b   : > { %v725_v27 = vmul.f32 %v980_v26, %v978_v23 }
 0x31d   : > { %726 = vst.msk [vmem:[#allocation3] sm:$0x3] %vm714_vm1, %v725_v27 }
 0x31e PF: > { %p930_p7 = scmp.eq.s32.totalorder %s1058_s19, 2  ;;  %s1021_s21 = smov [#allocation3]  }
 0x31f   : > { %s734_s22 = sshll.u32 %s1021_s21, 4  ;;  %s735_s22 = int_to_ptr.vmem [resolvable:$true] %s734_s22 }
 0x320   : > { %s981_s23 = scalar_lea.vmem %s735_s22, 32  ;;  %p988_p11 = scmp.lt.s32.totalorder %s735_s22, %s735_s22 }
 0x321   : > { %p982_p8 = scmp.ne.s32.totalorder %s735_s22, %s981_s23  ;;  %p989_p12 = scmp.lt.s32.totalorder %s981_s23, %s981_s23 }
 0x323   : > { %p983_p9 = pnand %p982_p8, %p930_p7  ;;  %p990_p13 = por %p989_p12, %p988_p11 }
 0x325   : > { %p984_p10 = pneg %p983_p9 }
 0x327   : > { %p991_p0 = pnand %p990_p13, %p984_p10 }
 0x329   : > { %994 = shalt.err (!%p991_p0)
}
 0x32a   : > { %927 = dma.vmem_to_hbm [thread:$0]  (%p930_p7), %s735_s22, 32, %s1191_s5, [#allocation4]  }
 0x32b   : > { %1010 = dma.done.wait (%p930_p7), [#allocation4], 32  }
 0x32c   : > { %1012 = vsyncadd (%p930_p7), [#allocation4], 4294967264 }
 0x32d PF: > { %s16_s18 = sadd.s32 1, %s1015_s18  }
 0x32e   : > { %p13_p1 = scmp.ge.s32.totalorder %s16_s18, 5  }
 0x330   :  { %15 = sbr.rel (!%p13_p1) target bundleno = 1 (0x1), region = 78 }
 0x335   :  { %747 = vsyncpa [#allocation4], 1 }
 0x336   :  { %749 = vsyncpa [#allocation4 + $0x1], 1 }

</bundles_post_ra>
